<compile_context>
chip_gen: v7x
topology: tpu7x:2x2x1
jax: 0.10.0
libtpu: 0.0.40
codegen_flags: <defaults>
</compile_context>

<pallas_src>
import math

import jax
import jax.numpy as jnp
from jax.experimental import pallas as pl
from jax.experimental.pallas import tpu as pltpu


def _relu(v):
    return jnp.maximum(v, 0.0)


def _softplus(v):
    # torch.nn.Softplus (threshold=20 linearization omitted; logaddexp is stable)
    return jnp.logaddexp(v, 0.0)


def vrnn_kernel(
    # inputs
    x_ref, eps_ref,
    wx1_ref, bx1_ref, wx2_ref, bx2_ref,      # phi_x MLP
    wpx_ref, bpx_ref,                        # fused [we1x | W_i(phi_x half)], bias=[be1|0]
    we2_ref, be2_ref,                        # enc layer 2
    wenc_ref, benc_ref,                      # fused [enc_mean | enc_std]
    wh5_ref, bh5_ref,                        # fused [we1h | w_prior | W_hh], bias=[0|bp|0]
    wpri_ref, bpri_ref,                      # fused [prior_mean | prior_std]
    wz_ref, bz_ref,                          # phi_z
    wizz_ref,                                # GRU W_i (phi_z half), (H, 3H)
    # outputs
    stats_ref,                               # (TB, BP, 4Z) packed per-step stats
    res_ref,                                 # (BP, 2H) = cat(phi_z_T, h_T), written on last chunk
    # scratch
    h_scr,                                   # (BP, H) hidden-state carry across chunks
):
    TC = eps_ref.shape[0]          # time-chunk length (static)
    BB = eps_ref.shape[1]          # padded batch
    Z = eps_ref.shape[2]
    H = wx1_ref.shape[1]
    f32 = jnp.float32

    tc = pl.program_id(0)
    n_tc = pl.num_programs(0)

    # ---- weights: read once per chunk ----
    wx1 = wx1_ref[...]; wx2 = wx2_ref[...]
    wpx = wpx_ref[...]; we2 = we2_ref[...]; wenc = wenc_ref[...]
    wh5 = wh5_ref[...]; wpri = wpri_ref[...]
    wz = wz_ref[...]; wizz = wizz_ref[...]

    def dot(a, w):
        # bf16 (or f32) operands, f32 accumulation on the MXU
        return jnp.dot(a.astype(w.dtype), w, preferred_element_type=f32)

    def bb(b_ref, rows):
        return jnp.broadcast_to(b_ref[...].astype(f32), (rows, b_ref.shape[-1]))

    # hoisted bias broadcasts (JAX does not CSE broadcast_in_dim)
    be2b = bb(be2_ref, BB); bencb = bb(benc_ref, BB)
    bh5b = bb(bh5_ref, BB); bprib = bb(bpri_ref, BB); bzb = bb(bz_ref, BB)

    # ---- chunk-level (h-independent) work: phi_x MLP + its fused projection ----
    TCB = TC * BB
    x2 = x_ref[...]                                        # (TC*BB, D) f32
    hx = _relu(dot(x2, wx1) + bb(bx1_ref, TCB))
    phi_x = _relu(dot(hx, wx2) + bb(bx2_ref, TCB))
    # px[:, :H]  = phi_x @ we1x + be1   (enc layer-1 contribution)
    # px[:, H:]  = phi_x @ W_i_x        (GRU input-side contribution, 3H lanes)
    px = dot(phi_x, wpx) + bb(bpx_ref, TCB)                # (TC*BB, 4H)

    @pl.when(tc == 0)
    def _():
        h_scr[...] = jnp.zeros_like(h_scr)

    h = h_scr[...]                                         # (BB, H) f32
    phi_z = jnp.zeros((BB, H), f32)

    # ---- recurrence: fully unrolled over the (small, static) chunk ----
    for t in range(TC):
        px_t = px[t * BB:(t + 1) * BB]                     # (BB, 4H) static slice
        eps_t = eps_ref[t]                                 # (BB, Z)

        # one fused h-LHS matmul: [enc-h | prior(+bp) | GRU hh]  -> (BB, 5H)
        hproj = dot(h, wh5) + bh5b

        # encoder
        e1 = _relu(px_t[:, :H] + hproj[:, :H])             # enc layer 1 (be1 fused in px)
        e2 = _relu(dot(e1, we2) + be2b)                    # enc layer 2
        enc_stats = dot(e2, wenc) + bencb                  # (BB, 2Z) [mean | std_pre]
        enc_mean = enc_stats[:, :Z]
        enc_std = _softplus(enc_stats[:, Z:])              # softplus only on the std half

        # prior
        p = _relu(hproj[:, H:2 * H])                       # bp fused into bh5
        pri_stats = dot(p, wpri) + bprib                   # (BB, 2Z)
        pri_mean = pri_stats[:, :Z]
        pri_std = _softplus(pri_stats[:, Z:])

        # reparameterized sample + phi_z
        z = eps_t * enc_std + enc_mean
        phi_z = _relu(dot(z, wz) + bzb)

        # single-step GRU (bias=False), PyTorch gate order r, z, n
        ii = px_t[:, H:] + dot(phi_z, wizz)                # (BB, 3H)
        hh = hproj[:, 2 * H:]                              # (BB, 3H)
        r = jax.nn.sigmoid(ii[:, :H] + hh[:, :H])
        zg = jax.nn.sigmoid(ii[:, H:2 * H] + hh[:, H:2 * H])
        n = jnp.tanh(ii[:, 2 * H:] + r * hh[:, 2 * H:])
        h = (1.0 - zg) * n + zg * h

        # direct slice stores (no in-loop concatenate)
        stats_ref[t, :, 0:Z] = enc_mean
        stats_ref[t, :, Z:2 * Z] = enc_std
        stats_ref[t, :, 2 * Z:3 * Z] = pri_mean
        stats_ref[t, :, 3 * Z:4 * Z] = pri_std

    # carry hidden state to the next chunk
    h_scr[...] = h

    # res = cat(phi_z_T, h_T), written once on the last chunk
    @pl.when(tc == n_tc - 1)
    def _():
        res_ref[:, :H] = phi_z
        res_ref[:, H:] = h


def vrnn_encoder_forward(x_btd, eps_tbz, params, *, time_block=None,
                         weight_dtype=jnp.bfloat16):
    """x_btd: (B, T, D) float32.  eps_tbz: (T, B, Z) float32 N(0,1) draws."""
    (wx1, bx1, wx2, bx2, we1, be1, we2, be2, wem, bem, wes, bes,
     wp, bp, wpm, bpm, wps, bps, wz, bz,
     wir, wiz, win, whr, whz, whn) = params

    B, T, D = x_btd.shape
    Z = eps_tbz.shape[-1]
    H = wx1.shape[1]

    # pad batch to a multiple of 8 sublanes; padded rows (zero inputs) compute
    # harmless finite garbage that is sliced off and never mixes with real rows
    BP = max(8, ((B + 7) // 8) * 8)
    x_tbd = jnp.transpose(x_btd, (1, 0, 2)).astype(jnp.float32)      # time-major
    x_tbd = jnp.pad(x_tbd, ((0, 0), (0, BP - B), (0, 0)))
    x_flat = x_tbd.reshape(T * BP, D)                                # (T*BP, D): no in-kernel reshape
    eps = jnp.pad(eps_tbz.astype(jnp.float32), ((0, 0), (0, BP - B), (0, 0)))

    # ---- weight fusion / splitting done once in the wrapper ----
    we1_x, we1_h = we1[:H], we1[H:]                        # enc layer-1 split (phi_x / h halves)
    w_i = jnp.concatenate([wir, wiz, win], axis=1)         # (2H, 3H) GRU input weights
    w_ix, w_izz = w_i[:H], w_i[H:]                         # phi_x / phi_z halves
    w_hh = jnp.concatenate([whr, whz, whn], axis=1)        # (H, 3H) GRU hidden weights

    w_px = jnp.concatenate([we1_x, w_ix], axis=1)          # (H, 4H)  phi_x-consumers, fused
    b_px = jnp.concatenate([be1, jnp.zeros((1, 3 * H), be1.dtype)], axis=1)
    w_h5 = jnp.concatenate([we1_h, wp, w_hh], axis=1)      # (H, 5H)  h-consumers, fused
    b_h5 = jnp.concatenate([jnp.zeros((1, H), bp.dtype), bp,
                            jnp.zeros((1, 3 * H), bp.dtype)], axis=1)
    w_enc = jnp.concatenate([wem, wes], axis=1)            # (H, 2Z)
    b_enc = jnp.concatenate([bem, bes], axis=1)
    w_pri = jnp.concatenate([wpm, wps], axis=1)            # (H, 2Z)
    b_pri = jnp.concatenate([bpm, bps], axis=1)

    Wc = lambda a: a.astype(weight_dtype)                  # matmul weights
    Bc = lambda a: a.astype(jnp.float32)                   # biases stay f32
    weights = [Wc(wx1), Bc(bx1), Wc(wx2), Bc(bx2),
               Wc(w_px), Bc(b_px),
               Wc(we2), Bc(be2),
               Wc(w_enc), Bc(b_enc),
               Wc(w_h5), Bc(b_h5),
               Wc(w_pri), Bc(b_pri),
               Wc(wz), Bc(bz),
               Wc(w_izz)]

    # time chunking: chunk must divide T (time padding would change h / res)
    if time_block is None:
        time_block = 1
        for cand in range(min(T, 8), 0, -1):
            if T % cand == 0:
                time_block = cand
                break
    assert T % time_block == 0, "time_block must divide T"
    TB = time_block
    n_t = T // TB

    x_spec = pl.BlockSpec((TB * BP, D), lambda tc: (tc, 0))
    eps_spec = pl.BlockSpec((TB, BP, Z), lambda tc: (tc, 0, 0))

    def w_spec(a):
        nd = a.ndim
        return pl.BlockSpec(a.shape, lambda tc, _nd=nd: (0,) * _nd)

    in_specs = [x_spec, eps_spec] + [w_spec(w) for w in weights]
    out_specs = [
        pl.BlockSpec((TB, BP, 4 * Z), lambda tc: (tc, 0, 0)),   # packed stats (per-chunk)
        pl.BlockSpec((BP, 2 * H), lambda tc: (0, 0)),           # res (resident, last chunk)
    ]
    out_shape = (
        jax.ShapeDtypeStruct((T, BP, 4 * Z), jnp.float32),
        jax.ShapeDtypeStruct((BP, 2 * H), jnp.float32),
    )

    # VMEM budget + advisory cost estimate
    def _nbytes(shape, dtype):
        return math.prod(shape) * jnp.dtype(dtype).itemsize

    w_bytes = sum(_nbytes(w.shape, w.dtype) for w in weights)
    blk_bytes = (2 * _nbytes((TB * BP, D), jnp.float32)
                 + 2 * _nbytes((TB, BP, Z), jnp.float32)
                 + 2 * _nbytes((TB, BP, 4 * Z), jnp.float32)
                 + _nbytes((BP, 2 * H), jnp.float32)
                 + 2 * w_bytes
                 + _nbytes((BP, H), jnp.float32)
                 + _nbytes((TB * BP, 4 * H), jnp.float32))
    vmem_limit = int(min(max(2 * blk_bytes + (4 << 20), 16 << 20), 64 << 20))

    macs = (D * H + H * H + H * 4 * H + H * 5 * H + H * H
            + 2 * (H * 2 * Z) + Z * H + H * 3 * H)
    cost = pl.CostEstimate(
        flops=int(2 * T * BP * macs),
        transcendentals=int(T * BP * (3 * H + 8 * Z)),
        bytes_accessed=int(_nbytes((T * BP, D), jnp.float32)
                           + _nbytes((T, BP, Z), jnp.float32)
                           + _nbytes((T, BP, 4 * Z), jnp.float32)
                           + _nbytes((BP, 2 * H), jnp.float32)
                           + w_bytes),
    )

    fn = pl.pallas_call(
        vrnn_kernel,
        grid=(n_t,),
        in_specs=in_specs,
        out_specs=out_specs,
        out_shape=out_shape,
        scratch_shapes=[pltpu.VMEM((BP, H), jnp.float32)],
        compiler_params=pltpu.CompilerParams(
            dimension_semantics=("arbitrary",),
            vmem_limit_bytes=vmem_limit),
        cost_estimate=cost,
    )
    stats, res = fn(x_flat, eps, *weights)

    stats = stats[:, :B, :]
    enc_mean = stats[..., 0:Z]
    enc_std = stats[..., Z:2 * Z]
    prior_mean = stats[..., 2 * Z:3 * Z]
    prior_std = stats[..., 3 * Z:4 * Z]
    res = res[:B]
    return res, enc_mean, enc_std, prior_mean, prior_std


def init_params(key, D, H, Z):
    """Deterministic synthetic parameters (torch-Linear layout transposed to (in, out))."""
    keys = iter(jax.random.split(key, 40))

    def lin(fan_in, fan_out):
        w = jax.random.normal(next(keys), (fan_in, fan_out), jnp.float32) / jnp.sqrt(fan_in)
        b = jax.random.normal(next(keys), (1, fan_out), jnp.float32) * 0.01
        return w, b

    def mat(fan_in, fan_out):
        return jax.random.normal(next(keys), (fan_in, fan_out), jnp.float32) / jnp.sqrt(fan_in)

    wx1, bx1 = lin(D, H)
    wx2, bx2 = lin(H, H)
    we1, be1 = lin(2 * H, H)
    we2, be2 = lin(H, H)
    wem, bem = lin(H, Z)
    wes, bes = lin(H, Z)
    wp, bp = lin(H, H)
    wpm, bpm = lin(H, Z)
    wps, bps = lin(H, Z)
    wz, bz = lin(Z, H)
    wir, wiz, win = mat(2 * H, H), mat(2 * H, H), mat(2 * H, H)
    whr, whz, whn = mat(H, H), mat(H, H), mat(H, H)
    return [wx1, bx1, wx2, bx2, we1, be1, we2, be2, wem, bem, wes, bes,
            wp, bp, wpm, bpm, wps, bps, wz, bz,
            wir, wiz, win, whr, whz, whn]


def reference_forward(x_btd, eps_tbz, params, matmul_dtype=jnp.float32):
    """Pure-JAX replica of the PyTorch forward (padded_input=False path).
    matmul_dtype lets the reference mimic the kernel's bf16-operand /
    f32-accumulation matmuls so structural correctness is checked tightly."""
    (wx1, bx1, wx2, bx2, we1, be1, we2, be2, wem, bem, wes, bes,
     wp, bp, wpm, bpm, wps, bps, wz, bz,
     wir, wiz, win, whr, whz, whn) = params
    B, T, D = x_btd.shape
    H = wx1.shape[1]
    md = matmul_dtype
    mm = lambda a, w: jnp.dot(a.astype(md), w.astype(md),
                              preferred_element_type=jnp.float32)
    relu = lambda v: jnp.maximum(v, 0.0)
    sp = lambda v: jnp.logaddexp(v, 0.0)
    h = jnp.zeros((B, H), jnp.float32)
    ems, ess, pms, pss = [], [], [], []
    phi_z = None
    for t in range(T):
        xt = x_btd[:, t].astype(jnp.float32)
        phi_x = relu(mm(relu(mm(xt, wx1) + bx1), wx2) + bx2)
        e = relu(mm(relu(mm(jnp.concatenate([phi_x, h], -1), we1) + be1), we2) + be2)
        em = mm(e, wem) + bem
        es = sp(mm(e, wes) + bes)
        p = relu(mm(h, wp) + bp)
        pm = mm(p, wpm) + bpm
        ps = sp(mm(p, wps) + bps)
        z = eps_tbz[t] * es + em
        phi_z = relu(mm(z, wz) + bz)
        ri = jnp.concatenate([phi_x, phi_z], -1)
        r = jax.nn.sigmoid(mm(ri, wir) + mm(h, whr))
        zg = jax.nn.sigmoid(mm(ri, wiz) + mm(h, whz))
        n = jnp.tanh(mm(ri, win) + r * mm(h, whn))
        h = (1.0 - zg) * n + zg * h
        ems.append(em); ess.append(es); pms.append(pm); pss.append(ps)
    res = jnp.concatenate([phi_z, h], -1)
    return res, jnp.stack(ems), jnp.stack(ess), jnp.stack(pms), jnp.stack(pss)


if __name__ == "__main__":
    B, T, D, H, Z = 4, 6, 16, 32, 8
    key = jax.random.PRNGKey(0)
    k_x, k_eps, k_p = jax.random.split(key, 3)

    x = jax.random.normal(k_x, (B, T, D), jnp.float32)
    # TODO(synk): torch draws eps in-place per step (torch.empty(...).normal_());
    # here the N(0,1) draws are precomputed deterministically and fed in.
    eps = jax.random.normal(k_eps, (T, B, Z), jnp.float32)
    params = init_params(k_p, D, H, Z)

    # tight check against a reference that mimics the kernel's bf16 matmul casts,
    # looser check against the pure-f32 reference (bf16 is an intentional approx.)
    refs_bf16 = reference_forward(x, eps, params, matmul_dtype=jnp.bfloat16)
    refs_f32 = reference_forward(x, eps, params, matmul_dtype=jnp.float32)
    names = ["res", "enc_mean", "enc_std", "prior_mean", "prior_std"]

    # exercise single-chunk (default -> TB=6), 2-chunk (TB=3) and 3-chunk (TB=2) paths
    for tb in (None, 3, 2):
        outs = vrnn_encoder_forward(x, eps, params, time_block=tb)
        outs = jax.tree_util.tree_map(jax.block_until_ready, outs)
        for name, a, rb, rf in zip(names, outs, refs_bf16, refs_f32):
            assert a.shape == rb.shape, (name, a.shape, rb.shape)
            assert jnp.allclose(a, rb, rtol=1e-3, atol=1e-3), \
                f"mismatch (bf16 ref) in {name} (time_block={tb})"
            assert jnp.allclose(a, rf, rtol=5e-2, atol=5e-2), \
                f"mismatch (f32 ref) in {name} (time_block={tb})"

    print("KERNEL_OK")
</pallas_src>

<mosaic_0001>
module attributes {stable_mosaic.version = 11 : i64} {
  func.func @vrnn_kernel(%arg0: i32, %arg1: memref<48x16xf32, #tpu.memory_space<vmem>>, %arg2: memref<6x8x8xf32, #tpu.memory_space<vmem>>, %arg3: memref<16x32xbf16, #tpu.memory_space<vmem>>, %arg4: memref<1x32xf32, #tpu.memory_space<vmem>>, %arg5: memref<32x32xbf16, #tpu.memory_space<vmem>>, %arg6: memref<1x32xf32, #tpu.memory_space<vmem>>, %arg7: memref<32x128xbf16, #tpu.memory_space<vmem>>, %arg8: memref<1x128xf32, #tpu.memory_space<vmem>>, %arg9: memref<32x32xbf16, #tpu.memory_space<vmem>>, %arg10: memref<1x32xf32, #tpu.memory_space<vmem>>, %arg11: memref<32x16xbf16, #tpu.memory_space<vmem>>, %arg12: memref<1x16xf32, #tpu.memory_space<vmem>>, %arg13: memref<32x160xbf16, #tpu.memory_space<vmem>>, %arg14: memref<1x160xf32, #tpu.memory_space<vmem>>, %arg15: memref<32x16xbf16, #tpu.memory_space<vmem>>, %arg16: memref<1x16xf32, #tpu.memory_space<vmem>>, %arg17: memref<8x32xbf16, #tpu.memory_space<vmem>>, %arg18: memref<1x32xf32, #tpu.memory_space<vmem>>, %arg19: memref<32x96xbf16, #tpu.memory_space<vmem>>, %arg20: memref<6x8x32xf32, #tpu.memory_space<vmem>>, %arg21: memref<8x64xf32, #tpu.memory_space<vmem>>, %arg22: memref<8x32xf32, #tpu.memory_space<vmem>>) attributes {dimension_semantics = [#tpu.dimension_semantics<arbitrary>], iteration_bounds = array<i64: 1>, scalar_prefetch = 0 : i64, scratch_operands = 1 : i64, tpu.core_type = #tpu.core_type<tc>, window_params = [{transform_indices = @transform_0, window_bounds = array<i64: 48, 16>}, {transform_indices = @transform_1, window_bounds = array<i64: 6, 8, 8>}, {pipeline_mode = #tpu.pipeline_mode<synchronous>, transform_indices = @transform_2, window_bounds = array<i64: 16, 32>}, {pipeline_mode = #tpu.pipeline_mode<synchronous>, transform_indices = @transform_3, window_bounds = array<i64: 1, 32>}, {pipeline_mode = #tpu.pipeline_mode<synchronous>, transform_indices = @transform_4, window_bounds = array<i64: 32, 32>}, {pipeline_mode = #tpu.pipeline_mode<synchronous>, transform_indices = @transform_5, window_bounds = array<i64: 1, 32>}, {pipeline_mode = #tpu.pipeline_mode<synchronous>, transform_indices = @transform_6, window_bounds = array<i64: 32, 128>}, {pipeline_mode = #tpu.pipeline_mode<synchronous>, transform_indices = @transform_7, window_bounds = array<i64: 1, 128>}, {pipeline_mode = #tpu.pipeline_mode<synchronous>, transform_indices = @transform_8, window_bounds = array<i64: 32, 32>}, {pipeline_mode = #tpu.pipeline_mode<synchronous>, transform_indices = @transform_9, window_bounds = array<i64: 1, 32>}, {pipeline_mode = #tpu.pipeline_mode<synchronous>, transform_indices = @transform_10, window_bounds = array<i64: 32, 16>}, {pipeline_mode = #tpu.pipeline_mode<synchronous>, transform_indices = @transform_11, window_bounds = array<i64: 1, 16>}, {pipeline_mode = #tpu.pipeline_mode<synchronous>, transform_indices = @transform_12, window_bounds = array<i64: 32, 160>}, {pipeline_mode = #tpu.pipeline_mode<synchronous>, transform_indices = @transform_13, window_bounds = array<i64: 1, 160>}, {pipeline_mode = #tpu.pipeline_mode<synchronous>, transform_indices = @transform_14, window_bounds = array<i64: 32, 16>}, {pipeline_mode = #tpu.pipeline_mode<synchronous>, transform_indices = @transform_15, window_bounds = array<i64: 1, 16>}, {pipeline_mode = #tpu.pipeline_mode<synchronous>, transform_indices = @transform_16, window_bounds = array<i64: 8, 32>}, {pipeline_mode = #tpu.pipeline_mode<synchronous>, transform_indices = @transform_17, window_bounds = array<i64: 1, 32>}, {pipeline_mode = #tpu.pipeline_mode<synchronous>, transform_indices = @transform_18, window_bounds = array<i64: 32, 96>}, {transform_indices = @transform_19, window_bounds = array<i64: 6, 8, 32>}, {pipeline_mode = #tpu.pipeline_mode<synchronous>, transform_indices = @transform_20, window_bounds = array<i64: 8, 64>}]} {
    %c0 = arith.constant 0 : index
    %c0_0 = arith.constant 0 : index
    %0 = vector.load %arg3[%c0, %c0_0] : memref<16x32xbf16, #tpu.memory_space<vmem>>, vector<16x32xbf16>
    %c0_1 = arith.constant 0 : index
    %c0_2 = arith.constant 0 : index
    %1 = vector.load %arg5[%c0_1, %c0_2] : memref<32x32xbf16, #tpu.memory_space<vmem>>, vector<32x32xbf16>
    %c0_3 = arith.constant 0 : index
    %c0_4 = arith.constant 0 : index
    %2 = vector.load %arg7[%c0_3, %c0_4] : memref<32x128xbf16, #tpu.memory_space<vmem>>, vector<32x128xbf16>
    %c0_5 = arith.constant 0 : index
    %c0_6 = arith.constant 0 : index
    %3 = vector.load %arg9[%c0_5, %c0_6] : memref<32x32xbf16, #tpu.memory_space<vmem>>, vector<32x32xbf16>
    %c0_7 = arith.constant 0 : index
    %c0_8 = arith.constant 0 : index
    %4 = vector.load %arg11[%c0_7, %c0_8] : memref<32x16xbf16, #tpu.memory_space<vmem>>, vector<32x16xbf16>
    %c0_9 = arith.constant 0 : index
    %c0_10 = arith.constant 0 : index
    %5 = vector.load %arg13[%c0_9, %c0_10] : memref<32x160xbf16, #tpu.memory_space<vmem>>, vector<32x160xbf16>
    %c0_11 = arith.constant 0 : index
    %c0_12 = arith.constant 0 : index
    %6 = vector.load %arg15[%c0_11, %c0_12] : memref<32x16xbf16, #tpu.memory_space<vmem>>, vector<32x16xbf16>
    %c0_13 = arith.constant 0 : index
    %c0_14 = arith.constant 0 : index
    %7 = vector.load %arg17[%c0_13, %c0_14] : memref<8x32xbf16, #tpu.memory_space<vmem>>, vector<8x32xbf16>
    %c0_15 = arith.constant 0 : index
    %c0_16 = arith.constant 0 : index
    %8 = vector.load %arg19[%c0_15, %c0_16] : memref<32x96xbf16, #tpu.memory_space<vmem>>, vector<32x96xbf16>
    %c0_17 = arith.constant 0 : index
    %c0_18 = arith.constant 0 : index
    %9 = vector.load %arg10[%c0_17, %c0_18] : memref<1x32xf32, #tpu.memory_space<vmem>>, vector<1x32xf32>
    %10 = vector.shape_cast %9 : vector<1x32xf32> to vector<1x32xf32>
    %11 = vector.broadcast %10 : vector<1x32xf32> to vector<8x32xf32>
    %c0_19 = arith.constant 0 : index
    %c0_20 = arith.constant 0 : index
    %12 = vector.load %arg12[%c0_19, %c0_20] : memref<1x16xf32, #tpu.memory_space<vmem>>, vector<1x16xf32>
    %13 = vector.shape_cast %12 : vector<1x16xf32> to vector<1x16xf32>
    %14 = vector.broadcast %13 : vector<1x16xf32> to vector<8x16xf32>
    %c0_21 = arith.constant 0 : index
    %c0_22 = arith.constant 0 : index
    %15 = vector.load %arg14[%c0_21, %c0_22] : memref<1x160xf32, #tpu.memory_space<vmem>>, vector<1x160xf32>
    %16 = vector.shape_cast %15 : vector<1x160xf32> to vector<1x160xf32>
    %17 = vector.broadcast %16 : vector<1x160xf32> to vector<8x160xf32>
    %c0_23 = arith.constant 0 : index
    %c0_24 = arith.constant 0 : index
    %18 = vector.load %arg16[%c0_23, %c0_24] : memref<1x16xf32, #tpu.memory_space<vmem>>, vector<1x16xf32>
    %19 = vector.shape_cast %18 : vector<1x16xf32> to vector<1x16xf32>
    %20 = vector.broadcast %19 : vector<1x16xf32> to vector<8x16xf32>
    %c0_25 = arith.constant 0 : index
    %c0_26 = arith.constant 0 : index
    %21 = vector.load %arg18[%c0_25, %c0_26] : memref<1x32xf32, #tpu.memory_space<vmem>>, vector<1x32xf32>
    %22 = vector.shape_cast %21 : vector<1x32xf32> to vector<1x32xf32>
    %23 = vector.broadcast %22 : vector<1x32xf32> to vector<8x32xf32>
    %c0_27 = arith.constant 0 : index
    %c0_28 = arith.constant 0 : index
    %24 = vector.load %arg1[%c0_27, %c0_28] : memref<48x16xf32, #tpu.memory_space<vmem>>, vector<48x16xf32>
    %25 = arith.truncf %24 : vector<48x16xf32> to vector<48x16xbf16>
    %cst = arith.constant dense<0.000000e+00> : vector<48x32xf32>
    %26 = tpu.matmul %25, %0, %cst {dimension_numbers = #tpu.dot_dimension_numbers<[1], [0], [0], [1], [0, 0, 1, 1], [], []>} : vector<48x16xbf16>, vector<16x32xbf16>, vector<48x32xf32> -> vector<48x32xf32>
    %c0_29 = arith.constant 0 : index
    %c0_30 = arith.constant 0 : index
    %27 = vector.load %arg4[%c0_29, %c0_30] : memref<1x32xf32, #tpu.memory_space<vmem>>, vector<1x32xf32>
    %28 = vector.shape_cast %27 : vector<1x32xf32> to vector<1x32xf32>
    %29 = vector.broadcast %28 : vector<1x32xf32> to vector<48x32xf32>
    %30 = arith.addf %26, %29 : vector<48x32xf32>
    %cst_31 = arith.constant 0.000000e+00 : f32
    %31 = vector.broadcast %cst_31 : f32 to vector<48x32xf32>
    %32 = arith.maximumf %30, %31 : vector<48x32xf32>
    %33 = arith.truncf %32 : vector<48x32xf32> to vector<48x32xbf16>
    %cst_32 = arith.constant dense<0.000000e+00> : vector<48x32xf32>
    %34 = tpu.matmul %33, %1, %cst_32 {dimension_numbers = #tpu.dot_dimension_numbers<[1], [0], [0], [1], [0, 0, 1, 1], [], []>} : vector<48x32xbf16>, vector<32x32xbf16>, vector<48x32xf32> -> vector<48x32xf32>
    %c0_33 = arith.constant 0 : index
    %c0_34 = arith.constant 0 : index
    %35 = vector.load %arg6[%c0_33, %c0_34] : memref<1x32xf32, #tpu.memory_space<vmem>>, vector<1x32xf32>
    %36 = vector.shape_cast %35 : vector<1x32xf32> to vector<1x32xf32>
    %37 = vector.broadcast %36 : vector<1x32xf32> to vector<48x32xf32>
    %38 = arith.addf %34, %37 : vector<48x32xf32>
    %cst_35 = arith.constant 0.000000e+00 : f32
    %39 = vector.broadcast %cst_35 : f32 to vector<48x32xf32>
    %40 = arith.maximumf %38, %39 : vector<48x32xf32>
    %41 = arith.truncf %40 : vector<48x32xf32> to vector<48x32xbf16>
    %cst_36 = arith.constant dense<0.000000e+00> : vector<48x128xf32>
    %42 = tpu.matmul %41, %2, %cst_36 {dimension_numbers = #tpu.dot_dimension_numbers<[1], [0], [0], [1], [0, 0, 1, 1], [], []>} : vector<48x32xbf16>, vector<32x128xbf16>, vector<48x128xf32> -> vector<48x128xf32>
    %c0_37 = arith.constant 0 : index
    %c0_38 = arith.constant 0 : index
    %43 = vector.load %arg8[%c0_37, %c0_38] : memref<1x128xf32, #tpu.memory_space<vmem>>, vector<1x128xf32>
    %44 = vector.shape_cast %43 : vector<1x128xf32> to vector<1x128xf32>
    %45 = vector.broadcast %44 : vector<1x128xf32> to vector<48x128xf32>
    %46 = arith.addf %42, %45 : vector<48x128xf32>
    %c0_i32 = arith.constant 0 : i32
    %47 = arith.cmpi eq, %arg0, %c0_i32 : i32
    %48 = arith.extui %47 : i1 to i32
    %c0_i32_39 = arith.constant 0 : i32
    %49 = arith.cmpi ne, %48, %c0_i32_39 : i32
    scf.if %49 {
      %cst_230 = arith.constant 0.000000e+00 : f32
      %697 = vector.broadcast %cst_230 : f32 to vector<8x32xf32>
      %c0_231 = arith.constant 0 : index
      %c0_232 = arith.constant 0 : index
      %698 = vector.load %arg22[%c0_231, %c0_232] : memref<8x32xf32, #tpu.memory_space<vmem>>, vector<8x32xf32>
      tpu.vector_store %arg22[%c0_231, %c0_232], %697 {strides = array<i32>} : memref<8x32xf32, #tpu.memory_space<vmem>>, vector<8x32xf32>,
    } else {
    }
    %c0_40 = arith.constant 0 : index
    %c0_41 = arith.constant 0 : index
    %50 = vector.load %arg22[%c0_40, %c0_41] : memref<8x32xf32, #tpu.memory_space<vmem>>, vector<8x32xf32>
    %51 = vector.extract_strided_slice %46 {offsets = [0, 0], sizes = [8, 128], strides = [1, 1]} : vector<48x128xf32> to vector<8x128xf32>
    %c0_42 = arith.constant 0 : index
    %c0_43 = arith.constant 0 : index
    %c0_44 = arith.constant 0 : index
    %52 = vector.load %arg2[%c0_42, %c0_43, %c0_44] : memref<6x8x8xf32, #tpu.memory_space<vmem>>, vector<1x8x8xf32>
    %53 = vector.shape_cast %52 : vector<1x8x8xf32> to vector<8x8xf32>
    %54 = arith.truncf %50 : vector<8x32xf32> to vector<8x32xbf16>
    %cst_45 = arith.constant dense<0.000000e+00> : vector<8x160xf32>
    %55 = tpu.matmul %54, %5, %cst_45 {dimension_numbers = #tpu.dot_dimension_numbers<[1], [0], [0], [1], [0, 0, 1, 1], [], []>} : vector<8x32xbf16>, vector<32x160xbf16>, vector<8x160xf32> -> vector<8x160xf32>
    %56 = arith.addf %55, %17 : vector<8x160xf32>
    %57 = vector.extract_strided_slice %51 {offsets = [0, 0], sizes = [8, 32], strides = [1, 1]} : vector<8x128xf32> to vector<8x32xf32>
    %58 = vector.extract_strided_slice %56 {offsets = [0, 0], sizes = [8, 32], strides = [1, 1]} : vector<8x160xf32> to vector<8x32xf32>
    %59 = arith.addf %57, %58 : vector<8x32xf32>
    %cst_46 = arith.constant 0.000000e+00 : f32
    %60 = vector.broadcast %cst_46 : f32 to vector<8x32xf32>
    %61 = arith.maximumf %59, %60 : vector<8x32xf32>
    %62 = arith.truncf %61 : vector<8x32xf32> to vector<8x32xbf16>
    %cst_47 = arith.constant dense<0.000000e+00> : vector<8x32xf32>
    %63 = tpu.matmul %62, %3, %cst_47 {dimension_numbers = #tpu.dot_dimension_numbers<[1], [0], [0], [1], [0, 0, 1, 1], [], []>} : vector<8x32xbf16>, vector<32x32xbf16>, vector<8x32xf32> -> vector<8x32xf32>
    %64 = arith.addf %63, %11 : vector<8x32xf32>
    %cst_48 = arith.constant 0.000000e+00 : f32
    %65 = vector.broadcast %cst_48 : f32 to vector<8x32xf32>
    %66 = arith.maximumf %64, %65 : vector<8x32xf32>
    %67 = arith.truncf %66 : vector<8x32xf32> to vector<8x32xbf16>
    %cst_49 = arith.constant dense<0.000000e+00> : vector<8x16xf32>
    %68 = tpu.matmul %67, %4, %cst_49 {dimension_numbers = #tpu.dot_dimension_numbers<[1], [0], [0], [1], [0, 0, 1, 1], [], []>} : vector<8x32xbf16>, vector<32x16xbf16>, vector<8x16xf32> -> vector<8x16xf32>
    %69 = arith.addf %68, %14 : vector<8x16xf32>
    %70 = vector.extract_strided_slice %69 {offsets = [0, 0], sizes = [8, 8], strides = [1, 1]} : vector<8x16xf32> to vector<8x8xf32>
    %71 = vector.extract_strided_slice %69 {offsets = [0, 8], sizes = [8, 8], strides = [1, 1]} : vector<8x16xf32> to vector<8x8xf32>
    %cst_50 = arith.constant 0.000000e+00 : f32
    %72 = vector.broadcast %cst_50 : f32 to vector<8x8xf32>
    %73 = arith.maximumf %71, %72 : vector<8x8xf32>
    %74 = vector.broadcast %cst_50 : f32 to vector<8x8xf32>
    %75 = arith.subf %71, %74 : vector<8x8xf32>
    %76 = arith.cmpf one, %75, %75 : vector<8x8xf32>
    %77 = vector.broadcast %cst_50 : f32 to vector<8x8xf32>
    %78 = arith.addf %71, %77 : vector<8x8xf32>
    %79 = math.absf %75 : vector<8x8xf32>
    %cst_51 = arith.constant 0.000000e+00 : f32
    %80 = vector.broadcast %cst_51 : f32 to vector<8x8xf32>
    %81 = arith.subf %80, %79 : vector<8x8xf32>
    %82 = math.exp %81 : vector<8x8xf32>
    %83 = math.log1p %82 : vector<8x8xf32>
    %84 = arith.addf %73, %83 : vector<8x8xf32>
    %85 = arith.select %76, %78, %84 : vector<8x8xi1>, vector<8x8xf32>
    %86 = vector.extract_strided_slice %56 {offsets = [0, 32], sizes = [8, 32], strides = [1, 1]} : vector<8x160xf32> to vector<8x32xf32>
    %cst_52 = arith.constant 0.000000e+00 : f32
    %87 = vector.broadcast %cst_52 : f32 to vector<8x32xf32>
    %88 = arith.maximumf %86, %87 : vector<8x32xf32>
    %89 = arith.truncf %88 : vector<8x32xf32> to vector<8x32xbf16>
    %cst_53 = arith.constant dense<0.000000e+00> : vector<8x16xf32>
    %90 = tpu.matmul %89, %6, %cst_53 {dimension_numbers = #tpu.dot_dimension_numbers<[1], [0], [0], [1], [0, 0, 1, 1], [], []>} : vector<8x32xbf16>, vector<32x16xbf16>, vector<8x16xf32> -> vector<8x16xf32>
    %91 = arith.addf %90, %20 : vector<8x16xf32>
    %92 = vector.extract_strided_slice %91 {offsets = [0, 0], sizes = [8, 8], strides = [1, 1]} : vector<8x16xf32> to vector<8x8xf32>
    %93 = vector.extract_strided_slice %91 {offsets = [0, 8], sizes = [8, 8], strides = [1, 1]} : vector<8x16xf32> to vector<8x8xf32>
    %cst_54 = arith.constant 0.000000e+00 : f32
    %94 = vector.broadcast %cst_54 : f32 to vector<8x8xf32>
    %95 = arith.maximumf %93, %94 : vector<8x8xf32>
    %96 = vector.broadcast %cst_54 : f32 to vector<8x8xf32>
    %97 = arith.subf %93, %96 : vector<8x8xf32>
    %98 = arith.cmpf one, %97, %97 : vector<8x8xf32>
    %99 = vector.broadcast %cst_54 : f32 to vector<8x8xf32>
    %100 = arith.addf %93, %99 : vector<8x8xf32>
    %101 = math.absf %97 : vector<8x8xf32>
    %cst_55 = arith.constant 0.000000e+00 : f32
    %102 = vector.broadcast %cst_55 : f32 to vector<8x8xf32>
    %103 = arith.subf %102, %101 : vector<8x8xf32>
    %104 = math.exp %103 : vector<8x8xf32>
    %105 = math.log1p %104 : vector<8x8xf32>
    %106 = arith.addf %95, %105 : vector<8x8xf32>
    %107 = arith.select %98, %100, %106 : vector<8x8xi1>, vector<8x8xf32>
    %108 = arith.mulf %53, %85 : vector<8x8xf32>
    %109 = arith.addf %108, %70 : vector<8x8xf32>
    %110 = arith.truncf %109 : vector<8x8xf32> to vector<8x8xbf16>
    %cst_56 = arith.constant dense<0.000000e+00> : vector<8x32xf32>
    %111 = tpu.matmul %110, %7, %cst_56 {dimension_numbers = #tpu.dot_dimension_numbers<[1], [0], [0], [1], [0, 0, 1, 1], [], []>} : vector<8x8xbf16>, vector<8x32xbf16>, vector<8x32xf32> -> vector<8x32xf32>
    %112 = arith.addf %111, %23 : vector<8x32xf32>
    %cst_57 = arith.constant 0.000000e+00 : f32
    %113 = vector.broadcast %cst_57 : f32 to vector<8x32xf32>
    %114 = arith.maximumf %112, %113 : vector<8x32xf32>
    %115 = vector.extract_strided_slice %51 {offsets = [0, 32], sizes = [8, 96], strides = [1, 1]} : vector<8x128xf32> to vector<8x96xf32>
    %116 = arith.truncf %114 : vector<8x32xf32> to vector<8x32xbf16>
    %cst_58 = arith.constant dense<0.000000e+00> : vector<8x96xf32>
    %117 = tpu.matmul %116, %8, %cst_58 {dimension_numbers = #tpu.dot_dimension_numbers<[1], [0], [0], [1], [0, 0, 1, 1], [], []>} : vector<8x32xbf16>, vector<32x96xbf16>, vector<8x96xf32> -> vector<8x96xf32>
    %118 = arith.addf %115, %117 : vector<8x96xf32>
    %119 = vector.extract_strided_slice %56 {offsets = [0, 64], sizes = [8, 96], strides = [1, 1]} : vector<8x160xf32> to vector<8x96xf32>
    %120 = vector.extract_strided_slice %118 {offsets = [0, 0], sizes = [8, 32], strides = [1, 1]} : vector<8x96xf32> to vector<8x32xf32>
    %121 = vector.extract_strided_slice %119 {offsets = [0, 0], sizes = [8, 32], strides = [1, 1]} : vector<8x96xf32> to vector<8x32xf32>
    %122 = arith.addf %120, %121 : vector<8x32xf32>
    %123 = arith.negf %122 : vector<8x32xf32>
    %124 = math.exp %123 : vector<8x32xf32>
    %cst_59 = arith.constant 1.000000e+00 : f32
    %125 = vector.broadcast %cst_59 : f32 to vector<8x32xf32>
    %126 = arith.addf %125, %124 : vector<8x32xf32>
    %127 = arith.divf %125, %126 : vector<8x32xf32>
    %128 = vector.extract_strided_slice %118 {offsets = [0, 32], sizes = [8, 32], strides = [1, 1]} : vector<8x96xf32> to vector<8x32xf32>
    %129 = vector.extract_strided_slice %119 {offsets = [0, 32], sizes = [8, 32], strides = [1, 1]} : vector<8x96xf32> to vector<8x32xf32>
    %130 = arith.addf %128, %129 : vector<8x32xf32>
    %131 = arith.negf %130 : vector<8x32xf32>
    %132 = math.exp %131 : vector<8x32xf32>
    %cst_60 = arith.constant 1.000000e+00 : f32
    %133 = vector.broadcast %cst_60 : f32 to vector<8x32xf32>
    %134 = arith.addf %133, %132 : vector<8x32xf32>
    %135 = arith.divf %133, %134 : vector<8x32xf32>
    %136 = vector.extract_strided_slice %118 {offsets = [0, 64], sizes = [8, 32], strides = [1, 1]} : vector<8x96xf32> to vector<8x32xf32>
    %137 = vector.extract_strided_slice %119 {offsets = [0, 64], sizes = [8, 32], strides = [1, 1]} : vector<8x96xf32> to vector<8x32xf32>
    %138 = arith.mulf %127, %137 : vector<8x32xf32>
    %139 = arith.addf %136, %138 : vector<8x32xf32>
    %140 = math.tanh %139 : vector<8x32xf32>
    %cst_61 = arith.constant 1.000000e+00 : f32
    %141 = vector.broadcast %cst_61 : f32 to vector<8x32xf32>
    %142 = arith.subf %141, %135 : vector<8x32xf32>
    %143 = arith.mulf %142, %140 : vector<8x32xf32>
    %144 = arith.mulf %135, %50 : vector<8x32xf32>
    %145 = arith.addf %143, %144 : vector<8x32xf32>
    %c0_62 = arith.constant 0 : index
    %c0_63 = arith.constant 0 : index
    %c0_64 = arith.constant 0 : index
    %146 = vector.load %arg20[%c0_62, %c0_63, %c0_64] : memref<6x8x32xf32, #tpu.memory_space<vmem>>, vector<1x8x8xf32>
    %147 = vector.shape_cast %146 : vector<1x8x8xf32> to vector<8x8xf32>
    %148 = vector.shape_cast %70 : vector<8x8xf32> to vector<1x8x8xf32>
    tpu.vector_store %arg20[%c0_62, %c0_63, %c0_64], %148 {strides = array<i32>} : memref<6x8x32xf32, #tpu.memory_space<vmem>>, vector<1x8x8xf32>,
    %c0_65 = arith.constant 0 : index
    %c0_66 = arith.constant 0 : index
    %c8 = arith.constant 8 : index
    %149 = vector.load %arg20[%c0_65, %c0_66, %c8] : memref<6x8x32xf32, #tpu.memory_space<vmem>>, vector<1x8x8xf32>
    %150 = vector.shape_cast %149 : vector<1x8x8xf32> to vector<8x8xf32>
    %151 = vector.shape_cast %85 : vector<8x8xf32> to vector<1x8x8xf32>
    tpu.vector_store %arg20[%c0_65, %c0_66, %c8], %151 {strides = array<i32>} : memref<6x8x32xf32, #tpu.memory_space<vmem>>, vector<1x8x8xf32>,
    %c0_67 = arith.constant 0 : index
    %c0_68 = arith.constant 0 : index
    %c16 = arith.constant 16 : index
    %152 = vector.load %arg20[%c0_67, %c0_68, %c16] : memref<6x8x32xf32, #tpu.memory_space<vmem>>, vector<1x8x8xf32>
    %153 = vector.shape_cast %152 : vector<1x8x8xf32> to vector<8x8xf32>
    %154 = vector.shape_cast %92 : vector<8x8xf32> to vector<1x8x8xf32>
    tpu.vector_store %arg20[%c0_67, %c0_68, %c16], %154 {strides = array<i32>} : memref<6x8x32xf32, #tpu.memory_space<vmem>>, vector<1x8x8xf32>,
    %c0_69 = arith.constant 0 : index
    %c0_70 = arith.constant 0 : index
    %c24 = arith.constant 24 : index
    %155 = vector.load %arg20[%c0_69, %c0_70, %c24] : memref<6x8x32xf32, #tpu.memory_space<vmem>>, vector<1x8x8xf32>
    %156 = vector.shape_cast %155 : vector<1x8x8xf32> to vector<8x8xf32>
    %157 = vector.shape_cast %107 : vector<8x8xf32> to vector<1x8x8xf32>
    tpu.vector_store %arg20[%c0_69, %c0_70, %c24], %157 {strides = array<i32>} : memref<6x8x32xf32, #tpu.memory_space<vmem>>, vector<1x8x8xf32>,
    %158 = vector.extract_strided_slice %46 {offsets = [8, 0], sizes = [8, 128], strides = [1, 1]} : vector<48x128xf32> to vector<8x128xf32>
    %c1 = arith.constant 1 : index
    %c0_71 = arith.constant 0 : index
    %c0_72 = arith.constant 0 : index
    %159 = vector.load %arg2[%c1, %c0_71, %c0_72] : memref<6x8x8xf32, #tpu.memory_space<vmem>>, vector<1x8x8xf32>
    %160 = vector.shape_cast %159 : vector<1x8x8xf32> to vector<8x8xf32>
    %161 = arith.truncf %145 : vector<8x32xf32> to vector<8x32xbf16>
    %cst_73 = arith.constant dense<0.000000e+00> : vector<8x160xf32>
    %162 = tpu.matmul %161, %5, %cst_73 {dimension_numbers = #tpu.dot_dimension_numbers<[1], [0], [0], [1], [0, 0, 1, 1], [], []>} : vector<8x32xbf16>, vector<32x160xbf16>, vector<8x160xf32> -> vector<8x160xf32>
    %163 = arith.addf %162, %17 : vector<8x160xf32>
    %164 = vector.extract_strided_slice %158 {offsets = [0, 0], sizes = [8, 32], strides = [1, 1]} : vector<8x128xf32> to vector<8x32xf32>
    %165 = vector.extract_strided_slice %163 {offsets = [0, 0], sizes = [8, 32], strides = [1, 1]} : vector<8x160xf32> to vector<8x32xf32>
    %166 = arith.addf %164, %165 : vector<8x32xf32>
    %cst_74 = arith.constant 0.000000e+00 : f32
    %167 = vector.broadcast %cst_74 : f32 to vector<8x32xf32>
    %168 = arith.maximumf %166, %167 : vector<8x32xf32>
    %169 = arith.truncf %168 : vector<8x32xf32> to vector<8x32xbf16>
    %cst_75 = arith.constant dense<0.000000e+00> : vector<8x32xf32>
    %170 = tpu.matmul %169, %3, %cst_75 {dimension_numbers = #tpu.dot_dimension_numbers<[1], [0], [0], [1], [0, 0, 1, 1], [], []>} : vector<8x32xbf16>, vector<32x32xbf16>, vector<8x32xf32> -> vector<8x32xf32>
    %171 = arith.addf %170, %11 : vector<8x32xf32>
    %cst_76 = arith.constant 0.000000e+00 : f32
    %172 = vector.broadcast %cst_76 : f32 to vector<8x32xf32>
    %173 = arith.maximumf %171, %172 : vector<8x32xf32>
    %174 = arith.truncf %173 : vector<8x32xf32> to vector<8x32xbf16>
    %cst_77 = arith.constant dense<0.000000e+00> : vector<8x16xf32>
    %175 = tpu.matmul %174, %4, %cst_77 {dimension_numbers = #tpu.dot_dimension_numbers<[1], [0], [0], [1], [0, 0, 1, 1], [], []>} : vector<8x32xbf16>, vector<32x16xbf16>, vector<8x16xf32> -> vector<8x16xf32>
    %176 = arith.addf %175, %14 : vector<8x16xf32>
    %177 = vector.extract_strided_slice %176 {offsets = [0, 0], sizes = [8, 8], strides = [1, 1]} : vector<8x16xf32> to vector<8x8xf32>
    %178 = vector.extract_strided_slice %176 {offsets = [0, 8], sizes = [8, 8], strides = [1, 1]} : vector<8x16xf32> to vector<8x8xf32>
    %cst_78 = arith.constant 0.000000e+00 : f32
    %179 = vector.broadcast %cst_78 : f32 to vector<8x8xf32>
    %180 = arith.maximumf %178, %179 : vector<8x8xf32>
    %181 = vector.broadcast %cst_78 : f32 to vector<8x8xf32>
    %182 = arith.subf %178, %181 : vector<8x8xf32>
    %183 = arith.cmpf one, %182, %182 : vector<8x8xf32>
    %184 = vector.broadcast %cst_78 : f32 to vector<8x8xf32>
    %185 = arith.addf %178, %184 : vector<8x8xf32>
    %186 = math.absf %182 : vector<8x8xf32>
    %cst_79 = arith.constant 0.000000e+00 : f32
    %187 = vector.broadcast %cst_79 : f32 to vector<8x8xf32>
    %188 = arith.subf %187, %186 : vector<8x8xf32>
    %189 = math.exp %188 : vector<8x8xf32>
    %190 = math.log1p %189 : vector<8x8xf32>
    %191 = arith.addf %180, %190 : vector<8x8xf32>
    %192 = arith.select %183, %185, %191 : vector<8x8xi1>, vector<8x8xf32>
    %193 = vector.extract_strided_slice %163 {offsets = [0, 32], sizes = [8, 32], strides = [1, 1]} : vector<8x160xf32> to vector<8x32xf32>
    %cst_80 = arith.constant 0.000000e+00 : f32
    %194 = vector.broadcast %cst_80 : f32 to vector<8x32xf32>
    %195 = arith.maximumf %193, %194 : vector<8x32xf32>
    %196 = arith.truncf %195 : vector<8x32xf32> to vector<8x32xbf16>
    %cst_81 = arith.constant dense<0.000000e+00> : vector<8x16xf32>
    %197 = tpu.matmul %196, %6, %cst_81 {dimension_numbers = #tpu.dot_dimension_numbers<[1], [0], [0], [1], [0, 0, 1, 1], [], []>} : vector<8x32xbf16>, vector<32x16xbf16>, vector<8x16xf32> -> vector<8x16xf32>
    %198 = arith.addf %197, %20 : vector<8x16xf32>
    %199 = vector.extract_strided_slice %198 {offsets = [0, 0], sizes = [8, 8], strides = [1, 1]} : vector<8x16xf32> to vector<8x8xf32>
    %200 = vector.extract_strided_slice %198 {offsets = [0, 8], sizes = [8, 8], strides = [1, 1]} : vector<8x16xf32> to vector<8x8xf32>
    %cst_82 = arith.constant 0.000000e+00 : f32
    %201 = vector.broadcast %cst_82 : f32 to vector<8x8xf32>
    %202 = arith.maximumf %200, %201 : vector<8x8xf32>
    %203 = vector.broadcast %cst_82 : f32 to vector<8x8xf32>
    %204 = arith.subf %200, %203 : vector<8x8xf32>
    %205 = arith.cmpf one, %204, %204 : vector<8x8xf32>
    %206 = vector.broadcast %cst_82 : f32 to vector<8x8xf32>
    %207 = arith.addf %200, %206 : vector<8x8xf32>
    %208 = math.absf %204 : vector<8x8xf32>
    %cst_83 = arith.constant 0.000000e+00 : f32
    %209 = vector.broadcast %cst_83 : f32 to vector<8x8xf32>
    %210 = arith.subf %209, %208 : vector<8x8xf32>
    %211 = math.exp %210 : vector<8x8xf32>
    %212 = math.log1p %211 : vector<8x8xf32>
    %213 = arith.addf %202, %212 : vector<8x8xf32>
    %214 = arith.select %205, %207, %213 : vector<8x8xi1>, vector<8x8xf32>
    %215 = arith.mulf %160, %192 : vector<8x8xf32>
    %216 = arith.addf %215, %177 : vector<8x8xf32>
    %217 = arith.truncf %216 : vector<8x8xf32> to vector<8x8xbf16>
    %cst_84 = arith.constant dense<0.000000e+00> : vector<8x32xf32>
    %218 = tpu.matmul %217, %7, %cst_84 {dimension_numbers = #tpu.dot_dimension_numbers<[1], [0], [0], [1], [0, 0, 1, 1], [], []>} : vector<8x8xbf16>, vector<8x32xbf16>, vector<8x32xf32> -> vector<8x32xf32>
    %219 = arith.addf %218, %23 : vector<8x32xf32>
    %cst_85 = arith.constant 0.000000e+00 : f32
    %220 = vector.broadcast %cst_85 : f32 to vector<8x32xf32>
    %221 = arith.maximumf %219, %220 : vector<8x32xf32>
    %222 = vector.extract_strided_slice %158 {offsets = [0, 32], sizes = [8, 96], strides = [1, 1]} : vector<8x128xf32> to vector<8x96xf32>
    %223 = arith.truncf %221 : vector<8x32xf32> to vector<8x32xbf16>
    %cst_86 = arith.constant dense<0.000000e+00> : vector<8x96xf32>
    %224 = tpu.matmul %223, %8, %cst_86 {dimension_numbers = #tpu.dot_dimension_numbers<[1], [0], [0], [1], [0, 0, 1, 1], [], []>} : vector<8x32xbf16>, vector<32x96xbf16>, vector<8x96xf32> -> vector<8x96xf32>
    %225 = arith.addf %222, %224 : vector<8x96xf32>
    %226 = vector.extract_strided_slice %163 {offsets = [0, 64], sizes = [8, 96], strides = [1, 1]} : vector<8x160xf32> to vector<8x96xf32>
    %227 = vector.extract_strided_slice %225 {offsets = [0, 0], sizes = [8, 32], strides = [1, 1]} : vector<8x96xf32> to vector<8x32xf32>
    %228 = vector.extract_strided_slice %226 {offsets = [0, 0], sizes = [8, 32], strides = [1, 1]} : vector<8x96xf32> to vector<8x32xf32>
    %229 = arith.addf %227, %228 : vector<8x32xf32>
    %230 = arith.negf %229 : vector<8x32xf32>
    %231 = math.exp %230 : vector<8x32xf32>
    %cst_87 = arith.constant 1.000000e+00 : f32
    %232 = vector.broadcast %cst_87 : f32 to vector<8x32xf32>
    %233 = arith.addf %232, %231 : vector<8x32xf32>
    %234 = arith.divf %232, %233 : vector<8x32xf32>
    %235 = vector.extract_strided_slice %225 {offsets = [0, 32], sizes = [8, 32], strides = [1, 1]} : vector<8x96xf32> to vector<8x32xf32>
    %236 = vector.extract_strided_slice %226 {offsets = [0, 32], sizes = [8, 32], strides = [1, 1]} : vector<8x96xf32> to vector<8x32xf32>
    %237 = arith.addf %235, %236 : vector<8x32xf32>
    %238 = arith.negf %237 : vector<8x32xf32>
    %239 = math.exp %238 : vector<8x32xf32>
    %cst_88 = arith.constant 1.000000e+00 : f32
    %240 = vector.broadcast %cst_88 : f32 to vector<8x32xf32>
    %241 = arith.addf %240, %239 : vector<8x32xf32>
    %242 = arith.divf %240, %241 : vector<8x32xf32>
    %243 = vector.extract_strided_slice %225 {offsets = [0, 64], sizes = [8, 32], strides = [1, 1]} : vector<8x96xf32> to vector<8x32xf32>
    %244 = vector.extract_strided_slice %226 {offsets = [0, 64], sizes = [8, 32], strides = [1, 1]} : vector<8x96xf32> to vector<8x32xf32>
    %245 = arith.mulf %234, %244 : vector<8x32xf32>
    %246 = arith.addf %243, %245 : vector<8x32xf32>
    %247 = math.tanh %246 : vector<8x32xf32>
    %cst_89 = arith.constant 1.000000e+00 : f32
    %248 = vector.broadcast %cst_89 : f32 to vector<8x32xf32>
    %249 = arith.subf %248, %242 : vector<8x32xf32>
    %250 = arith.mulf %249, %247 : vector<8x32xf32>
    %251 = arith.mulf %242, %145 : vector<8x32xf32>
    %252 = arith.addf %250, %251 : vector<8x32xf32>
    %c1_90 = arith.constant 1 : index
    %c0_91 = arith.constant 0 : index
    %c0_92 = arith.constant 0 : index
    %253 = vector.load %arg20[%c1_90, %c0_91, %c0_92] : memref<6x8x32xf32, #tpu.memory_space<vmem>>, vector<1x8x8xf32>
    %254 = vector.shape_cast %253 : vector<1x8x8xf32> to vector<8x8xf32>
    %255 = vector.shape_cast %177 : vector<8x8xf32> to vector<1x8x8xf32>
    tpu.vector_store %arg20[%c1_90, %c0_91, %c0_92], %255 {strides = array<i32>} : memref<6x8x32xf32, #tpu.memory_space<vmem>>, vector<1x8x8xf32>,
    %c1_93 = arith.constant 1 : index
    %c0_94 = arith.constant 0 : index
    %c8_95 = arith.constant 8 : index
    %256 = vector.load %arg20[%c1_93, %c0_94, %c8_95] : memref<6x8x32xf32, #tpu.memory_space<vmem>>, vector<1x8x8xf32>
    %257 = vector.shape_cast %256 : vector<1x8x8xf32> to vector<8x8xf32>
    %258 = vector.shape_cast %192 : vector<8x8xf32> to vector<1x8x8xf32>
    tpu.vector_store %arg20[%c1_93, %c0_94, %c8_95], %258 {strides = array<i32>} : memref<6x8x32xf32, #tpu.memory_space<vmem>>, vector<1x8x8xf32>,
    %c1_96 = arith.constant 1 : index
    %c0_97 = arith.constant 0 : index
    %c16_98 = arith.constant 16 : index
    %259 = vector.load %arg20[%c1_96, %c0_97, %c16_98] : memref<6x8x32xf32, #tpu.memory_space<vmem>>, vector<1x8x8xf32>
    %260 = vector.shape_cast %259 : vector<1x8x8xf32> to vector<8x8xf32>
    %261 = vector.shape_cast %199 : vector<8x8xf32> to vector<1x8x8xf32>
    tpu.vector_store %arg20[%c1_96, %c0_97, %c16_98], %261 {strides = array<i32>} : memref<6x8x32xf32, #tpu.memory_space<vmem>>, vector<1x8x8xf32>,
    %c1_99 = arith.constant 1 : index
    %c0_100 = arith.constant 0 : index
    %c24_101 = arith.constant 24 : index
    %262 = vector.load %arg20[%c1_99, %c0_100, %c24_101] : memref<6x8x32xf32, #tpu.memory_space<vmem>>, vector<1x8x8xf32>
    %263 = vector.shape_cast %262 : vector<1x8x8xf32> to vector<8x8xf32>
    %264 = vector.shape_cast %214 : vector<8x8xf32> to vector<1x8x8xf32>
    tpu.vector_store %arg20[%c1_99, %c0_100, %c24_101], %264 {strides = array<i32>} : memref<6x8x32xf32, #tpu.memory_space<vmem>>, vector<1x8x8xf32>,
    %265 = vector.extract_strided_slice %46 {offsets = [16, 0], sizes = [8, 128], strides = [1, 1]} : vector<48x128xf32> to vector<8x128xf32>
    %c2 = arith.constant 2 : index
    %c0_102 = arith.constant 0 : index
    %c0_103 = arith.constant 0 : index
    %266 = vector.load %arg2[%c2, %c0_102, %c0_103] : memref<6x8x8xf32, #tpu.memory_space<vmem>>, vector<1x8x8xf32>
    %267 = vector.shape_cast %266 : vector<1x8x8xf32> to vector<8x8xf32>
    %268 = arith.truncf %252 : vector<8x32xf32> to vector<8x32xbf16>
    %cst_104 = arith.constant dense<0.000000e+00> : vector<8x160xf32>
    %269 = tpu.matmul %268, %5, %cst_104 {dimension_numbers = #tpu.dot_dimension_numbers<[1], [0], [0], [1], [0, 0, 1, 1], [], []>} : vector<8x32xbf16>, vector<32x160xbf16>, vector<8x160xf32> -> vector<8x160xf32>
    %270 = arith.addf %269, %17 : vector<8x160xf32>
    %271 = vector.extract_strided_slice %265 {offsets = [0, 0], sizes = [8, 32], strides = [1, 1]} : vector<8x128xf32> to vector<8x32xf32>
    %272 = vector.extract_strided_slice %270 {offsets = [0, 0], sizes = [8, 32], strides = [1, 1]} : vector<8x160xf32> to vector<8x32xf32>
    %273 = arith.addf %271, %272 : vector<8x32xf32>
    %cst_105 = arith.constant 0.000000e+00 : f32
    %274 = vector.broadcast %cst_105 : f32 to vector<8x32xf32>
    %275 = arith.maximumf %273, %274 : vector<8x32xf32>
    %276 = arith.truncf %275 : vector<8x32xf32> to vector<8x32xbf16>
    %cst_106 = arith.constant dense<0.000000e+00> : vector<8x32xf32>
    %277 = tpu.matmul %276, %3, %cst_106 {dimension_numbers = #tpu.dot_dimension_numbers<[1], [0], [0], [1], [0, 0, 1, 1], [], []>} : vector<8x32xbf16>, vector<32x32xbf16>, vector<8x32xf32> -> vector<8x32xf32>
    %278 = arith.addf %277, %11 : vector<8x32xf32>
    %cst_107 = arith.constant 0.000000e+00 : f32
    %279 = vector.broadcast %cst_107 : f32 to vector<8x32xf32>
    %280 = arith.maximumf %278, %279 : vector<8x32xf32>
    %281 = arith.truncf %280 : vector<8x32xf32> to vector<8x32xbf16>
    %cst_108 = arith.constant dense<0.000000e+00> : vector<8x16xf32>
    %282 = tpu.matmul %281, %4, %cst_108 {dimension_numbers = #tpu.dot_dimension_numbers<[1], [0], [0], [1], [0, 0, 1, 1], [], []>} : vector<8x32xbf16>, vector<32x16xbf16>, vector<8x16xf32> -> vector<8x16xf32>
    %283 = arith.addf %282, %14 : vector<8x16xf32>
    %284 = vector.extract_strided_slice %283 {offsets = [0, 0], sizes = [8, 8], strides = [1, 1]} : vector<8x16xf32> to vector<8x8xf32>
    %285 = vector.extract_strided_slice %283 {offsets = [0, 8], sizes = [8, 8], strides = [1, 1]} : vector<8x16xf32> to vector<8x8xf32>
    %cst_109 = arith.constant 0.000000e+00 : f32
    %286 = vector.broadcast %cst_109 : f32 to vector<8x8xf32>
    %287 = arith.maximumf %285, %286 : vector<8x8xf32>
    %288 = vector.broadcast %cst_109 : f32 to vector<8x8xf32>
    %289 = arith.subf %285, %288 : vector<8x8xf32>
    %290 = arith.cmpf one, %289, %289 : vector<8x8xf32>
    %291 = vector.broadcast %cst_109 : f32 to vector<8x8xf32>
    %292 = arith.addf %285, %291 : vector<8x8xf32>
    %293 = math.absf %289 : vector<8x8xf32>
    %cst_110 = arith.constant 0.000000e+00 : f32
    %294 = vector.broadcast %cst_110 : f32 to vector<8x8xf32>
    %295 = arith.subf %294, %293 : vector<8x8xf32>
    %296 = math.exp %295 : vector<8x8xf32>
    %297 = math.log1p %296 : vector<8x8xf32>
    %298 = arith.addf %287, %297 : vector<8x8xf32>
    %299 = arith.select %290, %292, %298 : vector<8x8xi1>, vector<8x8xf32>
    %300 = vector.extract_strided_slice %270 {offsets = [0, 32], sizes = [8, 32], strides = [1, 1]} : vector<8x160xf32> to vector<8x32xf32>
    %cst_111 = arith.constant 0.000000e+00 : f32
    %301 = vector.broadcast %cst_111 : f32 to vector<8x32xf32>
    %302 = arith.maximumf %300, %301 : vector<8x32xf32>
    %303 = arith.truncf %302 : vector<8x32xf32> to vector<8x32xbf16>
    %cst_112 = arith.constant dense<0.000000e+00> : vector<8x16xf32>
    %304 = tpu.matmul %303, %6, %cst_112 {dimension_numbers = #tpu.dot_dimension_numbers<[1], [0], [0], [1], [0, 0, 1, 1], [], []>} : vector<8x32xbf16>, vector<32x16xbf16>, vector<8x16xf32> -> vector<8x16xf32>
    %305 = arith.addf %304, %20 : vector<8x16xf32>
    %306 = vector.extract_strided_slice %305 {offsets = [0, 0], sizes = [8, 8], strides = [1, 1]} : vector<8x16xf32> to vector<8x8xf32>
    %307 = vector.extract_strided_slice %305 {offsets = [0, 8], sizes = [8, 8], strides = [1, 1]} : vector<8x16xf32> to vector<8x8xf32>
    %cst_113 = arith.constant 0.000000e+00 : f32
    %308 = vector.broadcast %cst_113 : f32 to vector<8x8xf32>
    %309 = arith.maximumf %307, %308 : vector<8x8xf32>
    %310 = vector.broadcast %cst_113 : f32 to vector<8x8xf32>
    %311 = arith.subf %307, %310 : vector<8x8xf32>
    %312 = arith.cmpf one, %311, %311 : vector<8x8xf32>
    %313 = vector.broadcast %cst_113 : f32 to vector<8x8xf32>
    %314 = arith.addf %307, %313 : vector<8x8xf32>
    %315 = math.absf %311 : vector<8x8xf32>
    %cst_114 = arith.constant 0.000000e+00 : f32
    %316 = vector.broadcast %cst_114 : f32 to vector<8x8xf32>
    %317 = arith.subf %316, %315 : vector<8x8xf32>
    %318 = math.exp %317 : vector<8x8xf32>
    %319 = math.log1p %318 : vector<8x8xf32>
    %320 = arith.addf %309, %319 : vector<8x8xf32>
    %321 = arith.select %312, %314, %320 : vector<8x8xi1>, vector<8x8xf32>
    %322 = arith.mulf %267, %299 : vector<8x8xf32>
    %323 = arith.addf %322, %284 : vector<8x8xf32>
    %324 = arith.truncf %323 : vector<8x8xf32> to vector<8x8xbf16>
    %cst_115 = arith.constant dense<0.000000e+00> : vector<8x32xf32>
    %325 = tpu.matmul %324, %7, %cst_115 {dimension_numbers = #tpu.dot_dimension_numbers<[1], [0], [0], [1], [0, 0, 1, 1], [], []>} : vector<8x8xbf16>, vector<8x32xbf16>, vector<8x32xf32> -> vector<8x32xf32>
    %326 = arith.addf %325, %23 : vector<8x32xf32>
    %cst_116 = arith.constant 0.000000e+00 : f32
    %327 = vector.broadcast %cst_116 : f32 to vector<8x32xf32>
    %328 = arith.maximumf %326, %327 : vector<8x32xf32>
    %329 = vector.extract_strided_slice %265 {offsets = [0, 32], sizes = [8, 96], strides = [1, 1]} : vector<8x128xf32> to vector<8x96xf32>
    %330 = arith.truncf %328 : vector<8x32xf32> to vector<8x32xbf16>
    %cst_117 = arith.constant dense<0.000000e+00> : vector<8x96xf32>
    %331 = tpu.matmul %330, %8, %cst_117 {dimension_numbers = #tpu.dot_dimension_numbers<[1], [0], [0], [1], [0, 0, 1, 1], [], []>} : vector<8x32xbf16>, vector<32x96xbf16>, vector<8x96xf32> -> vector<8x96xf32>
    %332 = arith.addf %329, %331 : vector<8x96xf32>
    %333 = vector.extract_strided_slice %270 {offsets = [0, 64], sizes = [8, 96], strides = [1, 1]} : vector<8x160xf32> to vector<8x96xf32>
    %334 = vector.extract_strided_slice %332 {offsets = [0, 0], sizes = [8, 32], strides = [1, 1]} : vector<8x96xf32> to vector<8x32xf32>
    %335 = vector.extract_strided_slice %333 {offsets = [0, 0], sizes = [8, 32], strides = [1, 1]} : vector<8x96xf32> to vector<8x32xf32>
    %336 = arith.addf %334, %335 : vector<8x32xf32>
    %337 = arith.negf %336 : vector<8x32xf32>
    %338 = math.exp %337 : vector<8x32xf32>
    %cst_118 = arith.constant 1.000000e+00 : f32
    %339 = vector.broadcast %cst_118 : f32 to vector<8x32xf32>
    %340 = arith.addf %339, %338 : vector<8x32xf32>
    %341 = arith.divf %339, %340 : vector<8x32xf32>
    %342 = vector.extract_strided_slice %332 {offsets = [0, 32], sizes = [8, 32], strides = [1, 1]} : vector<8x96xf32> to vector<8x32xf32>
    %343 = vector.extract_strided_slice %333 {offsets = [0, 32], sizes = [8, 32], strides = [1, 1]} : vector<8x96xf32> to vector<8x32xf32>
    %344 = arith.addf %342, %343 : vector<8x32xf32>
    %345 = arith.negf %344 : vector<8x32xf32>
    %346 = math.exp %345 : vector<8x32xf32>
    %cst_119 = arith.constant 1.000000e+00 : f32
    %347 = vector.broadcast %cst_119 : f32 to vector<8x32xf32>
    %348 = arith.addf %347, %346 : vector<8x32xf32>
    %349 = arith.divf %347, %348 : vector<8x32xf32>
    %350 = vector.extract_strided_slice %332 {offsets = [0, 64], sizes = [8, 32], strides = [1, 1]} : vector<8x96xf32> to vector<8x32xf32>
    %351 = vector.extract_strided_slice %333 {offsets = [0, 64], sizes = [8, 32], strides = [1, 1]} : vector<8x96xf32> to vector<8x32xf32>
    %352 = arith.mulf %341, %351 : vector<8x32xf32>
    %353 = arith.addf %350, %352 : vector<8x32xf32>
    %354 = math.tanh %353 : vector<8x32xf32>
    %cst_120 = arith.constant 1.000000e+00 : f32
    %355 = vector.broadcast %cst_120 : f32 to vector<8x32xf32>
    %356 = arith.subf %355, %349 : vector<8x32xf32>
    %357 = arith.mulf %356, %354 : vector<8x32xf32>
    %358 = arith.mulf %349, %252 : vector<8x32xf32>
    %359 = arith.addf %357, %358 : vector<8x32xf32>
    %c2_121 = arith.constant 2 : index
    %c0_122 = arith.constant 0 : index
    %c0_123 = arith.constant 0 : index
    %360 = vector.load %arg20[%c2_121, %c0_122, %c0_123] : memref<6x8x32xf32, #tpu.memory_space<vmem>>, vector<1x8x8xf32>
    %361 = vector.shape_cast %360 : vector<1x8x8xf32> to vector<8x8xf32>
    %362 = vector.shape_cast %284 : vector<8x8xf32> to vector<1x8x8xf32>
    tpu.vector_store %arg20[%c2_121, %c0_122, %c0_123], %362 {strides = array<i32>} : memref<6x8x32xf32, #tpu.memory_space<vmem>>, vector<1x8x8xf32>,
    %c2_124 = arith.constant 2 : index
    %c0_125 = arith.constant 0 : index
    %c8_126 = arith.constant 8 : index
    %363 = vector.load %arg20[%c2_124, %c0_125, %c8_126] : memref<6x8x32xf32, #tpu.memory_space<vmem>>, vector<1x8x8xf32>
    %364 = vector.shape_cast %363 : vector<1x8x8xf32> to vector<8x8xf32>
    %365 = vector.shape_cast %299 : vector<8x8xf32> to vector<1x8x8xf32>
    tpu.vector_store %arg20[%c2_124, %c0_125, %c8_126], %365 {strides = array<i32>} : memref<6x8x32xf32, #tpu.memory_space<vmem>>, vector<1x8x8xf32>,
    %c2_127 = arith.constant 2 : index
    %c0_128 = arith.constant 0 : index
    %c16_129 = arith.constant 16 : index
    %366 = vector.load %arg20[%c2_127, %c0_128, %c16_129] : memref<6x8x32xf32, #tpu.memory_space<vmem>>, vector<1x8x8xf32>
    %367 = vector.shape_cast %366 : vector<1x8x8xf32> to vector<8x8xf32>
    %368 = vector.shape_cast %306 : vector<8x8xf32> to vector<1x8x8xf32>
    tpu.vector_store %arg20[%c2_127, %c0_128, %c16_129], %368 {strides = array<i32>} : memref<6x8x32xf32, #tpu.memory_space<vmem>>, vector<1x8x8xf32>,
    %c2_130 = arith.constant 2 : index
    %c0_131 = arith.constant 0 : index
    %c24_132 = arith.constant 24 : index
    %369 = vector.load %arg20[%c2_130, %c0_131, %c24_132] : memref<6x8x32xf32, #tpu.memory_space<vmem>>, vector<1x8x8xf32>
    %370 = vector.shape_cast %369 : vector<1x8x8xf32> to vector<8x8xf32>
    %371 = vector.shape_cast %321 : vector<8x8xf32> to vector<1x8x8xf32>
    tpu.vector_store %arg20[%c2_130, %c0_131, %c24_132], %371 {strides = array<i32>} : memref<6x8x32xf32, #tpu.memory_space<vmem>>, vector<1x8x8xf32>,
    %372 = vector.extract_strided_slice %46 {offsets = [24, 0], sizes = [8, 128], strides = [1, 1]} : vector<48x128xf32> to vector<8x128xf32>
    %c3 = arith.constant 3 : index
    %c0_133 = arith.constant 0 : index
    %c0_134 = arith.constant 0 : index
    %373 = vector.load %arg2[%c3, %c0_133, %c0_134] : memref<6x8x8xf32, #tpu.memory_space<vmem>>, vector<1x8x8xf32>
    %374 = vector.shape_cast %373 : vector<1x8x8xf32> to vector<8x8xf32>
    %375 = arith.truncf %359 : vector<8x32xf32> to vector<8x32xbf16>
    %cst_135 = arith.constant dense<0.000000e+00> : vector<8x160xf32>
    %376 = tpu.matmul %375, %5, %cst_135 {dimension_numbers = #tpu.dot_dimension_numbers<[1], [0], [0], [1], [0, 0, 1, 1], [], []>} : vector<8x32xbf16>, vector<32x160xbf16>, vector<8x160xf32> -> vector<8x160xf32>
    %377 = arith.addf %376, %17 : vector<8x160xf32>
    %378 = vector.extract_strided_slice %372 {offsets = [0, 0], sizes = [8, 32], strides = [1, 1]} : vector<8x128xf32> to vector<8x32xf32>
    %379 = vector.extract_strided_slice %377 {offsets = [0, 0], sizes = [8, 32], strides = [1, 1]} : vector<8x160xf32> to vector<8x32xf32>
    %380 = arith.addf %378, %379 : vector<8x32xf32>
    %cst_136 = arith.constant 0.000000e+00 : f32
    %381 = vector.broadcast %cst_136 : f32 to vector<8x32xf32>
    %382 = arith.maximumf %380, %381 : vector<8x32xf32>
    %383 = arith.truncf %382 : vector<8x32xf32> to vector<8x32xbf16>
    %cst_137 = arith.constant dense<0.000000e+00> : vector<8x32xf32>
    %384 = tpu.matmul %383, %3, %cst_137 {dimension_numbers = #tpu.dot_dimension_numbers<[1], [0], [0], [1], [0, 0, 1, 1], [], []>} : vector<8x32xbf16>, vector<32x32xbf16>, vector<8x32xf32> -> vector<8x32xf32>
    %385 = arith.addf %384, %11 : vector<8x32xf32>
    %cst_138 = arith.constant 0.000000e+00 : f32
    %386 = vector.broadcast %cst_138 : f32 to vector<8x32xf32>
    %387 = arith.maximumf %385, %386 : vector<8x32xf32>
    %388 = arith.truncf %387 : vector<8x32xf32> to vector<8x32xbf16>
    %cst_139 = arith.constant dense<0.000000e+00> : vector<8x16xf32>
    %389 = tpu.matmul %388, %4, %cst_139 {dimension_numbers = #tpu.dot_dimension_numbers<[1], [0], [0], [1], [0, 0, 1, 1], [], []>} : vector<8x32xbf16>, vector<32x16xbf16>, vector<8x16xf32> -> vector<8x16xf32>
    %390 = arith.addf %389, %14 : vector<8x16xf32>
    %391 = vector.extract_strided_slice %390 {offsets = [0, 0], sizes = [8, 8], strides = [1, 1]} : vector<8x16xf32> to vector<8x8xf32>
    %392 = vector.extract_strided_slice %390 {offsets = [0, 8], sizes = [8, 8], strides = [1, 1]} : vector<8x16xf32> to vector<8x8xf32>
    %cst_140 = arith.constant 0.000000e+00 : f32
    %393 = vector.broadcast %cst_140 : f32 to vector<8x8xf32>
    %394 = arith.maximumf %392, %393 : vector<8x8xf32>
    %395 = vector.broadcast %cst_140 : f32 to vector<8x8xf32>
    %396 = arith.subf %392, %395 : vector<8x8xf32>
    %397 = arith.cmpf one, %396, %396 : vector<8x8xf32>
    %398 = vector.broadcast %cst_140 : f32 to vector<8x8xf32>
    %399 = arith.addf %392, %398 : vector<8x8xf32>
    %400 = math.absf %396 : vector<8x8xf32>
    %cst_141 = arith.constant 0.000000e+00 : f32
    %401 = vector.broadcast %cst_141 : f32 to vector<8x8xf32>
    %402 = arith.subf %401, %400 : vector<8x8xf32>
    %403 = math.exp %402 : vector<8x8xf32>
    %404 = math.log1p %403 : vector<8x8xf32>
    %405 = arith.addf %394, %404 : vector<8x8xf32>
    %406 = arith.select %397, %399, %405 : vector<8x8xi1>, vector<8x8xf32>
    %407 = vector.extract_strided_slice %377 {offsets = [0, 32], sizes = [8, 32], strides = [1, 1]} : vector<8x160xf32> to vector<8x32xf32>
    %cst_142 = arith.constant 0.000000e+00 : f32
    %408 = vector.broadcast %cst_142 : f32 to vector<8x32xf32>
    %409 = arith.maximumf %407, %408 : vector<8x32xf32>
    %410 = arith.truncf %409 : vector<8x32xf32> to vector<8x32xbf16>
    %cst_143 = arith.constant dense<0.000000e+00> : vector<8x16xf32>
    %411 = tpu.matmul %410, %6, %cst_143 {dimension_numbers = #tpu.dot_dimension_numbers<[1], [0], [0], [1], [0, 0, 1, 1], [], []>} : vector<8x32xbf16>, vector<32x16xbf16>, vector<8x16xf32> -> vector<8x16xf32>
    %412 = arith.addf %411, %20 : vector<8x16xf32>
    %413 = vector.extract_strided_slice %412 {offsets = [0, 0], sizes = [8, 8], strides = [1, 1]} : vector<8x16xf32> to vector<8x8xf32>
    %414 = vector.extract_strided_slice %412 {offsets = [0, 8], sizes = [8, 8], strides = [1, 1]} : vector<8x16xf32> to vector<8x8xf32>
    %cst_144 = arith.constant 0.000000e+00 : f32
    %415 = vector.broadcast %cst_144 : f32 to vector<8x8xf32>
    %416 = arith.maximumf %414, %415 : vector<8x8xf32>
    %417 = vector.broadcast %cst_144 : f32 to vector<8x8xf32>
    %418 = arith.subf %414, %417 : vector<8x8xf32>
    %419 = arith.cmpf one, %418, %418 : vector<8x8xf32>
    %420 = vector.broadcast %cst_144 : f32 to vector<8x8xf32>
    %421 = arith.addf %414, %420 : vector<8x8xf32>
    %422 = math.absf %418 : vector<8x8xf32>
    %cst_145 = arith.constant 0.000000e+00 : f32
    %423 = vector.broadcast %cst_145 : f32 to vector<8x8xf32>
    %424 = arith.subf %423, %422 : vector<8x8xf32>
    %425 = math.exp %424 : vector<8x8xf32>
    %426 = math.log1p %425 : vector<8x8xf32>
    %427 = arith.addf %416, %426 : vector<8x8xf32>
    %428 = arith.select %419, %421, %427 : vector<8x8xi1>, vector<8x8xf32>
    %429 = arith.mulf %374, %406 : vector<8x8xf32>
    %430 = arith.addf %429, %391 : vector<8x8xf32>
    %431 = arith.truncf %430 : vector<8x8xf32> to vector<8x8xbf16>
    %cst_146 = arith.constant dense<0.000000e+00> : vector<8x32xf32>
    %432 = tpu.matmul %431, %7, %cst_146 {dimension_numbers = #tpu.dot_dimension_numbers<[1], [0], [0], [1], [0, 0, 1, 1], [], []>} : vector<8x8xbf16>, vector<8x32xbf16>, vector<8x32xf32> -> vector<8x32xf32>
    %433 = arith.addf %432, %23 : vector<8x32xf32>
    %cst_147 = arith.constant 0.000000e+00 : f32
    %434 = vector.broadcast %cst_147 : f32 to vector<8x32xf32>
    %435 = arith.maximumf %433, %434 : vector<8x32xf32>
    %436 = vector.extract_strided_slice %372 {offsets = [0, 32], sizes = [8, 96], strides = [1, 1]} : vector<8x128xf32> to vector<8x96xf32>
    %437 = arith.truncf %435 : vector<8x32xf32> to vector<8x32xbf16>
    %cst_148 = arith.constant dense<0.000000e+00> : vector<8x96xf32>
    %438 = tpu.matmul %437, %8, %cst_148 {dimension_numbers = #tpu.dot_dimension_numbers<[1], [0], [0], [1], [0, 0, 1, 1], [], []>} : vector<8x32xbf16>, vector<32x96xbf16>, vector<8x96xf32> -> vector<8x96xf32>
    %439 = arith.addf %436, %438 : vector<8x96xf32>
    %440 = vector.extract_strided_slice %377 {offsets = [0, 64], sizes = [8, 96], strides = [1, 1]} : vector<8x160xf32> to vector<8x96xf32>
    %441 = vector.extract_strided_slice %439 {offsets = [0, 0], sizes = [8, 32], strides = [1, 1]} : vector<8x96xf32> to vector<8x32xf32>
    %442 = vector.extract_strided_slice %440 {offsets = [0, 0], sizes = [8, 32], strides = [1, 1]} : vector<8x96xf32> to vector<8x32xf32>
    %443 = arith.addf %441, %442 : vector<8x32xf32>
    %444 = arith.negf %443 : vector<8x32xf32>
    %445 = math.exp %444 : vector<8x32xf32>
    %cst_149 = arith.constant 1.000000e+00 : f32
    %446 = vector.broadcast %cst_149 : f32 to vector<8x32xf32>
    %447 = arith.addf %446, %445 : vector<8x32xf32>
    %448 = arith.divf %446, %447 : vector<8x32xf32>
    %449 = vector.extract_strided_slice %439 {offsets = [0, 32], sizes = [8, 32], strides = [1, 1]} : vector<8x96xf32> to vector<8x32xf32>
    %450 = vector.extract_strided_slice %440 {offsets = [0, 32], sizes = [8, 32], strides = [1, 1]} : vector<8x96xf32> to vector<8x32xf32>
    %451 = arith.addf %449, %450 : vector<8x32xf32>
    %452 = arith.negf %451 : vector<8x32xf32>
    %453 = math.exp %452 : vector<8x32xf32>
    %cst_150 = arith.constant 1.000000e+00 : f32
    %454 = vector.broadcast %cst_150 : f32 to vector<8x32xf32>
    %455 = arith.addf %454, %453 : vector<8x32xf32>
    %456 = arith.divf %454, %455 : vector<8x32xf32>
    %457 = vector.extract_strided_slice %439 {offsets = [0, 64], sizes = [8, 32], strides = [1, 1]} : vector<8x96xf32> to vector<8x32xf32>
    %458 = vector.extract_strided_slice %440 {offsets = [0, 64], sizes = [8, 32], strides = [1, 1]} : vector<8x96xf32> to vector<8x32xf32>
    %459 = arith.mulf %448, %458 : vector<8x32xf32>
    %460 = arith.addf %457, %459 : vector<8x32xf32>
    %461 = math.tanh %460 : vector<8x32xf32>
    %cst_151 = arith.constant 1.000000e+00 : f32
    %462 = vector.broadcast %cst_151 : f32 to vector<8x32xf32>
    %463 = arith.subf %462, %456 : vector<8x32xf32>
    %464 = arith.mulf %463, %461 : vector<8x32xf32>
    %465 = arith.mulf %456, %359 : vector<8x32xf32>
    %466 = arith.addf %464, %465 : vector<8x32xf32>
    %c3_152 = arith.constant 3 : index
    %c0_153 = arith.constant 0 : index
    %c0_154 = arith.constant 0 : index
    %467 = vector.load %arg20[%c3_152, %c0_153, %c0_154] : memref<6x8x32xf32, #tpu.memory_space<vmem>>, vector<1x8x8xf32>
    %468 = vector.shape_cast %467 : vector<1x8x8xf32> to vector<8x8xf32>
    %469 = vector.shape_cast %391 : vector<8x8xf32> to vector<1x8x8xf32>
    tpu.vector_store %arg20[%c3_152, %c0_153, %c0_154], %469 {strides = array<i32>} : memref<6x8x32xf32, #tpu.memory_space<vmem>>, vector<1x8x8xf32>,
    %c3_155 = arith.constant 3 : index
    %c0_156 = arith.constant 0 : index
    %c8_157 = arith.constant 8 : index
    %470 = vector.load %arg20[%c3_155, %c0_156, %c8_157] : memref<6x8x32xf32, #tpu.memory_space<vmem>>, vector<1x8x8xf32>
    %471 = vector.shape_cast %470 : vector<1x8x8xf32> to vector<8x8xf32>
    %472 = vector.shape_cast %406 : vector<8x8xf32> to vector<1x8x8xf32>
    tpu.vector_store %arg20[%c3_155, %c0_156, %c8_157], %472 {strides = array<i32>} : memref<6x8x32xf32, #tpu.memory_space<vmem>>, vector<1x8x8xf32>,
    %c3_158 = arith.constant 3 : index
    %c0_159 = arith.constant 0 : index
    %c16_160 = arith.constant 16 : index
    %473 = vector.load %arg20[%c3_158, %c0_159, %c16_160] : memref<6x8x32xf32, #tpu.memory_space<vmem>>, vector<1x8x8xf32>
    %474 = vector.shape_cast %473 : vector<1x8x8xf32> to vector<8x8xf32>
    %475 = vector.shape_cast %413 : vector<8x8xf32> to vector<1x8x8xf32>
    tpu.vector_store %arg20[%c3_158, %c0_159, %c16_160], %475 {strides = array<i32>} : memref<6x8x32xf32, #tpu.memory_space<vmem>>, vector<1x8x8xf32>,
    %c3_161 = arith.constant 3 : index
    %c0_162 = arith.constant 0 : index
    %c24_163 = arith.constant 24 : index
    %476 = vector.load %arg20[%c3_161, %c0_162, %c24_163] : memref<6x8x32xf32, #tpu.memory_space<vmem>>, vector<1x8x8xf32>
    %477 = vector.shape_cast %476 : vector<1x8x8xf32> to vector<8x8xf32>
    %478 = vector.shape_cast %428 : vector<8x8xf32> to vector<1x8x8xf32>
    tpu.vector_store %arg20[%c3_161, %c0_162, %c24_163], %478 {strides = array<i32>} : memref<6x8x32xf32, #tpu.memory_space<vmem>>, vector<1x8x8xf32>,
    %479 = vector.extract_strided_slice %46 {offsets = [32, 0], sizes = [8, 128], strides = [1, 1]} : vector<48x128xf32> to vector<8x128xf32>
    %c4 = arith.constant 4 : index
    %c0_164 = arith.constant 0 : index
    %c0_165 = arith.constant 0 : index
    %480 = vector.load %arg2[%c4, %c0_164, %c0_165] : memref<6x8x8xf32, #tpu.memory_space<vmem>>, vector<1x8x8xf32>
    %481 = vector.shape_cast %480 : vector<1x8x8xf32> to vector<8x8xf32>
    %482 = arith.truncf %466 : vector<8x32xf32> to vector<8x32xbf16>
    %cst_166 = arith.constant dense<0.000000e+00> : vector<8x160xf32>
    %483 = tpu.matmul %482, %5, %cst_166 {dimension_numbers = #tpu.dot_dimension_numbers<[1], [0], [0], [1], [0, 0, 1, 1], [], []>} : vector<8x32xbf16>, vector<32x160xbf16>, vector<8x160xf32> -> vector<8x160xf32>
    %484 = arith.addf %483, %17 : vector<8x160xf32>
    %485 = vector.extract_strided_slice %479 {offsets = [0, 0], sizes = [8, 32], strides = [1, 1]} : vector<8x128xf32> to vector<8x32xf32>
    %486 = vector.extract_strided_slice %484 {offsets = [0, 0], sizes = [8, 32], strides = [1, 1]} : vector<8x160xf32> to vector<8x32xf32>
    %487 = arith.addf %485, %486 : vector<8x32xf32>
    %cst_167 = arith.constant 0.000000e+00 : f32
    %488 = vector.broadcast %cst_167 : f32 to vector<8x32xf32>
    %489 = arith.maximumf %487, %488 : vector<8x32xf32>
    %490 = arith.truncf %489 : vector<8x32xf32> to vector<8x32xbf16>
    %cst_168 = arith.constant dense<0.000000e+00> : vector<8x32xf32>
    %491 = tpu.matmul %490, %3, %cst_168 {dimension_numbers = #tpu.dot_dimension_numbers<[1], [0], [0], [1], [0, 0, 1, 1], [], []>} : vector<8x32xbf16>, vector<32x32xbf16>, vector<8x32xf32> -> vector<8x32xf32>
    %492 = arith.addf %491, %11 : vector<8x32xf32>
    %cst_169 = arith.constant 0.000000e+00 : f32
    %493 = vector.broadcast %cst_169 : f32 to vector<8x32xf32>
    %494 = arith.maximumf %492, %493 : vector<8x32xf32>
    %495 = arith.truncf %494 : vector<8x32xf32> to vector<8x32xbf16>
    %cst_170 = arith.constant dense<0.000000e+00> : vector<8x16xf32>
    %496 = tpu.matmul %495, %4, %cst_170 {dimension_numbers = #tpu.dot_dimension_numbers<[1], [0], [0], [1], [0, 0, 1, 1], [], []>} : vector<8x32xbf16>, vector<32x16xbf16>, vector<8x16xf32> -> vector<8x16xf32>
    %497 = arith.addf %496, %14 : vector<8x16xf32>
    %498 = vector.extract_strided_slice %497 {offsets = [0, 0], sizes = [8, 8], strides = [1, 1]} : vector<8x16xf32> to vector<8x8xf32>
    %499 = vector.extract_strided_slice %497 {offsets = [0, 8], sizes = [8, 8], strides = [1, 1]} : vector<8x16xf32> to vector<8x8xf32>
    %cst_171 = arith.constant 0.000000e+00 : f32
    %500 = vector.broadcast %cst_171 : f32 to vector<8x8xf32>
    %501 = arith.maximumf %499, %500 : vector<8x8xf32>
    %502 = vector.broadcast %cst_171 : f32 to vector<8x8xf32>
    %503 = arith.subf %499, %502 : vector<8x8xf32>
    %504 = arith.cmpf one, %503, %503 : vector<8x8xf32>
    %505 = vector.broadcast %cst_171 : f32 to vector<8x8xf32>
    %506 = arith.addf %499, %505 : vector<8x8xf32>
    %507 = math.absf %503 : vector<8x8xf32>
    %cst_172 = arith.constant 0.000000e+00 : f32
    %508 = vector.broadcast %cst_172 : f32 to vector<8x8xf32>
    %509 = arith.subf %508, %507 : vector<8x8xf32>
    %510 = math.exp %509 : vector<8x8xf32>
    %511 = math.log1p %510 : vector<8x8xf32>
    %512 = arith.addf %501, %511 : vector<8x8xf32>
    %513 = arith.select %504, %506, %512 : vector<8x8xi1>, vector<8x8xf32>
    %514 = vector.extract_strided_slice %484 {offsets = [0, 32], sizes = [8, 32], strides = [1, 1]} : vector<8x160xf32> to vector<8x32xf32>
    %cst_173 = arith.constant 0.000000e+00 : f32
    %515 = vector.broadcast %cst_173 : f32 to vector<8x32xf32>
    %516 = arith.maximumf %514, %515 : vector<8x32xf32>
    %517 = arith.truncf %516 : vector<8x32xf32> to vector<8x32xbf16>
    %cst_174 = arith.constant dense<0.000000e+00> : vector<8x16xf32>
    %518 = tpu.matmul %517, %6, %cst_174 {dimension_numbers = #tpu.dot_dimension_numbers<[1], [0], [0], [1], [0, 0, 1, 1], [], []>} : vector<8x32xbf16>, vector<32x16xbf16>, vector<8x16xf32> -> vector<8x16xf32>
    %519 = arith.addf %518, %20 : vector<8x16xf32>
    %520 = vector.extract_strided_slice %519 {offsets = [0, 0], sizes = [8, 8], strides = [1, 1]} : vector<8x16xf32> to vector<8x8xf32>
    %521 = vector.extract_strided_slice %519 {offsets = [0, 8], sizes = [8, 8], strides = [1, 1]} : vector<8x16xf32> to vector<8x8xf32>
    %cst_175 = arith.constant 0.000000e+00 : f32
    %522 = vector.broadcast %cst_175 : f32 to vector<8x8xf32>
    %523 = arith.maximumf %521, %522 : vector<8x8xf32>
    %524 = vector.broadcast %cst_175 : f32 to vector<8x8xf32>
    %525 = arith.subf %521, %524 : vector<8x8xf32>
    %526 = arith.cmpf one, %525, %525 : vector<8x8xf32>
    %527 = vector.broadcast %cst_175 : f32 to vector<8x8xf32>
    %528 = arith.addf %521, %527 : vector<8x8xf32>
    %529 = math.absf %525 : vector<8x8xf32>
    %cst_176 = arith.constant 0.000000e+00 : f32
    %530 = vector.broadcast %cst_176 : f32 to vector<8x8xf32>
    %531 = arith.subf %530, %529 : vector<8x8xf32>
    %532 = math.exp %531 : vector<8x8xf32>
    %533 = math.log1p %532 : vector<8x8xf32>
    %534 = arith.addf %523, %533 : vector<8x8xf32>
    %535 = arith.select %526, %528, %534 : vector<8x8xi1>, vector<8x8xf32>
    %536 = arith.mulf %481, %513 : vector<8x8xf32>
    %537 = arith.addf %536, %498 : vector<8x8xf32>
    %538 = arith.truncf %537 : vector<8x8xf32> to vector<8x8xbf16>
    %cst_177 = arith.constant dense<0.000000e+00> : vector<8x32xf32>
    %539 = tpu.matmul %538, %7, %cst_177 {dimension_numbers = #tpu.dot_dimension_numbers<[1], [0], [0], [1], [0, 0, 1, 1], [], []>} : vector<8x8xbf16>, vector<8x32xbf16>, vector<8x32xf32> -> vector<8x32xf32>
    %540 = arith.addf %539, %23 : vector<8x32xf32>
    %cst_178 = arith.constant 0.000000e+00 : f32
    %541 = vector.broadcast %cst_178 : f32 to vector<8x32xf32>
    %542 = arith.maximumf %540, %541 : vector<8x32xf32>
    %543 = vector.extract_strided_slice %479 {offsets = [0, 32], sizes = [8, 96], strides = [1, 1]} : vector<8x128xf32> to vector<8x96xf32>
    %544 = arith.truncf %542 : vector<8x32xf32> to vector<8x32xbf16>
    %cst_179 = arith.constant dense<0.000000e+00> : vector<8x96xf32>
    %545 = tpu.matmul %544, %8, %cst_179 {dimension_numbers = #tpu.dot_dimension_numbers<[1], [0], [0], [1], [0, 0, 1, 1], [], []>} : vector<8x32xbf16>, vector<32x96xbf16>, vector<8x96xf32> -> vector<8x96xf32>
    %546 = arith.addf %543, %545 : vector<8x96xf32>
    %547 = vector.extract_strided_slice %484 {offsets = [0, 64], sizes = [8, 96], strides = [1, 1]} : vector<8x160xf32> to vector<8x96xf32>
    %548 = vector.extract_strided_slice %546 {offsets = [0, 0], sizes = [8, 32], strides = [1, 1]} : vector<8x96xf32> to vector<8x32xf32>
    %549 = vector.extract_strided_slice %547 {offsets = [0, 0], sizes = [8, 32], strides = [1, 1]} : vector<8x96xf32> to vector<8x32xf32>
    %550 = arith.addf %548, %549 : vector<8x32xf32>
    %551 = arith.negf %550 : vector<8x32xf32>
    %552 = math.exp %551 : vector<8x32xf32>
    %cst_180 = arith.constant 1.000000e+00 : f32
    %553 = vector.broadcast %cst_180 : f32 to vector<8x32xf32>
    %554 = arith.addf %553, %552 : vector<8x32xf32>
    %555 = arith.divf %553, %554 : vector<8x32xf32>
    %556 = vector.extract_strided_slice %546 {offsets = [0, 32], sizes = [8, 32], strides = [1, 1]} : vector<8x96xf32> to vector<8x32xf32>
    %557 = vector.extract_strided_slice %547 {offsets = [0, 32], sizes = [8, 32], strides = [1, 1]} : vector<8x96xf32> to vector<8x32xf32>
    %558 = arith.addf %556, %557 : vector<8x32xf32>
    %559 = arith.negf %558 : vector<8x32xf32>
    %560 = math.exp %559 : vector<8x32xf32>
    %cst_181 = arith.constant 1.000000e+00 : f32
    %561 = vector.broadcast %cst_181 : f32 to vector<8x32xf32>
    %562 = arith.addf %561, %560 : vector<8x32xf32>
    %563 = arith.divf %561, %562 : vector<8x32xf32>
    %564 = vector.extract_strided_slice %546 {offsets = [0, 64], sizes = [8, 32], strides = [1, 1]} : vector<8x96xf32> to vector<8x32xf32>
    %565 = vector.extract_strided_slice %547 {offsets = [0, 64], sizes = [8, 32], strides = [1, 1]} : vector<8x96xf32> to vector<8x32xf32>
    %566 = arith.mulf %555, %565 : vector<8x32xf32>
    %567 = arith.addf %564, %566 : vector<8x32xf32>
    %568 = math.tanh %567 : vector<8x32xf32>
    %cst_182 = arith.constant 1.000000e+00 : f32
    %569 = vector.broadcast %cst_182 : f32 to vector<8x32xf32>
    %570 = arith.subf %569, %563 : vector<8x32xf32>
    %571 = arith.mulf %570, %568 : vector<8x32xf32>
    %572 = arith.mulf %563, %466 : vector<8x32xf32>
    %573 = arith.addf %571, %572 : vector<8x32xf32>
    %c4_183 = arith.constant 4 : index
    %c0_184 = arith.constant 0 : index
    %c0_185 = arith.constant 0 : index
    %574 = vector.load %arg20[%c4_183, %c0_184, %c0_185] : memref<6x8x32xf32, #tpu.memory_space<vmem>>, vector<1x8x8xf32>
    %575 = vector.shape_cast %574 : vector<1x8x8xf32> to vector<8x8xf32>
    %576 = vector.shape_cast %498 : vector<8x8xf32> to vector<1x8x8xf32>
    tpu.vector_store %arg20[%c4_183, %c0_184, %c0_185], %576 {strides = array<i32>} : memref<6x8x32xf32, #tpu.memory_space<vmem>>, vector<1x8x8xf32>,
    %c4_186 = arith.constant 4 : index
    %c0_187 = arith.constant 0 : index
    %c8_188 = arith.constant 8 : index
    %577 = vector.load %arg20[%c4_186, %c0_187, %c8_188] : memref<6x8x32xf32, #tpu.memory_space<vmem>>, vector<1x8x8xf32>
    %578 = vector.shape_cast %577 : vector<1x8x8xf32> to vector<8x8xf32>
    %579 = vector.shape_cast %513 : vector<8x8xf32> to vector<1x8x8xf32>
    tpu.vector_store %arg20[%c4_186, %c0_187, %c8_188], %579 {strides = array<i32>} : memref<6x8x32xf32, #tpu.memory_space<vmem>>, vector<1x8x8xf32>,
    %c4_189 = arith.constant 4 : index
    %c0_190 = arith.constant 0 : index
    %c16_191 = arith.constant 16 : index
    %580 = vector.load %arg20[%c4_189, %c0_190, %c16_191] : memref<6x8x32xf32, #tpu.memory_space<vmem>>, vector<1x8x8xf32>
    %581 = vector.shape_cast %580 : vector<1x8x8xf32> to vector<8x8xf32>
    %582 = vector.shape_cast %520 : vector<8x8xf32> to vector<1x8x8xf32>
    tpu.vector_store %arg20[%c4_189, %c0_190, %c16_191], %582 {strides = array<i32>} : memref<6x8x32xf32, #tpu.memory_space<vmem>>, vector<1x8x8xf32>,
    %c4_192 = arith.constant 4 : index
    %c0_193 = arith.constant 0 : index
    %c24_194 = arith.constant 24 : index
    %583 = vector.load %arg20[%c4_192, %c0_193, %c24_194] : memref<6x8x32xf32, #tpu.memory_space<vmem>>, vector<1x8x8xf32>
    %584 = vector.shape_cast %583 : vector<1x8x8xf32> to vector<8x8xf32>
    %585 = vector.shape_cast %535 : vector<8x8xf32> to vector<1x8x8xf32>
    tpu.vector_store %arg20[%c4_192, %c0_193, %c24_194], %585 {strides = array<i32>} : memref<6x8x32xf32, #tpu.memory_space<vmem>>, vector<1x8x8xf32>,
    %586 = vector.extract_strided_slice %46 {offsets = [40, 0], sizes = [8, 128], strides = [1, 1]} : vector<48x128xf32> to vector<8x128xf32>
    %c5 = arith.constant 5 : index
    %c0_195 = arith.constant 0 : index
    %c0_196 = arith.constant 0 : index
    %587 = vector.load %arg2[%c5, %c0_195, %c0_196] : memref<6x8x8xf32, #tpu.memory_space<vmem>>, vector<1x8x8xf32>
    %588 = vector.shape_cast %587 : vector<1x8x8xf32> to vector<8x8xf32>
    %589 = arith.truncf %573 : vector<8x32xf32> to vector<8x32xbf16>
    %cst_197 = arith.constant dense<0.000000e+00> : vector<8x160xf32>
    %590 = tpu.matmul %589, %5, %cst_197 {dimension_numbers = #tpu.dot_dimension_numbers<[1], [0], [0], [1], [0, 0, 1, 1], [], []>} : vector<8x32xbf16>, vector<32x160xbf16>, vector<8x160xf32> -> vector<8x160xf32>
    %591 = arith.addf %590, %17 : vector<8x160xf32>
    %592 = vector.extract_strided_slice %586 {offsets = [0, 0], sizes = [8, 32], strides = [1, 1]} : vector<8x128xf32> to vector<8x32xf32>
    %593 = vector.extract_strided_slice %591 {offsets = [0, 0], sizes = [8, 32], strides = [1, 1]} : vector<8x160xf32> to vector<8x32xf32>
    %594 = arith.addf %592, %593 : vector<8x32xf32>
    %cst_198 = arith.constant 0.000000e+00 : f32
    %595 = vector.broadcast %cst_198 : f32 to vector<8x32xf32>
    %596 = arith.maximumf %594, %595 : vector<8x32xf32>
    %597 = arith.truncf %596 : vector<8x32xf32> to vector<8x32xbf16>
    %cst_199 = arith.constant dense<0.000000e+00> : vector<8x32xf32>
    %598 = tpu.matmul %597, %3, %cst_199 {dimension_numbers = #tpu.dot_dimension_numbers<[1], [0], [0], [1], [0, 0, 1, 1], [], []>} : vector<8x32xbf16>, vector<32x32xbf16>, vector<8x32xf32> -> vector<8x32xf32>
    %599 = arith.addf %598, %11 : vector<8x32xf32>
    %cst_200 = arith.constant 0.000000e+00 : f32
    %600 = vector.broadcast %cst_200 : f32 to vector<8x32xf32>
    %601 = arith.maximumf %599, %600 : vector<8x32xf32>
    %602 = arith.truncf %601 : vector<8x32xf32> to vector<8x32xbf16>
    %cst_201 = arith.constant dense<0.000000e+00> : vector<8x16xf32>
    %603 = tpu.matmul %602, %4, %cst_201 {dimension_numbers = #tpu.dot_dimension_numbers<[1], [0], [0], [1], [0, 0, 1, 1], [], []>} : vector<8x32xbf16>, vector<32x16xbf16>, vector<8x16xf32> -> vector<8x16xf32>
    %604 = arith.addf %603, %14 : vector<8x16xf32>
    %605 = vector.extract_strided_slice %604 {offsets = [0, 0], sizes = [8, 8], strides = [1, 1]} : vector<8x16xf32> to vector<8x8xf32>
    %606 = vector.extract_strided_slice %604 {offsets = [0, 8], sizes = [8, 8], strides = [1, 1]} : vector<8x16xf32> to vector<8x8xf32>
    %cst_202 = arith.constant 0.000000e+00 : f32
    %607 = vector.broadcast %cst_202 : f32 to vector<8x8xf32>
    %608 = arith.maximumf %606, %607 : vector<8x8xf32>
    %609 = vector.broadcast %cst_202 : f32 to vector<8x8xf32>
    %610 = arith.subf %606, %609 : vector<8x8xf32>
    %611 = arith.cmpf one, %610, %610 : vector<8x8xf32>
    %612 = vector.broadcast %cst_202 : f32 to vector<8x8xf32>
    %613 = arith.addf %606, %612 : vector<8x8xf32>
    %614 = math.absf %610 : vector<8x8xf32>
    %cst_203 = arith.constant 0.000000e+00 : f32
    %615 = vector.broadcast %cst_203 : f32 to vector<8x8xf32>
    %616 = arith.subf %615, %614 : vector<8x8xf32>
    %617 = math.exp %616 : vector<8x8xf32>
    %618 = math.log1p %617 : vector<8x8xf32>
    %619 = arith.addf %608, %618 : vector<8x8xf32>
    %620 = arith.select %611, %613, %619 : vector<8x8xi1>, vector<8x8xf32>
    %621 = vector.extract_strided_slice %591 {offsets = [0, 32], sizes = [8, 32], strides = [1, 1]} : vector<8x160xf32> to vector<8x32xf32>
    %cst_204 = arith.constant 0.000000e+00 : f32
    %622 = vector.broadcast %cst_204 : f32 to vector<8x32xf32>
    %623 = arith.maximumf %621, %622 : vector<8x32xf32>
    %624 = arith.truncf %623 : vector<8x32xf32> to vector<8x32xbf16>
    %cst_205 = arith.constant dense<0.000000e+00> : vector<8x16xf32>
    %625 = tpu.matmul %624, %6, %cst_205 {dimension_numbers = #tpu.dot_dimension_numbers<[1], [0], [0], [1], [0, 0, 1, 1], [], []>} : vector<8x32xbf16>, vector<32x16xbf16>, vector<8x16xf32> -> vector<8x16xf32>
    %626 = arith.addf %625, %20 : vector<8x16xf32>
    %627 = vector.extract_strided_slice %626 {offsets = [0, 0], sizes = [8, 8], strides = [1, 1]} : vector<8x16xf32> to vector<8x8xf32>
    %628 = vector.extract_strided_slice %626 {offsets = [0, 8], sizes = [8, 8], strides = [1, 1]} : vector<8x16xf32> to vector<8x8xf32>
    %cst_206 = arith.constant 0.000000e+00 : f32
    %629 = vector.broadcast %cst_206 : f32 to vector<8x8xf32>
    %630 = arith.maximumf %628, %629 : vector<8x8xf32>
    %631 = vector.broadcast %cst_206 : f32 to vector<8x8xf32>
    %632 = arith.subf %628, %631 : vector<8x8xf32>
    %633 = arith.cmpf one, %632, %632 : vector<8x8xf32>
    %634 = vector.broadcast %cst_206 : f32 to vector<8x8xf32>
    %635 = arith.addf %628, %634 : vector<8x8xf32>
    %636 = math.absf %632 : vector<8x8xf32>
    %cst_207 = arith.constant 0.000000e+00 : f32
    %637 = vector.broadcast %cst_207 : f32 to vector<8x8xf32>
    %638 = arith.subf %637, %636 : vector<8x8xf32>
    %639 = math.exp %638 : vector<8x8xf32>
    %640 = math.log1p %639 : vector<8x8xf32>
    %641 = arith.addf %630, %640 : vector<8x8xf32>
    %642 = arith.select %633, %635, %641 : vector<8x8xi1>, vector<8x8xf32>
    %643 = arith.mulf %588, %620 : vector<8x8xf32>
    %644 = arith.addf %643, %605 : vector<8x8xf32>
    %645 = arith.truncf %644 : vector<8x8xf32> to vector<8x8xbf16>
    %cst_208 = arith.constant dense<0.000000e+00> : vector<8x32xf32>
    %646 = tpu.matmul %645, %7, %cst_208 {dimension_numbers = #tpu.dot_dimension_numbers<[1], [0], [0], [1], [0, 0, 1, 1], [], []>} : vector<8x8xbf16>, vector<8x32xbf16>, vector<8x32xf32> -> vector<8x32xf32>
    %647 = arith.addf %646, %23 : vector<8x32xf32>
    %cst_209 = arith.constant 0.000000e+00 : f32
    %648 = vector.broadcast %cst_209 : f32 to vector<8x32xf32>
    %649 = arith.maximumf %647, %648 : vector<8x32xf32>
    %650 = vector.extract_strided_slice %586 {offsets = [0, 32], sizes = [8, 96], strides = [1, 1]} : vector<8x128xf32> to vector<8x96xf32>
    %651 = arith.truncf %649 : vector<8x32xf32> to vector<8x32xbf16>
    %cst_210 = arith.constant dense<0.000000e+00> : vector<8x96xf32>
    %652 = tpu.matmul %651, %8, %cst_210 {dimension_numbers = #tpu.dot_dimension_numbers<[1], [0], [0], [1], [0, 0, 1, 1], [], []>} : vector<8x32xbf16>, vector<32x96xbf16>, vector<8x96xf32> -> vector<8x96xf32>
    %653 = arith.addf %650, %652 : vector<8x96xf32>
    %654 = vector.extract_strided_slice %591 {offsets = [0, 64], sizes = [8, 96], strides = [1, 1]} : vector<8x160xf32> to vector<8x96xf32>
    %655 = vector.extract_strided_slice %653 {offsets = [0, 0], sizes = [8, 32], strides = [1, 1]} : vector<8x96xf32> to vector<8x32xf32>
    %656 = vector.extract_strided_slice %654 {offsets = [0, 0], sizes = [8, 32], strides = [1, 1]} : vector<8x96xf32> to vector<8x32xf32>
    %657 = arith.addf %655, %656 : vector<8x32xf32>
    %658 = arith.negf %657 : vector<8x32xf32>
    %659 = math.exp %658 : vector<8x32xf32>
    %cst_211 = arith.constant 1.000000e+00 : f32
    %660 = vector.broadcast %cst_211 : f32 to vector<8x32xf32>
    %661 = arith.addf %660, %659 : vector<8x32xf32>
    %662 = arith.divf %660, %661 : vector<8x32xf32>
    %663 = vector.extract_strided_slice %653 {offsets = [0, 32], sizes = [8, 32], strides = [1, 1]} : vector<8x96xf32> to vector<8x32xf32>
    %664 = vector.extract_strided_slice %654 {offsets = [0, 32], sizes = [8, 32], strides = [1, 1]} : vector<8x96xf32> to vector<8x32xf32>
    %665 = arith.addf %663, %664 : vector<8x32xf32>
    %666 = arith.negf %665 : vector<8x32xf32>
    %667 = math.exp %666 : vector<8x32xf32>
    %cst_212 = arith.constant 1.000000e+00 : f32
    %668 = vector.broadcast %cst_212 : f32 to vector<8x32xf32>
    %669 = arith.addf %668, %667 : vector<8x32xf32>
    %670 = arith.divf %668, %669 : vector<8x32xf32>
    %671 = vector.extract_strided_slice %653 {offsets = [0, 64], sizes = [8, 32], strides = [1, 1]} : vector<8x96xf32> to vector<8x32xf32>
    %672 = vector.extract_strided_slice %654 {offsets = [0, 64], sizes = [8, 32], strides = [1, 1]} : vector<8x96xf32> to vector<8x32xf32>
    %673 = arith.mulf %662, %672 : vector<8x32xf32>
    %674 = arith.addf %671, %673 : vector<8x32xf32>
    %675 = math.tanh %674 : vector<8x32xf32>
    %cst_213 = arith.constant 1.000000e+00 : f32
    %676 = vector.broadcast %cst_213 : f32 to vector<8x32xf32>
    %677 = arith.subf %676, %670 : vector<8x32xf32>
    %678 = arith.mulf %677, %675 : vector<8x32xf32>
    %679 = arith.mulf %670, %573 : vector<8x32xf32>
    %680 = arith.addf %678, %679 : vector<8x32xf32>
    %c5_214 = arith.constant 5 : index
    %c0_215 = arith.constant 0 : index
    %c0_216 = arith.constant 0 : index
    %681 = vector.load %arg20[%c5_214, %c0_215, %c0_216] : memref<6x8x32xf32, #tpu.memory_space<vmem>>, vector<1x8x8xf32>
    %682 = vector.shape_cast %681 : vector<1x8x8xf32> to vector<8x8xf32>
    %683 = vector.shape_cast %605 : vector<8x8xf32> to vector<1x8x8xf32>
    tpu.vector_store %arg20[%c5_214, %c0_215, %c0_216], %683 {strides = array<i32>} : memref<6x8x32xf32, #tpu.memory_space<vmem>>, vector<1x8x8xf32>,
    %c5_217 = arith.constant 5 : index
    %c0_218 = arith.constant 0 : index
    %c8_219 = arith.constant 8 : index
    %684 = vector.load %arg20[%c5_217, %c0_218, %c8_219] : memref<6x8x32xf32, #tpu.memory_space<vmem>>, vector<1x8x8xf32>
    %685 = vector.shape_cast %684 : vector<1x8x8xf32> to vector<8x8xf32>
    %686 = vector.shape_cast %620 : vector<8x8xf32> to vector<1x8x8xf32>
    tpu.vector_store %arg20[%c5_217, %c0_218, %c8_219], %686 {strides = array<i32>} : memref<6x8x32xf32, #tpu.memory_space<vmem>>, vector<1x8x8xf32>,
    %c5_220 = arith.constant 5 : index
    %c0_221 = arith.constant 0 : index
    %c16_222 = arith.constant 16 : index
    %687 = vector.load %arg20[%c5_220, %c0_221, %c16_222] : memref<6x8x32xf32, #tpu.memory_space<vmem>>, vector<1x8x8xf32>
    %688 = vector.shape_cast %687 : vector<1x8x8xf32> to vector<8x8xf32>
    %689 = vector.shape_cast %627 : vector<8x8xf32> to vector<1x8x8xf32>
    tpu.vector_store %arg20[%c5_220, %c0_221, %c16_222], %689 {strides = array<i32>} : memref<6x8x32xf32, #tpu.memory_space<vmem>>, vector<1x8x8xf32>,
    %c5_223 = arith.constant 5 : index
    %c0_224 = arith.constant 0 : index
    %c24_225 = arith.constant 24 : index
    %690 = vector.load %arg20[%c5_223, %c0_224, %c24_225] : memref<6x8x32xf32, #tpu.memory_space<vmem>>, vector<1x8x8xf32>
    %691 = vector.shape_cast %690 : vector<1x8x8xf32> to vector<8x8xf32>
    %692 = vector.shape_cast %642 : vector<8x8xf32> to vector<1x8x8xf32>
    tpu.vector_store %arg20[%c5_223, %c0_224, %c24_225], %692 {strides = array<i32>} : memref<6x8x32xf32, #tpu.memory_space<vmem>>, vector<1x8x8xf32>,
    %c0_226 = arith.constant 0 : index
    %c0_227 = arith.constant 0 : index
    %693 = vector.load %arg22[%c0_226, %c0_227] : memref<8x32xf32, #tpu.memory_space<vmem>>, vector<8x32xf32>
    tpu.vector_store %arg22[%c0_226, %c0_227], %680 {strides = array<i32>} : memref<8x32xf32, #tpu.memory_space<vmem>>, vector<8x32xf32>,
    %c0_i32_228 = arith.constant 0 : i32
    %694 = arith.cmpi eq, %arg0, %c0_i32_228 : i32
    %695 = arith.extui %694 : i1 to i32
    %c0_i32_229 = arith.constant 0 : i32
    %696 = arith.cmpi ne, %695, %c0_i32_229 : i32
    scf.if %696 {
      %c0_230 = arith.constant 0 : index
      %c0_231 = arith.constant 0 : index
      %697 = vector.load %arg21[%c0_230, %c0_231] : memref<8x64xf32, #tpu.memory_space<vmem>>, vector<8x32xf32>
      tpu.vector_store %arg21[%c0_230, %c0_231], %649 {strides = array<i32>} : memref<8x64xf32, #tpu.memory_space<vmem>>, vector<8x32xf32>,
      %c0_232 = arith.constant 0 : index
      %c32 = arith.constant 32 : index
      %698 = vector.load %arg21[%c0_232, %c32] : memref<8x64xf32, #tpu.memory_space<vmem>>, vector<8x32xf32>
      tpu.vector_store %arg21[%c0_232, %c32], %680 {strides = array<i32>} : memref<8x64xf32, #tpu.memory_space<vmem>>, vector<8x32xf32>,
    } else {
    }
    return
  }
  func.func @transform_0(%arg0: i32) -> (i32, i32) {
    %c0_i32 = arith.constant 0 : i32
    %c0_i32_0 = arith.constant 0 : i32
    return %arg0, %c0_i32 : i32, i32
  }
  func.func @transform_1(%arg0: i32) -> (i32, i32, i32) {
    %c0_i32 = arith.constant 0 : i32
    %c0_i32_0 = arith.constant 0 : i32
    %c0_i32_1 = arith.constant 0 : i32
    return %arg0, %c0_i32, %c0_i32_0 : i32, i32, i32
  }
  func.func @transform_2(%arg0: i32) -> (i32, i32) {
    %c0_i32 = arith.constant 0 : i32
    %c0_i32_0 = arith.constant 0 : i32
    %c0_i32_1 = arith.constant 0 : i32
    return %c0_i32, %c0_i32_0 : i32, i32
  }
  func.func @transform_3(%arg0: i32) -> (i32, i32) {
    %c0_i32 = arith.constant 0 : i32
    %c0_i32_0 = arith.constant 0 : i32
    %c0_i32_1 = arith.constant 0 : i32
    return %c0_i32, %c0_i32_0 : i32, i32
  }
  func.func @transform_4(%arg0: i32) -> (i32, i32) {
    %c0_i32 = arith.constant 0 : i32
    %c0_i32_0 = arith.constant 0 : i32
    %c0_i32_1 = arith.constant 0 : i32
    return %c0_i32, %c0_i32_0 : i32, i32
  }
  func.func @transform_5(%arg0: i32) -> (i32, i32) {
    %c0_i32 = arith.constant 0 : i32
    %c0_i32_0 = arith.constant 0 : i32
    %c0_i32_1 = arith.constant 0 : i32
    return %c0_i32, %c0_i32_0 : i32, i32
  }
  func.func @transform_6(%arg0: i32) -> (i32, i32) {
    %c0_i32 = arith.constant 0 : i32
    %c0_i32_0 = arith.constant 0 : i32
    %c0_i32_1 = arith.constant 0 : i32
    return %c0_i32, %c0_i32_0 : i32, i32
  }
  func.func @transform_7(%arg0: i32) -> (i32, i32) {
    %c0_i32 = arith.constant 0 : i32
    %c0_i32_0 = arith.constant 0 : i32
    %c0_i32_1 = arith.constant 0 : i32
    return %c0_i32, %c0_i32_0 : i32, i32
  }
  func.func @transform_8(%arg0: i32) -> (i32, i32) {
    %c0_i32 = arith.constant 0 : i32
    %c0_i32_0 = arith.constant 0 : i32
    %c0_i32_1 = arith.constant 0 : i32
    return %c0_i32, %c0_i32_0 : i32, i32
  }
  func.func @transform_9(%arg0: i32) -> (i32, i32) {
    %c0_i32 = arith.constant 0 : i32
    %c0_i32_0 = arith.constant 0 : i32
    %c0_i32_1 = arith.constant 0 : i32
    return %c0_i32, %c0_i32_0 : i32, i32
  }
  func.func @transform_10(%arg0: i32) -> (i32, i32) {
    %c0_i32 = arith.constant 0 : i32
    %c0_i32_0 = arith.constant 0 : i32
    %c0_i32_1 = arith.constant 0 : i32
    return %c0_i32, %c0_i32_0 : i32, i32
  }
  func.func @transform_11(%arg0: i32) -> (i32, i32) {
    %c0_i32 = arith.constant 0 : i32
    %c0_i32_0 = arith.constant 0 : i32
    %c0_i32_1 = arith.constant 0 : i32
    return %c0_i32, %c0_i32_0 : i32, i32
  }
  func.func @transform_12(%arg0: i32) -> (i32, i32) {
    %c0_i32 = arith.constant 0 : i32
    %c0_i32_0 = arith.constant 0 : i32
    %c0_i32_1 = arith.constant 0 : i32
    return %c0_i32, %c0_i32_0 : i32, i32
  }
  func.func @transform_13(%arg0: i32) -> (i32, i32) {
    %c0_i32 = arith.constant 0 : i32
    %c0_i32_0 = arith.constant 0 : i32
    %c0_i32_1 = arith.constant 0 : i32
    return %c0_i32, %c0_i32_0 : i32, i32
  }
  func.func @transform_14(%arg0: i32) -> (i32, i32) {
    %c0_i32 = arith.constant 0 : i32
    %c0_i32_0 = arith.constant 0 : i32
    %c0_i32_1 = arith.constant 0 : i32
    return %c0_i32, %c0_i32_0 : i32, i32
  }
  func.func @transform_15(%arg0: i32) -> (i32, i32) {
    %c0_i32 = arith.constant 0 : i32
    %c0_i32_0 = arith.constant 0 : i32
    %c0_i32_1 = arith.constant 0 : i32
    return %c0_i32, %c0_i32_0 : i32, i32
  }
  func.func @transform_16(%arg0: i32) -> (i32, i32) {
    %c0_i32 = arith.constant 0 : i32
    %c0_i32_0 = arith.constant 0 : i32
    %c0_i32_1 = arith.constant 0 : i32
    return %c0_i32, %c0_i32_0 : i32, i32
  }
  func.func @transform_17(%arg0: i32) -> (i32, i32) {
    %c0_i32 = arith.constant 0 : i32
    %c0_i32_0 = arith.constant 0 : i32
    %c0_i32_1 = arith.constant 0 : i32
    return %c0_i32, %c0_i32_0 : i32, i32
  }
  func.func @transform_18(%arg0: i32) -> (i32, i32) {
    %c0_i32 = arith.constant 0 : i32
    %c0_i32_0 = arith.constant 0 : i32
    %c0_i32_1 = arith.constant 0 : i32
    return %c0_i32, %c0_i32_0 : i32, i32
  }
  func.func @transform_19(%arg0: i32) -> (i32, i32, i32) {
    %c0_i32 = arith.constant 0 : i32
    %c0_i32_0 = arith.constant 0 : i32
    %c0_i32_1 = arith.constant 0 : i32
    return %arg0, %c0_i32, %c0_i32_0 : i32, i32, i32
  }
  func.func @transform_20(%arg0: i32) -> (i32, i32) {
    %c0_i32 = arith.constant 0 : i32
    %c0_i32_0 = arith.constant 0 : i32
    %c0_i32_1 = arith.constant 0 : i32
    return %c0_i32, %c0_i32_0 : i32, i32
  }
}

</mosaic_0001>

<bundles_post_ra>
// kernel: tpu_custom_call.1
= control target key start
LH: loop header
LB: loop body
LE: loop exit
PB: predicated region body
PF: predicated region fallthrough
CT: control target
= control target key end

     0   :  { %s4554_s0 = inlined_call_operand.vmem [shape: f32[48,16], index: 0, kind: input, shape index: {}]   ;;  %s4555_s1 = inlined_call_operand.vmem [shape: f32[6,8,8], index: 1, kind: input, shape index: {}]   ;;  %s4556_s2 = inlined_call_operand.hbm [shape: bf16[16,32], index: 2, kind: input, shape index: {}]   ;;  %s4557_s3 = inlined_call_operand.vmem [shape: f32[1,32], index: 3, kind: input, shape index: {}]   ;;  %s4558_s4 = inlined_call_operand.vmem [shape: bf16[32,32], index: 4, kind: input, shape index: {}]   ;;  %s4559_s5 = inlined_call_operand.hbm [shape: f32[1,32], index: 5, kind: input, shape index: {}]   ;;  %s4560_s6 = inlined_call_operand.vmem [shape: bf16[32,128], index: 6, kind: input, shape index: {}]   ;;  %s4561_s7 = inlined_call_operand.hbm [shape: f32[1,128], index: 7, kind: input, shape index: {}]   ;;  %s4562_s8 = inlined_call_operand.hbm [shape: bf16[32,32], index: 8, kind: input, shape index: {}]   ;;  %s4563_s9 = inlined_call_operand.hbm [shape: f32[1,32], index: 9, kind: input, shape index: {}]   ;;  %s4564_s10 = inlined_call_operand.vmem [shape: bf16[32,16], index: 10, kind: input, shape index: {}]   ;;  %s4565_s11 = inlined_call_operand.hbm [shape: f32[1,16], index: 11, kind: input, shape index: {}]   ;;  %s4566_s12 = inlined_call_operand.vmem [shape: bf16[32,160], index: 12, kind: input, shape index: {}]   ;;  %s4567_s13 = inlined_call_operand.vmem [shape: f32[1,160], index: 13, kind: input, shape index: {}]   ;;  %s4568_s14 = inlined_call_operand.vmem [shape: bf16[32,16], index: 14, kind: input, shape index: {}]   ;;  %s4569_s15 = inlined_call_operand.vmem [shape: f32[1,16], index: 15, kind: input, shape index: {}]   ;;  %s4570_s16 = inlined_call_operand.vmem [shape: bf16[8,32], index: 16, kind: input, shape index: {}]   ;;  %s4571_s17 = inlined_call_operand.vmem [shape: f32[1,32], index: 17, kind: input, shape index: {}]   ;;  %s4572_s18 = inlined_call_operand.vmem [shape: bf16[32,96], index: 18, kind: input, shape index: {}]   ;;  %s4573_s19 = inlined_call_operand.hbm [shape: f32[6,8,32], index: 19, kind: output, shape index: {0}]   ;;  %s4574_s20 = inlined_call_operand.hbm [shape: f32[8,64], index: 20, kind: output, shape index: {1}]  }
   0x1   :  { %4579 = sst [smem:[#allocation23_spill]] %s4554_s0 }
   0x2   :  { %4580 = sst [smem:[#allocation24_spill]] %s4555_s1 }
   0x3   :  { %4581 = sst [smem:[#allocation25_spill]] %s4556_s2 }
   0x4   :  { %4582 = sst [smem:[#allocation26_spill]] %s4557_s3 }
   0x5   :  { %4583 = sst [smem:[#allocation27_spill]] %s4558_s4 }
   0x6   :  { %26 = vsyncpa [#allocation4], 0 }
   0x7   :  { %27 = vsyncpa [#allocation7], 0 }
   0x8   :  { %28 = vsyncpa [#allocation10], 0 }
   0x9   :  { %29 = vsyncpa [#allocation13], 0 }
   0xa   :  { %30 = vsyncpa [#allocation5], 0 }
   0xb   :  { %31 = vsyncpa [#allocation16], 0  ;;  %s3604_s1 = smov [#allocation6]   ;;  %s3416_s2 = scalar_lea.hbm %s4559_s5, 16 }
   0xc   :  { %s58_s22 = sshll.u32 %s3604_s1, 4  ;;  %p3417_p0 = scmp.ne.s32.totalorder %s4559_s5, %s3416_s2  ;;  %s59_s22 = int_to_ptr.vmem [resolvable:$true] %s58_s22 }
   0xd   :  { %p3420_p1 = scmp.lt.u32.totalorder %s3416_s2, %s4559_s5 }
   0xf   :  { %p3422_p2 = pnand %p3420_p1, %p3417_p0 }
  0x11   :  { %3425 = shalt.err (!%p3422_p2)
}
  0x12   :  { %s3426_s28 = scalar_lea.vmem %s59_s22, 16  ;;  %s3430_s4 = scalar_lea.vmem %s59_s22, 32 }
  0x13   :  { %p3427_p3 = scmp.ne.s32.totalorder %s59_s22, %s3426_s28  ;;  %p3431_p4 = scmp.lt.s32.totalorder %s59_s22, %s59_s22 }
  0x14   :  { %p3432_p5 = scmp.lt.s32.totalorder %s3430_s4, %s3426_s28 }
  0x16   :  { %p3433_p6 = por %p3432_p5, %p3431_p4 }
  0x18   :  { %p3434_p7 = pnand %p3433_p6, %p3427_p3 }
  0x1a   :  { %3437 = shalt.err (!%p3434_p7)
}
  0x1b   :  { %61 = dma.hbm_to_vmem [thread:$0]  %s4559_s5, 16, %s59_s22, [#allocation7]  }
  0x1c   :  { %s3605_s0 = smov [#allocation9]   ;;  %s3606_s1 = smov [#allocation3]  }
  0x1d   :  { %s79_s21 = sshll.u32 %s3605_s0, 4  ;;  %s41_s23 = sshll.u32 %s3606_s1, 4  ;;  %s80_s21 = int_to_ptr.vmem [resolvable:$true] %s79_s21  ;;  %s42_s23 = int_to_ptr.vmem [resolvable:$true] %s41_s23 }
  0x1e   :  { %s3438_s25 = scalar_lea.hbm %s4562_s8, 256 }
  0x1f   :  { %p3439_p8 = scmp.ne.s32.totalorder %s4562_s8, %s3438_s25  ;;  %p3442_p9 = scmp.lt.u32.totalorder %s3438_s25, %s4562_s8 }
  0x21   :  { %p3444_p10 = pnand %p3442_p9, %p3439_p8 }
  0x23   :  { %3447 = shalt.err (!%p3444_p10)
}
  0x24   :  { %s3448_s5 = scalar_lea.vmem %s80_s21, 256  ;;  %p3453_p12 = scmp.lt.s32.totalorder %s80_s21, %s80_s21 }
  0x25   :  { %p3449_p11 = scmp.ne.s32.totalorder %s80_s21, %s3448_s5  ;;  %p3454_p13 = scmp.lt.s32.totalorder %s3448_s5, %s3448_s5 }
  0x27   :  { %p3455_p0 = por %p3454_p13, %p3453_p12 }
  0x29   :  { %p3456_p1 = pnand %p3455_p0, %p3449_p11 }
  0x2b   :  { %3459 = shalt.err (!%p3456_p1)
}
  0x2c   :  { %s3607_s22 = smov 64   ;;  %s3608_s4 = smov 4  }
  0x2d   :  { %85 = dma.hbm_to_vmem [thread:$0]  %s4562_s8, 256, %s80_s21, [#allocation10], %s3607_s22, %s3607_s22, %s3608_s4  }
  0x2e   :  { %s4584_s24 = sld [smem:[#allocation25_spill]] }
  0x34   :  { %s3460_s2 = scalar_lea.hbm %s4584_s24, 128 }
  0x35   :  { %p3461_p2 = scmp.ne.s32.totalorder %s4584_s24, %s3460_s2  ;;  %p3464_p3 = scmp.lt.u32.totalorder %s3460_s2, %s4584_s24 }
  0x37   :  { %p3466_p4 = pnand %p3464_p3, %p3461_p2 }
  0x39   :  { %3469 = shalt.err (!%p3466_p4)
}
  0x3a   :  { %s3470_s28 = scalar_lea.vmem %s42_s23, 128  ;;  %p3475_p6 = scmp.lt.s32.totalorder %s42_s23, %s42_s23 }
  0x3b   :  { %p3471_p5 = scmp.ne.s32.totalorder %s42_s23, %s3470_s28  ;;  %p3476_p7 = scmp.lt.s32.totalorder %s3470_s28, %s3470_s28 }
  0x3d   :  { %p3477_p8 = por %p3476_p7, %p3475_p6 }
  0x3f   :  { %p3478_p9 = pnand %p3477_p8, %p3471_p5 }
  0x41   :  { %3481 = shalt.err (!%p3478_p9)
}
  0x42   :  { %47 = dma.hbm_to_vmem [thread:$0]  %s4584_s24, 128, %s42_s23, [#allocation4], %s3607_s22, %s3607_s22, %s3608_s4  }
  0x43   :  { %s3609_s5 = smov [#allocation8]   ;;  %s3610_s30 = smov [#allocation11]  }
  0x44   :  { %s70_s29 = sshll.u32 %s3609_s5, 4  ;;  %s92_s0 = sshll.u32 %s3610_s30, 4  ;;  %s71_s29 = int_to_ptr.vmem [resolvable:$true] %s70_s29  ;;  %s93_s0 = int_to_ptr.vmem [resolvable:$true] %s92_s0 }
  0x45   :  { %s3482_s25 = scalar_lea.hbm %s4561_s7, 16 }
  0x46   :  { %p3483_p10 = scmp.ne.s32.totalorder %s4561_s7, %s3482_s25  ;;  %p3486_p11 = scmp.lt.u32.totalorder %s3482_s25, %s4561_s7 }
  0x48   :  { %p3488_p12 = pnand %p3486_p11, %p3483_p10 }
  0x4a   :  { %3491 = shalt.err (!%p3488_p12)
}
  0x4b   :  { %s3492_s23 = scalar_lea.vmem %s71_s29, 16  ;;  %s3496_s4 = scalar_lea.vmem %s71_s29, 32 }
  0x4c   :  { %p3493_p13 = scmp.ne.s32.totalorder %s71_s29, %s3492_s23  ;;  %p3497_p0 = scmp.lt.s32.totalorder %s71_s29, %s71_s29 }
  0x4d   :  { %p3498_p1 = scmp.lt.s32.totalorder %s3496_s4, %s3492_s23 }
  0x4f   :  { %p3499_p2 = por %p3498_p1, %p3497_p0 }
  0x51   :  { %p3500_p3 = pnand %p3499_p2, %p3493_p13 }
  0x53   :  { %3503 = shalt.err (!%p3500_p3)
}
  0x54   :  { %73 = dma.hbm_to_vmem [thread:$0]  %s4561_s7, 16, %s71_s29, [#allocation7]  }
  0x55   :  { %s3504_s30 = scalar_lea.hbm %s4563_s9, 16 }
  0x56   :  { %p3505_p4 = scmp.ne.s32.totalorder %s4563_s9, %s3504_s30  ;;  %p3508_p5 = scmp.lt.u32.totalorder %s3504_s30, %s4563_s9 }
  0x58   :  { %p3510_p6 = pnand %p3508_p5, %p3505_p4 }
  0x5a   :  { %3513 = shalt.err (!%p3510_p6)
}
  0x5b   :  { %s3514_s26 = scalar_lea.vmem %s93_s0, 16  ;;  %s3518_s27 = scalar_lea.vmem %s93_s0, 32 }
  0x5c   :  { %p3515_p7 = scmp.ne.s32.totalorder %s93_s0, %s3514_s26  ;;  %p3519_p8 = scmp.lt.s32.totalorder %s93_s0, %s93_s0 }
  0x5d   :  { %p3520_p9 = scmp.lt.s32.totalorder %s3518_s27, %s3514_s26 }
  0x5f   :  { %p3521_p10 = por %p3520_p9, %p3519_p8 }
  0x61   :  { %p3522_p11 = pnand %p3521_p10, %p3515_p7 }
  0x63   :  { %3525 = shalt.err (!%p3522_p11)
}
  0x64   :  { %95 = dma.hbm_to_vmem [thread:$0]  %s4563_s9, 16, %s93_s0, [#allocation10]  }
  0x65   :  { %s3611_s28 = smov [#allocation12]   ;;  %s3526_s8 = scalar_lea.hbm %s4565_s11, 16 }
  0x66   :  { %s104_s23 = sshll.u32 %s3611_s28, 4  ;;  %p3527_p12 = scmp.ne.s32.totalorder %s4565_s11, %s3526_s8  ;;  %s105_s23 = int_to_ptr.vmem [resolvable:$true] %s104_s23 }
  0x67   :  { %p3530_p13 = scmp.lt.u32.totalorder %s3526_s8, %s4565_s11 }
  0x69   :  { %p3532_p0 = pnand %p3530_p13, %p3527_p12 }
  0x6b   :  { %3535 = shalt.err (!%p3532_p0)
}
  0x6c   :  { %s3536_s2 = scalar_lea.vmem %s105_s23, 16  ;;  %s3540_s9 = scalar_lea.vmem %s105_s23, 32 }
  0x6d   :  { %p3537_p1 = scmp.ne.s32.totalorder %s105_s23, %s3536_s2  ;;  %p3541_p2 = scmp.lt.s32.totalorder %s105_s23, %s105_s23 }
  0x6e   :  { %p3542_p3 = scmp.lt.s32.totalorder %s3540_s9, %s3536_s2 }
  0x70   :  { %p3543_p4 = por %p3542_p3, %p3541_p2 }
  0x72   :  { %p3544_p5 = pnand %p3543_p4, %p3537_p1 }
  0x74   :  { %3547 = shalt.err (!%p3544_p5)
}
  0x75   :  { %107 = dma.hbm_to_vmem [thread:$0]  %s4565_s11, 16, %s105_s23, [#allocation13]  }
  0x76   :  { %3592 = dma.done.wait [#allocation4], 128  }
  0x77   :  { %3593 = vsyncadd [#allocation4], 4294967168 }
  0x78   :  { %3594 = dma.done.wait [#allocation7], 32  }
  0x79   :  { %3595 = vsyncadd [#allocation7], 4294967264 }
  0x7a   :  { %3596 = dma.done.wait [#allocation10], 272  }
  0x7b   :  { %3597 = vsyncadd [#allocation10], 4294967024 }
  0x7c   :  { %3598 = dma.done.wait [#allocation13], 16  }
  0x7d   :  { %3599 = vsyncadd [#allocation13], 4294967280  ;;  %v3612_v0 = vmov 0.0   ;;  %vm3613_vm0 = vmmov 0   ;;  %v3298_v1 = vld [vmem:[#allocation3] sm:$0xff]   ;;  %s4585_s26 = sld [smem:[#allocation23_spill]]  ;;  %v188_v50 = vlaneseq }
  0x7e   :  { %3005 = vmatprep.subr.bf16.mxu0 %v3612_v0  ;;  %3007 = vmatprep.mubr.msk.bf16.mxu0 %vm3613_vm0, %v3612_v0  ;;  %vm234_vm1 = vcmask 130048   ;;  %s4586_s2 = sld [smem:[#allocation27_spill]]  ;;  %vm329_vm2 = vcmask 261120   ;;  %v3847_v13 = vld [vmem:[%s4566_s12 + $0x4] ss:$8 sps:$4 sm:$0xff]   ;;  %s4587_s23 = sld [smem:[#allocation26_spill]] }
  0x7f   :  { %3019 = vmatprep.subr.bf16.mxu1 %v3612_v0  ;;  %3023 = vmatprep.mubr.msk.bf16.mxu1 %vm3613_vm0, %v3612_v0  ;;  %494 = vst.msk [vmem:[#allocation2] sm:$0xff] %vm329_vm2, %v3612_v0  ;;  %v3303_v14 = vld [vmem:[%s4560_s6] sm:$0xff]   ;;  %v3307_v15 = vld [vmem:[%s4560_s6 + $0x8] sm:$0xff]   ;;  %v3869_v27 = vld [vmem:[%s4566_s12 + $0x14] ss:$8 sps:$4 sm:$0xff]   ;;  %v3614_v49 = vmov 0  }
  0x80   :  { %3006 = vmatpush3.bf16.msra.mxu0 %v3298_v1  ;;  %v3864_v25 = vld [vmem:[%s4566_s12] ss:$8 sps:$4 sm:$0xff]   ;;  %v3878_v32 = vld [vmem:[%s4566_s12 + $0x10] ss:$8 sps:$4 sm:$0xff]   ;;  %v189_v51 = vshrl.u32 %v188_v50, 7  ;;  %vm784_vm3 = vcmask 1043456  }
  0x81   :  { %3035 = vmatprep.subr.bf16.mxu0 %v3612_v0  ;;  %v186_v52 = vld [vmem:[%s4567_s13] sm:$0x3]  ;;  %v2836_v55 = vld [vmem:[#allocation6] ss:$0 sm:$0xff]  ;;  %vm780_vm4 = vcmask 64512   ;;  %vm925_vm6 = vcmask 130112  }
  0x82   :  { %v194_v53 = vsub.s32 1, %v189_v51  ;;  %s3615_s7 = smov 120   ;;  %s3616_s29 = smov 96  }
  0x83   :  { %v212_v2 = vld [vmem:[%s4585_s26] sm:$0xff]  ;;  %v213_v3 = vld [vmem:[%s4585_s26 + $0x8] sm:$0xff]  ;;  %v214_v5 = vld [vmem:[%s4585_s26 + $0x10] sm:$0xff]  ;;  %s3617_s28 = smov 32   ;;  %s4588_s24 = sld [smem:[#allocation24_spill]] }
  0x84   :  { %v218_v4 = vpack.c.bf16 %v213_v3, %v212_v2  ;;  %v215_v6 = vld [vmem:[%s4585_s26 + $0x18] sm:$0xff]  ;;  %v216_v8 = vld [vmem:[%s4585_s26 + $0x20] sm:$0xff]  ;;  %v217_v9 = vld [vmem:[%s4585_s26 + $0x28] sm:$0xff]  ;;  %v3898_v54 = vrot.slane %v186_v52, %v194_v53 }
  0x85   :  { %v219_v7 = vpack.c.bf16 %v215_v6, %v214_v5  ;;  %v220_v10 = vpack.c.bf16 %v217_v9, %v216_v8  ;;  %v3299_v11 = vld [vmem:[%s4586_s2] sm:$0xff]   ;;  %v3300_v12 = vld [vmem:[%s4586_s2 + $0x8] sm:$0xff]  }
  0x86   :  { %3008 = vmatmul.mubr.msk.bf16.vlgmr.msra.gmra.mrb[0].mxu0 %vm234_vm1, %v218_v4  ;;  %3020 = vmatpush3.bf16.msra.mxu1 %v3299_v11  ;;  %v2831_v16 = vld [vmem:[%s4587_s23] ss:$0 sm:$0xff] }
  0x87   :  { %3011 = vmatprep.mubr.msk.bf16.mxu0 %vm3613_vm0, %v3612_v0  ;;  %3021 = vmatprep.subr.bf16.mxu1 %v3612_v0  ;;  %v3887_v47 = vld [vmem:[#allocation2] sm:$0xff] }
  0x88   :  { %3036 = vmatpush3.bf16.msra.mxu0 %v3303_v14  ;;  %v497_v48 = vpack.c.bf16 %v3887_v47, %v3887_v47 }
  0x89   :  { %3037 = vmatprep.subr.bf16.mxu0 %v3612_v0 }
  0x8a   :  { %3022 = vmatpush3.bf16.msra.mxu1 %v3300_v12 }
  0x8b   :  { %521 = vmatprep.subr.bf16.mxu1 %v3847_v13 }
  0x8c   :  { %3038 = vmatpush3.bf16.msra.mxu0 %v3307_v15 }
  0x8d   :  { %3067 = vmatprep.subr.bf16.mxu0 %v3612_v0 }
  0x8e   :  { %3012 = vmatmul.mubr.msk.bf16.gmra.mrb[4].mxu0 %vm234_vm1, %v219_v7 }
  0x8f   :  { %3015 = vmatprep.mubr.msk.bf16.mxu0 %vm3613_vm0, %v3612_v0 }
  0x96   :  { %3016 = vmatmul.mubr.msk.bf16.gmra.mrb[8].mxu0 %vm234_vm1, %v220_v10 }
  0x97   :  { %3039 = vmatprep.mubr.msk.bf16.mxu0 %vm3613_vm0, %v3612_v0 }
 0x159   :  { %v278_v17 = vpop.f32.mrb[0].mxu0 }
 0x15a   :  { %v279_v18 = vadd.f32 %v2831_v16, %v278_v17  ;;  %v3009_v19 = vpop.f32.mrb[1].mxu0 }
 0x15b   :  { %v281_v20 = vpop.f32.mrb[2].mxu0 }
 0x15c   :  { %v282_v21 = vadd.f32 %v2831_v16, %v281_v20  ;;  %v3010_v22 = vpop.f32.mrb[3].mxu0  ;;  %v301_v23 = vmax.f32 %v279_v18, 0.0 }
 0x15e   :  { %v302_v24 = vmax.f32 %v282_v21, 0.0 }
 0x160   :  { %v307_v26 = vpack.c.bf16 %v302_v24, %v301_v23 }
 0x161   :  { %v286_v28 = vpop.f32.mrb[4].mxu0 }
 0x162   :  { %3024 = vmatmul.mubr.msk.bf16.vlgmr.msra.gmra.mrb[0].mxu1 %vm329_vm2, %v307_v26  ;;  %v287_v29 = vadd.f32 %v2831_v16, %v286_v28  ;;  %v3013_v30 = vpop.f32.mrb[5].mxu0  ;;  %v3911_v26 = vld [vmem:[#allocation9] sm:$0xff]   ;;  %v3915_v28 = vld [vmem:[#allocation9 + $0x8] sm:$0xff]  }
 0x163   :  { %v289_v31 = vpop.f32.mrb[6].mxu0  ;;  %3027 = vmatprep.mubr.msk.bf16.mxu1 %vm3613_vm0, %v3612_v0  ;;  %522 = vmatpush1.bf16.msra.mxu1 %v3864_v25 }
 0x164   :  { %v303_v33 = vmax.f32 %v287_v29, 0.0  ;;  %v290_v34 = vadd.f32 %v2831_v16, %v289_v31  ;;  %v3014_v35 = vpop.f32.mrb[7].mxu0  ;;  %523 = vmatprep.subr.bf16.mxu1 %v3869_v27  ;;  %v190_v29 = vsub.s32 0, %v189_v51  ;;  %v2842_v31 = vld [vmem:[#allocation8] ss:$0 sm:$0xff] }
 0x166   :  { %v304_v36 = vmax.f32 %v290_v34, 0.0  ;;  %v3919_v30 = vrot.slane %v186_v52, %v190_v29 }
 0x167   :  { %524 = vmatpush1.bf16.msra.mxu1 %v3878_v32 }
 0x168   :  { %v308_v37 = vpack.c.bf16 %v304_v36, %v303_v33  ;;  %3051 = vmatprep.subr.bf16.mxu1 %v3612_v0 }
 0x169   :  { %v294_v38 = vpop.f32.mrb[8].mxu0 }
 0x16a   :  { %v295_v39 = vadd.f32 %v2831_v16, %v294_v38  ;;  %v3017_v40 = vpop.f32.mrb[9].mxu0  ;;  %3028 = vmatmul.mubr.msk.bf16.gmra.mrb[4].mxu1 %vm329_vm2, %v308_v37 }
 0x16b   :  { %v297_v41 = vpop.f32.mrb[10].mxu0  ;;  %3031 = vmatprep.mubr.msk.bf16.mxu1 %vm3613_vm0, %v3612_v0 }
 0x16c   :  { %v305_v42 = vmax.f32 %v295_v39, 0.0  ;;  %v298_v43 = vadd.f32 %v2831_v16, %v297_v41  ;;  %v3018_v44 = vpop.f32.mrb[11].mxu0 }
 0x16e   :  { %v306_v45 = vmax.f32 %v298_v43, 0.0 }
 0x170   :  { %v309_v46 = vpack.c.bf16 %v306_v45, %v305_v42  ;;  %v3933_v42 = vld [vmem:[%s4564_s10] sm:$0xff]  }
 0x172   :  { %3032 = vmatmul.mubr.msk.bf16.gmra.mrb[8].mxu1 %vm329_vm2, %v309_v46 }
 0x173   :  { %553 = vmatprep.mubr.bf16.mxu1 %v3614_v49 }
 0x17a   :  { %2852 = vmatmul.mubr.msk.bf16.vlgmr.msra.gmra.mrb[12].mxu1 %vm329_vm2, %v497_v48 }
 0x17b   :  { %3055 = vmatprep.mubr.msk.bf16.mxu1 %vm3613_vm0, %v3612_v0  ;;  %3052 = vmatpush3.bf16.msra.mxu1 %v3911_v26 }
 0x17c   :  { %3053 = vmatprep.subr.bf16.mxu1 %v3612_v0 }
 0x17f   :  { %3054 = vmatpush3.bf16.msra.mxu1 %v3915_v28 }
 0x180   :  { %3059 = vmatprep.subr.bf16.mxu1 %v3612_v0 }
 0x235   :  { %v373_v56 = vpop.f32.mrb[0].mxu1 }
 0x236   :  { %v374_v57 = vadd.f32 %v2836_v55, %v373_v56  ;;  %v3025_v58 = vpop.f32.mrb[1].mxu1 }
 0x237   :  { %v376_v59 = vpop.f32.mrb[2].mxu1 }
 0x238   :  { %v377_v60 = vadd.f32 %v2836_v55, %v376_v59  ;;  %v3026_v61 = vpop.f32.mrb[3].mxu1  ;;  %v396_v62 = vmax.f32 %v374_v57, 0.0  ;;  %v3951_v59 = vld [vmem:[%s4564_s10 + $0x8] sm:$0xff]  }
 0x23a   :  { %v397_v63 = vmax.f32 %v377_v60, 0.0  ;;  %v3955_v60 = vld [vmem:[#allocation11] ss:$0 sm:$0xff] }
 0x23c   :  { %v402_v1 = vpack.c.bf16 %v397_v63, %v396_v62 }
 0x23d   :  { %v381_v2 = vpop.f32.mrb[4].mxu1 }
 0x23e   :  { %3040 = vmatmul.mubr.msk.bf16.vlgmr.msra.gmra.mrb[12].mxu0 %vm329_vm2, %v402_v1  ;;  %v382_v3 = vadd.f32 %v2836_v55, %v381_v2  ;;  %v3029_v4 = vpop.f32.mrb[5].mxu1 }
 0x23f   :  { %v384_v5 = vpop.f32.mrb[6].mxu1  ;;  %3043 = vmatprep.mubr.msk.bf16.mxu0 %vm3613_vm0, %v3612_v0 }
 0x240   :  { %v398_v6 = vmax.f32 %v382_v3, 0.0  ;;  %v385_v7 = vadd.f32 %v2836_v55, %v384_v5  ;;  %v3030_v8 = vpop.f32.mrb[7].mxu1  ;;  %v3964_v5 = vld [vmem:[%s4568_s14] sm:$0xff]  }
 0x241   :  { %3068 = vmatpush3.bf16.msra.mxu0 %v3964_v5  ;;  %v3975_v8 = vld [vmem:[#allocation12] ss:$0 sm:$0xff] }
 0x242   :  { %v399_v9 = vmax.f32 %v385_v7, 0.0  ;;  %3069 = vmatprep.subr.bf16.mxu0 %v3612_v0 }
 0x244   :  { %v403_v10 = vpack.c.bf16 %v399_v9, %v398_v6  ;;  %v167_v6 = vld [vmem:[%s4570_s16] sm:$0xf] }
 0x245   :  { %v389_v11 = vpop.f32.mrb[8].mxu1  ;;  %v3969_v7 = vsel %vm784_vm3, %v167_v6, 0 }
 0x246   :  { %v390_v12 = vadd.f32 %v2836_v55, %v389_v11  ;;  %v3033_v14 = vpop.f32.mrb[9].mxu1  ;;  %3044 = vmatmul.mubr.msk.bf16.gmra.mrb[16].mxu0 %vm329_vm2, %v403_v10 }
 0x247   :  { %v392_v15 = vpop.f32.mrb[10].mxu1  ;;  %3047 = vmatprep.mubr.msk.bf16.mxu0 %vm3613_vm0, %v3612_v0 }
 0x248   :  { %v400_v16 = vmax.f32 %v390_v12, 0.0  ;;  %v393_v17 = vadd.f32 %v2836_v55, %v392_v15  ;;  %v3034_v18 = vpop.f32.mrb[11].mxu1 }
 0x24a   :  { %v401_v19 = vmax.f32 %v393_v17, 0.0 }
 0x24c   :  { %v404_v20 = vpack.c.bf16 %v401_v19, %v400_v16 }
 0x24d   :  { %v555_v21 = vpop.f32.mrb[12].mxu1 }
 0x24e   :  { %3048 = vmatmul.mubr.msk.bf16.gmra.mrb[20].mxu0 %vm329_vm2, %v404_v20  ;;  %v3909_v22 = vpop.f32.mrb[13].mxu1  ;;  %v3922_v33 = vadd.f32 %v555_v21, %v3919_v30  ;;  %v3982_v21 = vld [vmem:[%s4568_s14 + $0x8] sm:$0xff]  }
 0x24f   :  { %3071 = vmatprep.mubr.msk.bf16.mxu0 %vm3613_vm0, %v3612_v0  ;;  %v559_v23 = vpop.f32.mrb[14].mxu1  ;;  %3070 = vmatpush3.bf16.msra.mxu0 %v3982_v21 }
 0x250   :  { %v560_v24 = vpop.f32.mrb[15].mxu1  ;;  %3081 = vmatprep.subr.bf16.mxu0 %v3612_v0 }
 0x311   :  { %v467_v34 = vpop.f32.mrb[12].mxu0 }
 0x312   :  { %v3924_v35 = vadd.f32 %v2842_v31, %v467_v34  ;;  %v3041_v36 = vpop.f32.mrb[13].mxu0 }
 0x313   :  { %v470_v37 = vpop.f32.mrb[14].mxu0 }
 0x314   :  { %v562_v38 = vadd.f32 %v3922_v33, %v3924_v35  ;;  %v3928_v39 = vadd.f32 %v2842_v31, %v470_v37  ;;  %v3042_v40 = vpop.f32.mrb[15].mxu0 }
 0x315   :  { %v695_v40 = vmax.f32 %v3922_v33, 0.0 }
 0x316   :  { %v563_v41 = vmax.f32 %v562_v38, 0.0 }
 0x318   :  { %v564_v43 = vpack.c.bf16 %v563_v41, %v563_v41 }
 0x319   :  { %v475_v44 = vpop.f32.mrb[16].mxu0 }
 0x31a   :  { %3056 = vmatmul.mubr.msk.bf16.vlgmr.msra.gmra.mrb[16].mxu1 %vm329_vm2, %v564_v43  ;;  %v3936_v45 = vadd.f32 %v2842_v31, %v475_v44  ;;  %v3045_v46 = vpop.f32.mrb[17].mxu0  ;;  %v696_v43 = vpack.c.bf16 %v695_v40, %v695_v40  ;;  %v558_v44 = vadd.f32 %v3909_v22, %v3898_v54  ;;  %v4008_v22 = vld [vmem:[%s4572_s18] sm:$0xff]  }
 0x31b   :  { %v478_v48 = vpop.f32.mrb[18].mxu0  ;;  %3060 = vmatpush3.bf16.msra.mxu1 %v3933_v42  ;;  %3063 = vmatprep.mubr.msk.bf16.mxu1 %vm3613_vm0, %v3612_v0  ;;  %v496_v46 = vld [vmem:[%s4588_s24] sm:$0xff] }
 0x31c   :  { %v3941_v50 = vadd.f32 %v2842_v31, %v478_v48  ;;  %v3046_v51 = vpop.f32.mrb[19].mxu0  ;;  %3061 = vmatprep.subr.bf16.mxu1 %v3612_v0 }
 0x31f   :  { %3062 = vmatpush3.bf16.msra.mxu1 %v3951_v59 }
 0x320   :  { %3075 = vmatprep.subr.bf16.mxu1 %v3612_v0 }
 0x321   :  { %v483_v52 = vpop.f32.mrb[20].mxu0 }
 0x322   :  { %v3944_v53 = vadd.f32 %v2842_v31, %v483_v52  ;;  %v3049_v55 = vpop.f32.mrb[21].mxu0 }
 0x323   :  { %v486_v56 = vpop.f32.mrb[22].mxu0 }
 0x324   :  { %v3946_v57 = vadd.f32 %v2842_v31, %v486_v56  ;;  %v3050_v58 = vpop.f32.mrb[23].mxu0 }
 0x325   :  { %v4015_v58 = vld [vmem:[%s4572_s18 + $0x8] sm:$0xff]  }
 0x3ed   :  { %v614_v61 = vpop.f32.mrb[16].mxu1 }
 0x3ee   :  { %v615_v62 = vadd.f32 %v3955_v60, %v614_v61  ;;  %v3057_v63 = vpop.f32.mrb[17].mxu1 }
 0x3ef   :  { %v617_v1 = vpop.f32.mrb[18].mxu1 }
 0x3f0   :  { %v620_v2 = vmax.f32 %v615_v62, 0.0  ;;  %v3058_v3 = vpop.f32.mrb[19].mxu1  ;;  %v4024_v62 = vld [vmem:[%s4571_s17] ss:$0 sm:$0xff] }
 0x3f2   :  { %v621_v4 = vpack.c.bf16 %v620_v2, %v620_v2 }
 0x3f4   :  { %3064 = vmatmul.mubr.msk.bf16.vlgmr.msra.gmra.mrb[20].mxu1 %vm329_vm2, %v621_v4 }
 0x3f5   :  { %3077 = vmatprep.mubr.msk.bf16.mxu1 %vm3613_vm0, %v3612_v0  ;;  %3076 = vmatpush3.bf16.msra.mxu1 %v3969_v7 }
 0x3f6   :  { %948 = vmatprep.subr.bf16.mxu1 %v3847_v13 }
 0x4c7   :  { %v671_v9 = vpop.f32.mrb[20].mxu1 }
 0x4c8   :  { %v672_v10 = vadd.f32 %v3975_v8, %v671_v9  ;;  %v3065_v11 = vpop.f32.mrb[21].mxu1 }
 0x4c9   :  { %v674_v12 = vpop.f32.mrb[22].mxu1 }
 0x4ca   :  { %v680_v14 = vand.u32 2147483647, %v672_v10  ;;  %v3066_v15 = vpop.f32.mrb[23].mxu1  ;;  %924 = vst.msk [vmem:[#allocation14] sm:$0xff] %vm780_vm4, %v672_v10  ;;  %v677_v36 = vmax.f32 %v672_v10, 0.0  ;;  %vm678_vm7 = vcmp.ne.f32.partialorder %v672_v10, %v672_v10 }
 0x4cc   :  { %v681_v16 = vsub.f32 0.0, %v680_v14 }
 0x4ce   :  { %v682_v17 = vmul.f32 1.442695, %v681_v16 }
 0x4d0   :  { %3317 = vpow2.f32 %v682_v17 }
 0x4da   :  { %v3318_v18 = vpop.eup %3317 }
 0x4db   :  { %v684_v19 = vadd.f32 1.0, %v3318_v18  ;;  %v687_v20 = vmul.f32 -0.5, %v3318_v18  ;;  %v690_v24 = vand.u32 2147483647, %v3318_v18 }
 0x4dd   :  { %3319 = vlog2.f32 %v684_v19  ;;  %v688_v23 = vadd.f32 1.0, %v687_v20  ;;  %vm691_vm5 = vcmp.lt.f32.partialorder %v690_v24, 0.0004427343 }
 0x4df   :  { %v689_v34 = vmul.f32 %v3318_v18, %v688_v23 }
 0x4e7   :  { %v3320_v29 = vpop.eup %3319 }
 0x4e8   :  { %v686_v31 = vmul.f32 0.6931472, %v3320_v29 }
 0x4ea   :  { %v692_v37 = vsel %vm691_vm5, %v689_v34, %v686_v31 }
 0x4eb   :  { %v693_v38 = vadd.f32 %v692_v37, %v677_v36 }
 0x4ed   :  { %v694_v41 = vsel %vm678_vm7, %v672_v10, %v693_v38 }
 0x4ee   :  { %774 = vrot.lane.b32.xlu0 %v694_v41, %s3615_s7  ;;  %926 = vst.msk [vmem:[#allocation14] sm:$0xff] %vm925_vm6, %v694_v41 }
 0x4f2   :  { %698 = vrot.lane.b32.xlu0 %v696_v43, %s3616_s29 }
 0x4f6   :  { %902 = vrot.lane.b32.xlu0 %v558_v44, %s3617_s28 }
 0x560   :  { %v775_v48 = vpop.permute.xlu0 %774 }
 0x561   :  { %v777_v51 = vmul.f32 %v775_v48, %v496_v46 }
 0x563   :  { %v778_v52 = vadd.f32 %v777_v51, %v672_v10 }
 0x564   :  { %v699_v55 = vpop.permute.xlu0 %698 }
 0x565   :  { %v779_v56 = vpack.c.bf16 %v778_v52, %v778_v52  ;;  %3072 = vmatmul.mubr.msk.bf16.vlgmr.msra.gmra.mrb[24].mxu0 %vm329_vm2, %v699_v55 }
 0x566   :  { %3085 = vmatprep.mubr.msk.bf16.mxu0 %vm3613_vm0, %v3612_v0  ;;  %3082 = vmatpush3.bf16.msra.mxu0 %v4008_v22 }
 0x567   :  { %3078 = vmatmul.mubr.msk.bf16.vlgmr.msra.gmra.mrb[24].mxu1 %vm780_vm4, %v779_v56  ;;  %3083 = vmatprep.subr.bf16.mxu0 %v3612_v0 }
 0x568   :  { %949 = vmatpush1.bf16.msra.mxu1 %v3864_v25  ;;  %980 = vmatprep.mubr.bf16.mxu1 %v3614_v49  ;;  %v903_v36 = vpop.permute.xlu0 %902 }
 0x569   :  { %950 = vmatprep.subr.bf16.mxu1 %v3869_v27 }
 0x56a   :  { %3084 = vmatpush3.bf16.msra.mxu0 %v4015_v58 }
 0x56b   :  { %3089 = vmatprep.subr.bf16.mxu0 %v3612_v0 }
 0x56c   :  { %951 = vmatpush1.bf16.msra.mxu1 %v3878_v32 }
 0x56d   :  { %3097 = vmatprep.subr.bf16.mxu1 %v3612_v0 }
 0x638   :  { %v4019_v61 = vpop.f32.mrb[24].mxu0 }
 0x639   :  { %v3073_v63 = vpop.f32.mrb[25].mxu0 }
 0x63a   :  { %v752_v1 = vpop.f32.mrb[26].mxu0  ;;  %v822_v2 = vpop.f32.mrb[24].mxu1 }
 0x63b   :  { %v823_v3 = vadd.f32 %v4024_v62, %v822_v2  ;;  %v3074_v4 = vpop.f32.mrb[27].mxu0  ;;  %v3079_v6 = vpop.f32.mrb[25].mxu1 }
 0x63c   :  { %v825_v9 = vpop.f32.mrb[26].mxu1 }
 0x63d   :  { %v828_v10 = vmax.f32 %v823_v3, 0.0  ;;  %v3080_v11 = vpop.f32.mrb[27].mxu1 }
 0x63f   :  { %v829_v12 = vpack.c.bf16 %v828_v10, %v828_v10 }
 0x641   :  { %3086 = vmatmul.mubr.msk.bf16.vlgmr.msra.gmra.mrb[28].mxu0 %vm329_vm2, %v829_v12 }
 0x642   :  { %3090 = vmatpush3.bf16.msra.mxu0 %v3911_v26  ;;  %3093 = vmatprep.mubr.msk.bf16.mxu0 %vm3613_vm0, %v3612_v0 }
 0x643   :  { %3091 = vmatprep.subr.bf16.mxu0 %v3612_v0 }
 0x646   :  { %3092 = vmatpush3.bf16.msra.mxu0 %v3915_v28 }
 0x647   :  { %3105 = vmatprep.subr.bf16.mxu0 %v3612_v0 }
 0x714   :  { %v879_v14 = vpop.f32.mrb[28].mxu0 }
 0x715   :  { %886 = vrot.lane.b32.xlu1 %v879_v14, %s3617_s28  ;;  %v3087_v15 = vpop.f32.mrb[29].mxu0 }
 0x716   :  { %v882_v16 = vpop.f32.mrb[30].mxu0 }
 0x717   :  { %v3088_v17 = vpop.f32.mrb[31].mxu0 }
 0x719   :  { %891 = vrot.lane.b32.xlu1 %v3922_v33, %s3616_s29 }
 0x787   :  { %v887_v18 = vpop.permute.xlu1 %886 }
 0x788   :  { %v889_v19 = vadd.f32 %v887_v18, %v3924_v35 }
 0x78b   :  { %v892_v20 = vpop.permute.xlu1 %891 }
 0x78c   :  { %v894_v23 = vadd.f32 %v892_v20, %v889_v19 }
 0x78e   :  { %v2866_v24 = vmul.f32 -1.442695, %v894_v23 }
 0x790   :  { %3321 = vpow2.f32 %v2866_v24 }
 0x79a   :  { %v3322_v29 = vpop.eup %3321 }
 0x79b   :  { %v898_v31 = vadd.f32 1.0, %v3322_v29 }
 0x79d   :  { %3323 = vrcp.f32 %v898_v31 }
 0x7a7   :  { %v3324_v34 = vpop.eup %3323 }
 0x7a8   :  { %v905_v37 = vmul.f32 %v3324_v34, %v903_v36  ;;  %v912_v41 = vsub.f32 1.0, %v3324_v34 }
 0x7aa   :  { %907 = vrot.lane.b32.xlu1 %v905_v37, %s3607_s22 }
 0x7ae   :  { %919 = vrot.lane.b32.xlu1 %v3887_v47, %s3607_s22 }
 0x81c   :  { %v908_v38 = vpop.permute.xlu1 %907 }
 0x81d   :  { %v910_v33 = vadd.f32 %v908_v38, %v889_v19 }
 0x81f   :  { %3325 = vtanh.f32 %v910_v33 }
 0x820   :  { %v920_v35 = vpop.permute.xlu1 %919 }
 0x821   :  { %v922_v44 = vmul.f32 %v3324_v34, %v920_v35 }
 0x829   :  { %v3326_v40 = vpop.eup %3325 }
 0x82a   :  { %914 = vrot.lane.b32.xlu0 %v3326_v40, %s3616_s29 }
 0x89c   :  { %v915_v43 = vpop.permute.xlu0 %914 }
 0x89d   :  { %v917_v46 = vmul.f32 %v915_v43, %v912_v41 }
 0x89f   :  { %v4042_v48 = vadd.f32 %v922_v44, %v917_v46 }
 0x8a1   :  { %v941_v51 = vpack.c.bf16 %v4042_v48, %v4042_v48 }
 0x8a3   :  { %943 = vrot.lane.b32.xlu0 %v941_v51, %s3607_s22 }
 0x915   :  { %v944_v52 = vpop.permute.xlu0 %943 }
 0x916   :  { %2868 = vmatmul.mubr.msk.bf16.vlgmr.msra.gmra.mrb[28].mxu1 %vm329_vm2, %v944_v52 }
 0x917   :  { %3098 = vmatpush3.bf16.msra.mxu1 %v3933_v42  ;;  %3101 = vmatprep.mubr.msk.bf16.mxu1 %vm3613_vm0, %v3612_v0 }
 0x918   :  { %3099 = vmatprep.subr.bf16.mxu1 %v3612_v0 }
 0x91b   :  { %3100 = vmatpush3.bf16.msra.mxu1 %v3951_v59 }
 0x91c   :  { %3113 = vmatprep.subr.bf16.mxu1 %v3612_v0 }
 0x9e9   :  { %v982_v47 = vpop.f32.mrb[28].mxu1 }
 0x9ea   :  { %v983_v55 = vadd.f32 %v982_v47, %v3919_v30  ;;  %v4055_v56 = vpop.f32.mrb[29].mxu1 }
 0x9eb   :  { %v986_v63 = vpop.f32.mrb[30].mxu1 }
 0x9ec   :  { %v989_v1 = vadd.f32 %v983_v55, %v3928_v39  ;;  %v987_v2 = vpop.f32.mrb[31].mxu1  ;;  %v1098_v3 = vmax.f32 %v983_v55, 0.0 }
 0x9ee   :  { %v990_v4 = vmax.f32 %v989_v1, 0.0  ;;  %v1099_v6 = vpack.c.bf16 %v1098_v3, %v1098_v3  ;;  %v2867_v3 = vld [vmem:[%s4588_s24 + $0x8] sm:$0xff] }
 0x9f0   :  { %v991_v9 = vpack.c.bf16 %v990_v4, %v990_v4  ;;  %1101 = vrot.lane.b32.xlu0 %v1099_v6, %s3616_s29 }
 0x9f2   :  { %3094 = vmatmul.mubr.msk.bf16.vlgmr.msra.gmra.mrb[32].mxu0 %vm329_vm2, %v991_v9 }
 0x9f3   :  { %3106 = vmatpush3.bf16.msra.mxu0 %v3964_v5  ;;  %3109 = vmatprep.mubr.msk.bf16.mxu0 %vm3613_vm0, %v3612_v0 }
 0x9f4   :  { %1265 = vrot.lane.b32.xlu0 %v983_v55, %s3616_s29  ;;  %3107 = vmatprep.subr.bf16.mxu0 %v3612_v0 }
 0x9f7   :  { %3108 = vmatpush3.bf16.msra.mxu0 %v3982_v21 }
 0x9f8   :  { %3119 = vmatprep.subr.bf16.mxu0 %v3612_v0 }
 0xa62   :  { %v1102_v10 = vpop.permute.xlu0 %1101 }
 0xa63   :  { %3110 = vmatmul.mubr.msk.bf16.vlgmr.msra.gmra.mrb[36].mxu0 %vm329_vm2, %v1102_v10 }
 0xa64   :  { %3120 = vmatpush3.bf16.msra.mxu0 %v4008_v22  ;;  %3123 = vmatprep.mubr.msk.bf16.mxu0 %vm3613_vm0, %v3612_v0 }
 0xa65   :  { %3121 = vmatprep.subr.bf16.mxu0 %v3612_v0 }
 0xa68   :  { %3122 = vmatpush3.bf16.msra.mxu0 %v4015_v58 }
 0xa69   :  { %3127 = vmatprep.subr.bf16.mxu0 %v3612_v0 }
 0xac5   :  { %v1029_v11 = vpop.f32.mrb[32].mxu0 }
 0xac6   :  { %v1030_v12 = vadd.f32 %v3955_v60, %v1029_v11  ;;  %v3095_v14 = vpop.f32.mrb[33].mxu0 }
 0xac7   :  { %v1032_v15 = vpop.f32.mrb[34].mxu0 }
 0xac8   :  { %v1035_v16 = vmax.f32 %v1030_v12, 0.0  ;;  %v3096_v17 = vpop.f32.mrb[35].mxu0 }
 0xaca   :  { %v1036_v18 = vpack.c.bf16 %v1035_v16, %v1035_v16 }
 0xacc   :  { %3102 = vmatmul.mubr.msk.bf16.vlgmr.msra.gmra.mrb[32].mxu1 %vm329_vm2, %v1036_v18 }
 0xacd   :  { %3114 = vmatpush3.bf16.msra.mxu1 %v3969_v7  ;;  %3115 = vmatprep.mubr.msk.bf16.mxu1 %vm3613_vm0, %v3612_v0 }
 0xace   :  { %1316 = vmatprep.subr.bf16.mxu1 %v3847_v13 }
 0xb36   :  { %v4080_v19 = vpop.f32.mrb[36].mxu0 }
 0xb37   :  { %v3111_v20 = vpop.f32.mrb[37].mxu0 }
 0xb38   :  { %v1143_v23 = vpop.f32.mrb[38].mxu0 }
 0xb39   :  { %v3112_v24 = vpop.f32.mrb[39].mxu0 }
 0xb9f   :  { %v1074_v29 = vpop.f32.mrb[32].mxu1 }
 0xba0   :  { %v1075_v31 = vadd.f32 %v3975_v8, %v1074_v29  ;;  %v3103_v34 = vpop.f32.mrb[33].mxu1  ;;  %v985_v29 = vadd.f32 %v4055_v56, %v3898_v54 }
 0xba1   :  { %v1077_v36 = vpop.f32.mrb[34].mxu1 }
 0xba2   :  { %v1083_v37 = vand.u32 2147483647, %v1075_v31  ;;  %1295 = vst.msk [vmem:[#allocation14 + $0x8] sm:$0xff] %vm780_vm4, %v1075_v31  ;;  %v3104_v38 = vpop.f32.mrb[35].mxu1  ;;  %v1080_v55 = vmax.f32 %v1075_v31, 0.0  ;;  %vm1081_vm9 = vcmp.ne.f32.partialorder %v1075_v31, %v1075_v31 }
 0xba4   :  { %v1084_v33 = vsub.f32 0.0, %v1083_v37  ;;  %v1266_v37 = vpop.permute.xlu0 %1265 }
 0xba6   :  { %v1085_v40 = vmul.f32 1.442695, %v1084_v33 }
 0xba8   :  { %3327 = vpow2.f32 %v1085_v40 }
 0xbb2   :  { %v3328_v35 = vpop.eup %3327 }
 0xbb3   :  { %v1087_v41 = vadd.f32 1.0, %v3328_v35  ;;  %v1090_v43 = vmul.f32 -0.5, %v3328_v35  ;;  %v1093_v46 = vand.u32 2147483647, %v3328_v35 }
 0xbb5   :  { %3329 = vlog2.f32 %v1087_v41  ;;  %v1091_v44 = vadd.f32 1.0, %v1090_v43  ;;  %vm1094_vm8 = vcmp.lt.f32.partialorder %v1093_v46, 0.0004427343 }
 0xbb7   :  { %v1092_v47 = vmul.f32 %v3328_v35, %v1091_v44 }
 0xbbf   :  { %v3330_v51 = vpop.eup %3329 }
 0xbc0   :  { %v1089_v52 = vmul.f32 0.6931472, %v3330_v51 }
 0xbc2   :  { %v1095_v63 = vsel %vm1094_vm8, %v1092_v47, %v1089_v52 }
 0xbc3   :  { %v1096_v1 = vadd.f32 %v1095_v63, %v1080_v55 }
 0xbc5   :  { %v1097_v2 = vsel %vm1081_vm9, %v1075_v31, %v1096_v1  ;;  %vm931_vm9 = vcmask 195712  }
 0xbc6   :  { %1165 = vrot.lane.b32.xlu1 %v1097_v2, %s3615_s7  ;;  %1296 = vst.msk [vmem:[#allocation14 + $0x8] sm:$0xff] %vm925_vm6, %v1097_v2 }
 0xc38   :  { %v1166_v4 = vpop.permute.xlu1 %1165 }
 0xc39   :  { %v1168_v6 = vmul.f32 %v2867_v3, %v1166_v4 }
 0xc3b   :  { %v1169_v9 = vadd.f32 %v1168_v6, %v1075_v31 }
 0xc3d   :  { %v1170_v10 = vpack.c.bf16 %v1169_v9, %v1169_v9 }
 0xc3f   :  { %3116 = vmatmul.mubr.msk.bf16.vlgmr.msra.gmra.mrb[36].mxu1 %vm780_vm4, %v1170_v10 }
 0xc40   :  { %1317 = vmatpush1.bf16.msra.mxu1 %v3864_v25  ;;  %1348 = vmatprep.mubr.bf16.mxu1 %v3614_v49 }
 0xc41   :  { %1318 = vmatprep.subr.bf16.mxu1 %v3869_v27 }
 0xc44   :  { %1319 = vmatpush1.bf16.msra.mxu1 %v3878_v32 }
 0xc45   :  { %3135 = vmatprep.subr.bf16.mxu1 %v3612_v0 }
 0xd12   :  { %v1208_v11 = vpop.f32.mrb[36].mxu1 }
 0xd13   :  { %v1209_v12 = vadd.f32 %v4024_v62, %v1208_v11  ;;  %v3117_v14 = vpop.f32.mrb[37].mxu1 }
 0xd14   :  { %v1211_v15 = vpop.f32.mrb[38].mxu1 }
 0xd15   :  { %v1214_v16 = vmax.f32 %v1209_v12, 0.0  ;;  %v3118_v17 = vpop.f32.mrb[39].mxu1 }
 0xd17   :  { %v1215_v18 = vpack.c.bf16 %v1214_v16, %v1214_v16 }
 0xd19   :  { %3124 = vmatmul.mubr.msk.bf16.vlgmr.msra.gmra.mrb[40].mxu0 %vm329_vm2, %v1215_v18 }
 0xd1a   :  { %3128 = vmatpush3.bf16.msra.mxu0 %v3911_v26  ;;  %3131 = vmatprep.mubr.msk.bf16.mxu0 %vm3613_vm0, %v3612_v0 }
 0xd1b   :  { %3129 = vmatprep.subr.bf16.mxu0 %v3612_v0 }
 0xd1e   :  { %3130 = vmatpush3.bf16.msra.mxu0 %v3915_v28 }
 0xd1f   :  { %3143 = vmatprep.subr.bf16.mxu0 %v3612_v0 }
 0xdec   :  { %v1253_v20 = vpop.f32.mrb[40].mxu0 }
 0xded   :  { %1260 = vrot.lane.b32.xlu1 %v1253_v20, %s3617_s28  ;;  %v3125_v23 = vpop.f32.mrb[41].mxu0 }
 0xdee   :  { %v1256_v24 = vpop.f32.mrb[42].mxu0 }
 0xdef   :  { %v3126_v31 = vpop.f32.mrb[43].mxu0 }
 0xdf1   :  { %1276 = vrot.lane.b32.xlu1 %v985_v29, %s3617_s28 }
 0xe5f   :  { %v1261_v34 = vpop.permute.xlu1 %1260 }
 0xe60   :  { %v1263_v36 = vadd.f32 %v1261_v34, %v3928_v39 }
 0xe62   :  { %v1268_v38 = vadd.f32 %v1266_v37, %v1263_v36 }
 0xe63   :  { %v1277_v43 = vpop.permute.xlu1 %1276 }
 0xe64   :  { %v2874_v33 = vmul.f32 -1.442695, %v1268_v38 }
 0xe66   :  { %3331 = vpow2.f32 %v2874_v33 }
 0xe70   :  { %v3332_v40 = vpop.eup %3331 }
 0xe71   :  { %v1272_v35 = vadd.f32 1.0, %v3332_v40 }
 0xe73   :  { %3333 = vrcp.f32 %v1272_v35 }
 0xe7d   :  { %v3334_v41 = vpop.eup %3333 }
 0xe7e   :  { %v1279_v44 = vmul.f32 %v3334_v41, %v1277_v43  ;;  %v1286_v52 = vsub.f32 1.0, %v3334_v41  ;;  %v1292_v47 = vmul.f32 %v3334_v41, %v4042_v48 }
 0xe80   :  { %1281 = vrot.lane.b32.xlu0 %v1279_v44, %s3607_s22 }
 0xef2   :  { %v1282_v46 = vpop.permute.xlu0 %1281 }
 0xef3   :  { %v1284_v56 = vadd.f32 %v1282_v46, %v1263_v36 }
 0xef5   :  { %3335 = vtanh.f32 %v1284_v56 }
 0xeff   :  { %v3336_v51 = vpop.eup %3335 }
 0xf00   :  { %1288 = vrot.lane.b32.xlu1 %v3336_v51, %s3616_s29 }
 0xf72   :  { %v1289_v39 = vpop.permute.xlu1 %1288 }
 0xf73   :  { %v1291_v55 = vmul.f32 %v1289_v39, %v1286_v52 }
 0xf75   :  { %v4111_v63 = vadd.f32 %v1292_v47, %v1291_v55 }
 0xf77   :  { %v1309_v1 = vpack.c.bf16 %v4111_v63, %v4111_v63 }
 0xf79   :  { %1311 = vrot.lane.b32.xlu0 %v1309_v1, %s3607_s22 }
 0xfeb   :  { %v1312_v2 = vpop.permute.xlu0 %1311 }
 0xfec   :  { %2876 = vmatmul.mubr.msk.bf16.vlgmr.msra.gmra.mrb[40].mxu1 %vm329_vm2, %v1312_v2 }
 0xfed   :  { %3136 = vmatpush3.bf16.msra.mxu1 %v3933_v42  ;;  %3139 = vmatprep.mubr.msk.bf16.mxu1 %vm3613_vm0, %v3612_v0 }
 0xfee   :  { %3137 = vmatprep.subr.bf16.mxu1 %v3612_v0 }
 0xff1   :  { %3138 = vmatpush3.bf16.msra.mxu1 %v3951_v59 }
 0xff2   :  { %3151 = vmatprep.subr.bf16.mxu1 %v3612_v0 }
0x10bf   :  { %v1350_v48 = vpop.f32.mrb[40].mxu1 }
0x10c0   :  { %v1351_v3 = vadd.f32 %v1350_v48, %v3919_v30  ;;  %v4124_v4 = vpop.f32.mrb[41].mxu1 }
0x10c1   :  { %v1354_v6 = vpop.f32.mrb[42].mxu1 }
0x10c2   :  { %v1357_v9 = vadd.f32 %v1351_v3, %v3936_v45  ;;  %v1355_v10 = vpop.f32.mrb[43].mxu1  ;;  %v1466_v11 = vmax.f32 %v1351_v3, 0.0 }
0x10c3   :  { %v2875_v10 = vld [vmem:[%s4588_s24 + $0x10] sm:$0xff] }
0x10c4   :  { %v1358_v12 = vmax.f32 %v1357_v9, 0.0  ;;  %v1467_v14 = vpack.c.bf16 %v1466_v11, %v1466_v11 }
0x10c6   :  { %v1359_v15 = vpack.c.bf16 %v1358_v12, %v1358_v12  ;;  %1469 = vrot.lane.b32.xlu0 %v1467_v14, %s3616_s29 }
0x10c8   :  { %3132 = vmatmul.mubr.msk.bf16.vlgmr.msra.gmra.mrb[44].mxu0 %vm329_vm2, %v1359_v15 }
0x10c9   :  { %3144 = vmatpush3.bf16.msra.mxu0 %v3964_v5  ;;  %3147 = vmatprep.mubr.msk.bf16.mxu0 %vm3613_vm0, %v3612_v0 }
0x10ca   :  { %1633 = vrot.lane.b32.xlu0 %v1351_v3, %s3616_s29  ;;  %3145 = vmatprep.subr.bf16.mxu0 %v3612_v0 }
0x10cd   :  { %3146 = vmatpush3.bf16.msra.mxu0 %v3982_v21 }
0x10ce   :  { %3157 = vmatprep.subr.bf16.mxu0 %v3612_v0 }
0x1138   :  { %v1470_v16 = vpop.permute.xlu0 %1469 }
0x1139   :  { %3148 = vmatmul.mubr.msk.bf16.vlgmr.msra.gmra.mrb[48].mxu0 %vm329_vm2, %v1470_v16 }
0x113a   :  { %3158 = vmatpush3.bf16.msra.mxu0 %v4008_v22  ;;  %3161 = vmatprep.mubr.msk.bf16.mxu0 %vm3613_vm0, %v3612_v0 }
0x113b   :  { %3159 = vmatprep.subr.bf16.mxu0 %v3612_v0 }
0x113e   :  { %3160 = vmatpush3.bf16.msra.mxu0 %v4015_v58 }
0x113f   :  { %3165 = vmatprep.subr.bf16.mxu0 %v3612_v0 }
0x119b   :  { %v1397_v17 = vpop.f32.mrb[44].mxu0 }
0x119c   :  { %v1398_v18 = vadd.f32 %v3955_v60, %v1397_v17  ;;  %v3133_v20 = vpop.f32.mrb[45].mxu0 }
0x119d   :  { %v1400_v23 = vpop.f32.mrb[46].mxu0 }
0x119e   :  { %v1403_v24 = vmax.f32 %v1398_v18, 0.0  ;;  %v3134_v29 = vpop.f32.mrb[47].mxu0 }
0x11a0   :  { %v1404_v31 = vpack.c.bf16 %v1403_v24, %v1403_v24 }
0x11a2   :  { %3140 = vmatmul.mubr.msk.bf16.vlgmr.msra.gmra.mrb[44].mxu1 %vm329_vm2, %v1404_v31  ;;  %v1353_v31 = vadd.f32 %v4124_v4, %v3898_v54 }
0x11a3   :  { %3152 = vmatpush3.bf16.msra.mxu1 %v3969_v7  ;;  %3153 = vmatprep.mubr.msk.bf16.mxu1 %vm3613_vm0, %v3612_v0 }
0x11a4   :  { %1684 = vmatprep.subr.bf16.mxu1 %v3847_v13 }
0x120c   :  { %v4149_v34 = vpop.f32.mrb[48].mxu0 }
0x120d   :  { %v3149_v36 = vpop.f32.mrb[49].mxu0 }
0x120e   :  { %v1511_v37 = vpop.f32.mrb[50].mxu0 }
0x120f   :  { %v3150_v38 = vpop.f32.mrb[51].mxu0 }
0x1210   :  { %v1634_v38 = vpop.permute.xlu0 %1633 }
0x1275   :  { %v1442_v33 = vpop.f32.mrb[44].mxu1 }
0x1276   :  { %v1443_v40 = vadd.f32 %v3975_v8, %v1442_v33  ;;  %v3141_v35 = vpop.f32.mrb[45].mxu1 }
0x1277   :  { %v1445_v41 = vpop.f32.mrb[46].mxu1 }
0x1278   :  { %v1451_v43 = vand.u32 2147483647, %v1443_v40  ;;  %1663 = vst.msk [vmem:[#allocation14 + $0x10] sm:$0xff] %vm780_vm4, %v1443_v40  ;;  %v3142_v44 = vpop.f32.mrb[47].mxu1  ;;  %v1448_v48 = vmax.f32 %v1443_v40, 0.0  ;;  %vm1449_vm11 = vcmp.ne.f32.partialorder %v1443_v40, %v1443_v40 }
0x127a   :  { %v1452_v46 = vsub.f32 0.0, %v1451_v43 }
0x127c   :  { %v1453_v56 = vmul.f32 1.442695, %v1452_v46 }
0x127e   :  { %3337 = vpow2.f32 %v1453_v56 }
0x1288   :  { %v3338_v51 = vpop.eup %3337 }
0x1289   :  { %v1455_v52 = vadd.f32 1.0, %v3338_v51  ;;  %v1458_v13 = vmul.f32 -0.5, %v3338_v51  ;;  %v1461_v47 = vand.u32 2147483647, %v3338_v51 }
0x128b   :  { %3339 = vlog2.f32 %v1455_v52  ;;  %v1459_v39 = vadd.f32 1.0, %v1458_v13  ;;  %vm1462_vm10 = vcmp.lt.f32.partialorder %v1461_v47, 0.0004427343 }
0x128d   :  { %v1460_v2 = vmul.f32 %v3338_v51, %v1459_v39 }
0x1295   :  { %v3340_v55 = vpop.eup %3339 }
0x1296   :  { %v1457_v1 = vmul.f32 0.6931472, %v3340_v55 }
0x1298   :  { %v1463_v3 = vsel %vm1462_vm10, %v1460_v2, %v1457_v1  ;;  %vm937_vm10 = vcmask 261312  }
0x1299   :  { %v1464_v6 = vadd.f32 %v1463_v3, %v1448_v48 }
0x129b   :  { %v1465_v9 = vsel %vm1449_vm11, %v1443_v40, %v1464_v6 }
0x129c   :  { %1533 = vrot.lane.b32.xlu1 %v1465_v9, %s3615_s7  ;;  %1664 = vst.msk [vmem:[#allocation14 + $0x10] sm:$0xff] %vm925_vm6, %v1465_v9 }
0x130e   :  { %v1534_v11 = vpop.permute.xlu1 %1533 }
0x130f   :  { %v1536_v12 = vmul.f32 %v2875_v10, %v1534_v11 }
0x1311   :  { %v1537_v14 = vadd.f32 %v1536_v12, %v1443_v40 }
0x1313   :  { %v1538_v15 = vpack.c.bf16 %v1537_v14, %v1537_v14 }
0x1315   :  { %3154 = vmatmul.mubr.msk.bf16.vlgmr.msra.gmra.mrb[48].mxu1 %vm780_vm4, %v1538_v15 }
0x1316   :  { %1685 = vmatpush1.bf16.msra.mxu1 %v3864_v25  ;;  %1716 = vmatprep.mubr.bf16.mxu1 %v3614_v49 }
0x1317   :  { %1686 = vmatprep.subr.bf16.mxu1 %v3869_v27 }
0x131a   :  { %1687 = vmatpush1.bf16.msra.mxu1 %v3878_v32 }
0x131b   :  { %3173 = vmatprep.subr.bf16.mxu1 %v3612_v0 }
0x13e8   :  { %v1576_v16 = vpop.f32.mrb[48].mxu1 }
0x13e9   :  { %v1577_v17 = vadd.f32 %v4024_v62, %v1576_v16  ;;  %v3155_v18 = vpop.f32.mrb[49].mxu1 }
0x13ea   :  { %v1579_v20 = vpop.f32.mrb[50].mxu1 }
0x13eb   :  { %v1582_v23 = vmax.f32 %v1577_v17, 0.0  ;;  %v3156_v24 = vpop.f32.mrb[51].mxu1  ;;  %v4220_v20 = vld [vmem:[%s4566_s12 + $0x4] ss:$8 sps:$4 sm:$0xff]  }
0x13ed   :  { %v1583_v29 = vpack.c.bf16 %v1582_v23, %v1582_v23 }
0x13ef   :  { %3162 = vmatmul.mubr.msk.bf16.vlgmr.msra.gmra.mrb[52].mxu0 %vm329_vm2, %v1583_v29 }
0x13f0   :  { %3166 = vmatpush3.bf16.msra.mxu0 %v3911_v26  ;;  %3169 = vmatprep.mubr.msk.bf16.mxu0 %vm3613_vm0, %v3612_v0 }
0x13f1   :  { %3167 = vmatprep.subr.bf16.mxu0 %v3612_v0 }
0x13f4   :  { %3168 = vmatpush3.bf16.msra.mxu0 %v3915_v28 }
0x13f5   :  { %3181 = vmatprep.subr.bf16.mxu0 %v3612_v0 }
0x14c2   :  { %v1621_v25 = vpop.f32.mrb[52].mxu0 }
0x14c3   :  { %1628 = vrot.lane.b32.xlu1 %v1621_v25, %s3617_s28  ;;  %v3163_v27 = vpop.f32.mrb[53].mxu0 }
0x14c4   :  { %v1624_v32 = vpop.f32.mrb[54].mxu0 }
0x14c5   :  { %v3164_v36 = vpop.f32.mrb[55].mxu0 }
0x14c7   :  { %1644 = vrot.lane.b32.xlu1 %v1353_v31, %s3617_s28 }
0x1535   :  { %v1629_v26 = vpop.permute.xlu1 %1628 }
0x1536   :  { %v1631_v37 = vadd.f32 %v1629_v26, %v3936_v45 }
0x1538   :  { %v1636_v33 = vadd.f32 %v1634_v38, %v1631_v37 }
0x1539   :  { %v1645_v43 = vpop.permute.xlu1 %1644 }
0x153a   :  { %v2882_v40 = vmul.f32 -1.442695, %v1636_v33 }
0x153c   :  { %3341 = vpow2.f32 %v2882_v40 }
0x1546   :  { %v3342_v28 = vpop.eup %3341 }
0x1547   :  { %v1640_v35 = vadd.f32 1.0, %v3342_v28 }
0x1549   :  { %3343 = vrcp.f32 %v1640_v35 }
0x1553   :  { %v3344_v41 = vpop.eup %3343 }
0x1554   :  { %v1647_v44 = vmul.f32 %v3344_v41, %v1645_v43  ;;  %v1654_v51 = vsub.f32 1.0, %v3344_v41  ;;  %v1660_v52 = vmul.f32 %v3344_v41, %v4111_v63 }
0x1556   :  { %1649 = vrot.lane.b32.xlu0 %v1647_v44, %s3607_s22 }
0x15c8   :  { %v1650_v46 = vpop.permute.xlu0 %1649 }
0x15c9   :  { %v1652_v4 = vadd.f32 %v1650_v46, %v1631_v37 }
0x15cb   :  { %3345 = vtanh.f32 %v1652_v4 }
0x15d5   :  { %v3346_v56 = vpop.eup %3345 }
0x15d6   :  { %1656 = vrot.lane.b32.xlu1 %v3346_v56, %s3616_s29 }
0x1648   :  { %v1657_v45 = vpop.permute.xlu1 %1656 }
0x1649   :  { %v1659_v13 = vmul.f32 %v1657_v45, %v1654_v51  ;;  %v2883_v45 = vld [vmem:[%s4588_s24 + $0x18] sm:$0xff] }
0x164b   :  { %v4180_v39 = vadd.f32 %v1660_v52, %v1659_v13 }
0x164d   :  { %v1677_v47 = vpack.c.bf16 %v4180_v39, %v4180_v39 }
0x164f   :  { %1679 = vrot.lane.b32.xlu0 %v1677_v47, %s3607_s22 }
0x16c1   :  { %v1680_v55 = vpop.permute.xlu0 %1679 }
0x16c2   :  { %2884 = vmatmul.mubr.msk.bf16.vlgmr.msra.gmra.mrb[52].mxu1 %vm329_vm2, %v1680_v55 }
0x16c3   :  { %3174 = vmatpush3.bf16.msra.mxu1 %v3933_v42  ;;  %3177 = vmatprep.mubr.msk.bf16.mxu1 %vm3613_vm0, %v3612_v0 }
0x16c4   :  { %3175 = vmatprep.subr.bf16.mxu1 %v3612_v0 }
0x16c7   :  { %3176 = vmatpush3.bf16.msra.mxu1 %v3951_v59 }
0x16c8   :  { %3189 = vmatprep.subr.bf16.mxu1 %v3612_v0 }
0x1795   :  { %v1718_v63 = vpop.f32.mrb[52].mxu1 }
0x1796   :  { %v1719_v1 = vadd.f32 %v1718_v63, %v3919_v30  ;;  %v4193_v2 = vpop.f32.mrb[53].mxu1  ;;  %v4236_v63 = vld [vmem:[%s4566_s12] ss:$8 sps:$4 sm:$0xff]  }
0x1797   :  { %v1722_v48 = vpop.f32.mrb[54].mxu1 }
0x1798   :  { %v1725_v3 = vadd.f32 %v1719_v1, %v3941_v50  ;;  %v1723_v6 = vpop.f32.mrb[55].mxu1  ;;  %v1834_v9 = vmax.f32 %v1719_v1, 0.0  ;;  %v4249_v48 = vld [vmem:[%s4566_s12 + $0x10] ss:$8 sps:$4 sm:$0xff]  }
0x179a   :  { %v1726_v42 = vmax.f32 %v1725_v3, 0.0  ;;  %v1835_v10 = vpack.c.bf16 %v1834_v9, %v1834_v9 }
0x179c   :  { %v1727_v11 = vpack.c.bf16 %v1726_v42, %v1726_v42  ;;  %1837 = vrot.lane.b32.xlu0 %v1835_v10, %s3616_s29 }
0x179e   :  { %3170 = vmatmul.mubr.msk.bf16.vlgmr.msra.gmra.mrb[56].mxu0 %vm329_vm2, %v1727_v11 }
0x179f   :  { %3182 = vmatpush3.bf16.msra.mxu0 %v3964_v5  ;;  %3185 = vmatprep.mubr.msk.bf16.mxu0 %vm3613_vm0, %v3612_v0 }
0x17a0   :  { %2001 = vrot.lane.b32.xlu0 %v1719_v1, %s3616_s29  ;;  %3183 = vmatprep.subr.bf16.mxu0 %v3612_v0  ;;  %v4243_v1 = vld [vmem:[%s4566_s12 + $0x14] ss:$8 sps:$4 sm:$0xff]  }
0x17a3   :  { %3184 = vmatpush3.bf16.msra.mxu0 %v3982_v21 }
0x17a4   :  { %3195 = vmatprep.subr.bf16.mxu0 %v3612_v0 }
0x180e   :  { %v1838_v59 = vpop.permute.xlu0 %1837 }
0x180f   :  { %3186 = vmatmul.mubr.msk.bf16.vlgmr.msra.gmra.mrb[60].mxu0 %vm329_vm2, %v1838_v59 }
0x1810   :  { %3196 = vmatpush3.bf16.msra.mxu0 %v4008_v22  ;;  %3199 = vmatprep.mubr.msk.bf16.mxu0 %vm3613_vm0, %v3612_v0 }
0x1811   :  { %3197 = vmatprep.subr.bf16.mxu0 %v3612_v0 }
0x1814   :  { %3198 = vmatpush3.bf16.msra.mxu0 %v4015_v58 }
0x1815   :  { %3203 = vmatprep.subr.bf16.mxu0 %v3612_v0 }
0x1871   :  { %v1765_v5 = vpop.f32.mrb[56].mxu0 }
0x1872   :  { %v1766_v12 = vadd.f32 %v3955_v60, %v1765_v5  ;;  %v3171_v14 = vpop.f32.mrb[57].mxu0  ;;  %v4255_v5 = vld [vmem:[#allocation9] sm:$0xff]  }
0x1873   :  { %v1768_v15 = vpop.f32.mrb[58].mxu0 }
0x1874   :  { %v1771_v16 = vmax.f32 %v1766_v12, 0.0  ;;  %v3172_v17 = vpop.f32.mrb[59].mxu0  ;;  %v4261_v12 = vld [vmem:[#allocation9 + $0x8] sm:$0xff]  }
0x1876   :  { %v1772_v18 = vpack.c.bf16 %v1771_v16, %v1771_v16  ;;  %v1721_v16 = vadd.f32 %v4193_v2, %v3898_v54 }
0x1878   :  { %3178 = vmatmul.mubr.msk.bf16.vlgmr.msra.gmra.mrb[56].mxu1 %vm329_vm2, %v1772_v18 }
0x1879   :  { %3190 = vmatpush3.bf16.msra.mxu1 %v3969_v7  ;;  %3191 = vmatprep.mubr.msk.bf16.mxu1 %vm3613_vm0, %v3612_v0 }
0x187a   :  { %2052 = vmatprep.subr.bf16.mxu1 %v4220_v20 }
0x18e2   :  { %v4223_v60 = vpop.f32.mrb[60].mxu0 }
0x18e3   :  { %v3187_v23 = vpop.f32.mrb[61].mxu0 }
0x18e4   :  { %v1879_v24 = vpop.f32.mrb[62].mxu0 }
0x18e5   :  { %v3188_v29 = vpop.f32.mrb[63].mxu0  ;;  %v2002_v24 = vpop.permute.xlu0 %2001 }
0x194b   :  { %v1810_v25 = vpop.f32.mrb[56].mxu1 }
0x194c   :  { %v1811_v27 = vadd.f32 %v3975_v8, %v1810_v25  ;;  %v3179_v32 = vpop.f32.mrb[57].mxu1 }
0x194d   :  { %v1813_v31 = vpop.f32.mrb[58].mxu1 }
0x194e   :  { %v1819_v36 = vand.u32 2147483647, %v1811_v27  ;;  %2031 = vst.msk [vmem:[#allocation14 + $0x18] sm:$0xff] %vm780_vm4, %v1811_v27  ;;  %v3180_v26 = vpop.f32.mrb[59].mxu1  ;;  %v1816_v4 = vmax.f32 %v1811_v27, 0.0  ;;  %vm1817_vm13 = vcmp.ne.f32.partialorder %v1811_v27, %v1811_v27 }
0x1950   :  { %v1820_v37 = vsub.f32 0.0, %v1819_v36 }
0x1952   :  { %v1821_v38 = vmul.f32 1.442695, %v1820_v37 }
0x1954   :  { %3347 = vpow2.f32 %v1821_v38 }
0x195e   :  { %v3348_v33 = vpop.eup %3347 }
0x195f   :  { %v1823_v40 = vadd.f32 1.0, %v3348_v33  ;;  %v1826_v28 = vmul.f32 -0.5, %v3348_v33  ;;  %v1829_v41 = vand.u32 2147483647, %v3348_v33 }
0x1961   :  { %3349 = vlog2.f32 %v1823_v40  ;;  %v1827_v35 = vadd.f32 1.0, %v1826_v28  ;;  %vm1830_vm12 = vcmp.lt.f32.partialorder %v1829_v41, 0.0004427343 }
0x1963   :  { %v1828_v46 = vmul.f32 %v3348_v33, %v1827_v35 }
0x196b   :  { %v3350_v43 = vpop.eup %3349 }
0x196c   :  { %v1825_v44 = vmul.f32 0.6931472, %v3350_v43 }
0x196e   :  { %v1831_v8 = vsel %vm1830_vm12, %v1828_v46, %v1825_v44  ;;  %v4282_v44 = vld [vmem:[%s4564_s10] sm:$0xff]  }
0x196f   :  { %v1832_v56 = vadd.f32 %v1831_v8, %v1816_v4 }
0x1971   :  { %v1833_v51 = vsel %vm1817_vm13, %v1811_v27, %v1832_v56 }
0x1972   :  { %1901 = vrot.lane.b32.xlu1 %v1833_v51, %s3615_s7  ;;  %2032 = vst.msk [vmem:[#allocation14 + $0x18] sm:$0xff] %vm925_vm6, %v1833_v51 }
0x19e4   :  { %v1902_v52 = vpop.permute.xlu1 %1901 }
0x19e5   :  { %v1904_v13 = vmul.f32 %v2883_v45, %v1902_v52 }
0x19e7   :  { %v1905_v47 = vadd.f32 %v1904_v13, %v1811_v27 }
0x19e9   :  { %v1906_v55 = vpack.c.bf16 %v1905_v47, %v1905_v47 }
0x19eb   :  { %3192 = vmatmul.mubr.msk.bf16.vlgmr.msra.gmra.mrb[60].mxu1 %vm780_vm4, %v1906_v55 }
0x19ec   :  { %2053 = vmatpush1.bf16.msra.mxu1 %v4236_v63  ;;  %2084 = vmatprep.mubr.bf16.mxu1 %v3614_v49 }
0x19ed   :  { %2054 = vmatprep.subr.bf16.mxu1 %v4243_v1 }
0x19f0   :  { %2055 = vmatpush1.bf16.msra.mxu1 %v4249_v48 }
0x19f1   :  { %3211 = vmatprep.subr.bf16.mxu1 %v3612_v0 }
0x1abe   :  { %v1944_v3 = vpop.f32.mrb[60].mxu1 }
0x1abf   :  { %v1945_v6 = vadd.f32 %v4024_v62, %v1944_v3  ;;  %v3193_v9 = vpop.f32.mrb[61].mxu1  ;;  %v4304_v3 = vld [vmem:[%s4568_s14] sm:$0xff]  }
0x1ac0   :  { %v1947_v42 = vpop.f32.mrb[62].mxu1 }
0x1ac1   :  { %v1950_v10 = vmax.f32 %v1945_v6, 0.0  ;;  %v3194_v11 = vpop.f32.mrb[63].mxu1  ;;  %v4320_v42 = vld [vmem:[#allocation11] ss:$0 sm:$0xff] }
0x1ac3   :  { %v1951_v59 = vpack.c.bf16 %v1950_v10, %v1950_v10 }
0x1ac5   :  { %3200 = vmatmul.mubr.msk.bf16.vlgmr.msra.gmra.mrb[64].mxu0 %vm329_vm2, %v1951_v59 }
0x1ac6   :  { %3204 = vmatpush3.bf16.msra.mxu0 %v4255_v5  ;;  %3207 = vmatprep.mubr.msk.bf16.mxu0 %vm3613_vm0, %v3612_v0 }
0x1ac7   :  { %3205 = vmatprep.subr.bf16.mxu0 %v3612_v0 }
0x1aca   :  { %3206 = vmatpush3.bf16.msra.mxu0 %v4261_v12 }
0x1acb   :  { %3219 = vmatprep.subr.bf16.mxu0 %v3612_v0 }
0x1b98   :  { %v1989_v62 = vpop.f32.mrb[64].mxu0 }
0x1b99   :  { %1996 = vrot.lane.b32.xlu1 %v1989_v62, %s3617_s28  ;;  %v3201_v14 = vpop.f32.mrb[65].mxu0 }
0x1b9a   :  { %v1992_v15 = vpop.f32.mrb[66].mxu0 }
0x1b9b   :  { %v3202_v17 = vpop.f32.mrb[67].mxu0 }
0x1b9d   :  { %2012 = vrot.lane.b32.xlu1 %v1721_v16, %s3617_s28 }
0x1c0b   :  { %v1997_v18 = vpop.permute.xlu1 %1996 }
0x1c0c   :  { %v1999_v23 = vadd.f32 %v1997_v18, %v3941_v50  ;;  %v4330_v18 = vld [vmem:[#allocation12] ss:$0 sm:$0xff] }
0x1c0e   :  { %v2004_v29 = vadd.f32 %v2002_v24, %v1999_v23 }
0x1c0f   :  { %v2013_v36 = vpop.permute.xlu1 %2012 }
0x1c10   :  { %v2890_v25 = vmul.f32 -1.442695, %v2004_v29 }
0x1c12   :  { %3351 = vpow2.f32 %v2890_v25 }
0x1c1c   :  { %v3352_v27 = vpop.eup %3351 }
0x1c1d   :  { %v2008_v32 = vadd.f32 1.0, %v3352_v27 }
0x1c1f   :  { %3353 = vrcp.f32 %v2008_v32 }
0x1c29   :  { %v3354_v31 = vpop.eup %3353 }
0x1c2a   :  { %v2015_v26 = vmul.f32 %v3354_v31, %v2013_v36  ;;  %v2022_v33 = vsub.f32 1.0, %v3354_v31  ;;  %v2028_v40 = vmul.f32 %v3354_v31, %v4180_v39  ;;  %v4291_v39 = vld [vmem:[%s4564_s10 + $0x8] sm:$0xff]  }
0x1c2c   :  { %2017 = vrot.lane.b32.xlu0 %v2015_v26, %s3607_s22 }
0x1c9e   :  { %v2018_v37 = vpop.permute.xlu0 %2017 }
0x1c9f   :  { %v2020_v2 = vadd.f32 %v2018_v37, %v1999_v23 }
0x1ca1   :  { %3355 = vtanh.f32 %v2020_v2 }
0x1cab   :  { %v3356_v38 = vpop.eup %3355 }
0x1cac   :  { %2024 = vrot.lane.b32.xlu1 %v3356_v38, %s3616_s29 }
0x1d1e   :  { %v2025_v50 = vpop.permute.xlu1 %2024 }
0x1d1f   :  { %v2027_v28 = vmul.f32 %v2025_v50, %v2022_v33 }
0x1d21   :  { %v4273_v35 = vadd.f32 %v2028_v40, %v2027_v28 }
0x1d23   :  { %v2045_v41 = vpack.c.bf16 %v4273_v35, %v4273_v35 }
0x1d25   :  { %2047 = vrot.lane.b32.xlu0 %v2045_v41, %s3607_s22 }
0x1d97   :  { %v2048_v43 = vpop.permute.xlu0 %2047 }
0x1d98   :  { %2892 = vmatmul.mubr.msk.bf16.vlgmr.msra.gmra.mrb[64].mxu1 %vm329_vm2, %v2048_v43 }
0x1d99   :  { %3212 = vmatpush3.bf16.msra.mxu1 %v4282_v44  ;;  %3215 = vmatprep.mubr.msk.bf16.mxu1 %vm3613_vm0, %v3612_v0 }
0x1d9a   :  { %3213 = vmatprep.subr.bf16.mxu1 %v3612_v0 }
0x1d9d   :  { %3214 = vmatpush3.bf16.msra.mxu1 %v4291_v39 }
0x1d9e   :  { %3227 = vmatprep.subr.bf16.mxu1 %v3612_v0 }
0x1e6b   :  { %v2086_v46 = vpop.f32.mrb[64].mxu1 }
0x1e6c   :  { %v2087_v4 = vadd.f32 %v2086_v46, %v3919_v30  ;;  %v4296_v8 = vpop.f32.mrb[65].mxu1  ;;  %v2891_v46 = vld [vmem:[%s4588_s24 + $0x20] sm:$0xff] }
0x1e6d   :  { %v2090_v56 = vpop.f32.mrb[66].mxu1 }
0x1e6e   :  { %v2093_v51 = vadd.f32 %v2087_v4, %v3944_v53  ;;  %v2091_v45 = vpop.f32.mrb[67].mxu1  ;;  %v2202_v52 = vmax.f32 %v2087_v4, 0.0 }
0x1e70   :  { %v2094_v13 = vmax.f32 %v2093_v51, 0.0  ;;  %v2203_v47 = vpack.c.bf16 %v2202_v52, %v2202_v52 }
0x1e72   :  { %v2095_v55 = vpack.c.bf16 %v2094_v13, %v2094_v13  ;;  %2205 = vrot.lane.b32.xlu0 %v2203_v47, %s3616_s29  ;;  %v4348_v13 = vld [vmem:[%s4571_s17] ss:$0 sm:$0xff] }
0x1e74   :  { %3208 = vmatmul.mubr.msk.bf16.vlgmr.msra.gmra.mrb[68].mxu0 %vm329_vm2, %v2095_v55 }
0x1e75   :  { %3220 = vmatpush3.bf16.msra.mxu0 %v4304_v3  ;;  %3223 = vmatprep.mubr.msk.bf16.mxu0 %vm3613_vm0, %v3612_v0 }
0x1e76   :  { %2369 = vrot.lane.b32.xlu0 %v2087_v4, %s3616_s29  ;;  %3221 = vmatprep.subr.bf16.mxu0 %v3612_v0 }
0x1e79   :  { %3222 = vmatpush3.bf16.msra.mxu0 %v3982_v21 }
0x1e7a   :  { %3233 = vmatprep.subr.bf16.mxu0 %v3612_v0 }
0x1ee4   :  { %v2206_v6 = vpop.permute.xlu0 %2205 }
0x1ee5   :  { %3224 = vmatmul.mubr.msk.bf16.vlgmr.msra.gmra.mrb[72].mxu0 %vm329_vm2, %v2206_v6 }
0x1ee6   :  { %3234 = vmatpush3.bf16.msra.mxu0 %v4008_v22  ;;  %3237 = vmatprep.mubr.msk.bf16.mxu0 %vm3613_vm0, %v3612_v0 }
0x1ee7   :  { %3235 = vmatprep.subr.bf16.mxu0 %v3612_v0 }
0x1eea   :  { %3236 = vmatpush3.bf16.msra.mxu0 %v4015_v58 }
0x1eeb   :  { %3241 = vmatprep.subr.bf16.mxu0 %v3612_v0 }
0x1f47   :  { %v2133_v9 = vpop.f32.mrb[68].mxu0 }
0x1f48   :  { %v2134_v21 = vadd.f32 %v4320_v42, %v2133_v9  ;;  %v3209_v10 = vpop.f32.mrb[69].mxu0 }
0x1f49   :  { %v2136_v11 = vpop.f32.mrb[70].mxu0  ;;  %v2089_v10 = vadd.f32 %v4296_v8, %v3898_v54 }
0x1f4a   :  { %v2139_v59 = vmax.f32 %v2134_v21, 0.0  ;;  %v3210_v62 = vpop.f32.mrb[71].mxu0 }
0x1f4b   :  { %v2370_v62 = vpop.permute.xlu0 %2369 }
0x1f4c   :  { %v2140_v14 = vpack.c.bf16 %v2139_v59, %v2139_v59 }
0x1f4e   :  { %3216 = vmatmul.mubr.msk.bf16.vlgmr.msra.gmra.mrb[68].mxu1 %vm329_vm2, %v2140_v14 }
0x1f4f   :  { %3228 = vmatpush3.bf16.msra.mxu1 %v3969_v7  ;;  %3229 = vmatprep.mubr.msk.bf16.mxu1 %vm3613_vm0, %v3612_v0 }
0x1f50   :  { %2420 = vmatprep.subr.bf16.mxu1 %v4220_v20 }
0x1fb8   :  { %v4328_v22 = vpop.f32.mrb[72].mxu0 }
0x1fb9   :  { %v3225_v58 = vpop.f32.mrb[73].mxu0 }
0x1fba   :  { %v2247_v15 = vpop.f32.mrb[74].mxu0 }
0x1fbb   :  { %v3226_v16 = vpop.f32.mrb[75].mxu0 }
0x2021   :  { %v2178_v17 = vpop.f32.mrb[68].mxu1 }
0x2022   :  { %v2179_v23 = vadd.f32 %v4330_v18, %v2178_v17  ;;  %v3217_v24 = vpop.f32.mrb[69].mxu1 }
0x2023   :  { %v2181_v29 = vpop.f32.mrb[70].mxu1 }
0x2024   :  { %v2187_v25 = vand.u32 2147483647, %v2179_v23  ;;  %2399 = vst.msk [vmem:[#allocation14 + $0x20] sm:$0xff] %vm780_vm4, %v2179_v23  ;;  %v3218_v27 = vpop.f32.mrb[71].mxu1  ;;  %v2184_v40 = vmax.f32 %v2179_v23, 0.0  ;;  %vm2185_vm15 = vcmp.ne.f32.partialorder %v2179_v23, %v2179_v23 }
0x2026   :  { %v2188_v32 = vsub.f32 0.0, %v2187_v25 }
0x2028   :  { %v2189_v31 = vmul.f32 1.442695, %v2188_v32 }
0x202a   :  { %3357 = vpow2.f32 %v2189_v31 }
0x2034   :  { %v3358_v20 = vpop.eup %3357 }
0x2035   :  { %v2191_v36 = vadd.f32 1.0, %v3358_v20  ;;  %v2194_v26 = vmul.f32 -0.5, %v3358_v20  ;;  %v2197_v2 = vand.u32 2147483647, %v3358_v20 }
0x2037   :  { %3359 = vlog2.f32 %v2191_v36  ;;  %v2195_v37 = vadd.f32 1.0, %v2194_v26  ;;  %vm2198_vm14 = vcmp.lt.f32.partialorder %v2197_v2, 0.0004427343 }
0x2039   :  { %v2196_v50 = vmul.f32 %v3358_v20, %v2195_v37 }
0x2041   :  { %v3360_v38 = vpop.eup %3359 }
0x2042   :  { %v2193_v33 = vmul.f32 0.6931472, %v3360_v38 }
0x2044   :  { %v2199_v28 = vsel %vm2198_vm14, %v2196_v50, %v2193_v33 }
0x2045   :  { %v2200_v41 = vadd.f32 %v2199_v28, %v2184_v40 }
0x2047   :  { %v2201_v43 = vsel %vm2185_vm15, %v2179_v23, %v2200_v41  ;;  %v3415_v41 = vld [vmem:[%s4572_s18 + $0x8] sm:$0xff]  }
0x2048   :  { %2269 = vrot.lane.b32.xlu1 %v2201_v43, %s3615_s7  ;;  %2400 = vst.msk [vmem:[#allocation14 + $0x20] sm:$0xff] %vm925_vm6, %v2201_v43 }
0x20ba   :  { %v2270_v4 = vpop.permute.xlu1 %2269 }
0x20bb   :  { %v2272_v56 = vmul.f32 %v2891_v46, %v2270_v4 }
0x20bd   :  { %v2273_v51 = vadd.f32 %v2272_v56, %v2179_v23 }
0x20bf   :  { %v2274_v45 = vpack.c.bf16 %v2273_v51, %v2273_v51 }
0x20c1   :  { %3230 = vmatmul.mubr.msk.bf16.vlgmr.msra.gmra.mrb[72].mxu1 %vm780_vm4, %v2274_v45 }
0x20c2   :  { %2421 = vmatpush1.bf16.msra.mxu1 %v4236_v63  ;;  %2452 = vmatprep.mubr.bf16.mxu1 %v3614_v49 }
0x20c3   :  { %2422 = vmatprep.subr.bf16.mxu1 %v4243_v1 }
0x20c6   :  { %2423 = vmatpush1.bf16.msra.mxu1 %v4249_v48 }
0x20c7   :  { %3249 = vmatprep.subr.bf16.mxu1 %v3612_v0 }
0x2194   :  { %v2312_v52 = vpop.f32.mrb[72].mxu1 }
0x2195   :  { %v2313_v47 = vadd.f32 %v4348_v13, %v2312_v52  ;;  %v3231_v55 = vpop.f32.mrb[73].mxu1 }
0x2196   :  { %v2315_v6 = vpop.f32.mrb[74].mxu1 }
0x2197   :  { %v2318_v9 = vmax.f32 %v2313_v47, 0.0  ;;  %v3232_v63 = vpop.f32.mrb[75].mxu1 }
0x2199   :  { %v2319_v21 = vpack.c.bf16 %v2318_v9, %v2318_v9 }
0x219b   :  { %3238 = vmatmul.mubr.msk.bf16.vlgmr.msra.gmra.mrb[76].mxu0 %vm329_vm2, %v2319_v21 }
0x219c   :  { %3242 = vmatpush3.bf16.msra.mxu0 %v4255_v5  ;;  %3245 = vmatprep.mubr.msk.bf16.mxu0 %vm3613_vm0, %v3612_v0 }
0x219d   :  { %3243 = vmatprep.subr.bf16.mxu0 %v3612_v0 }
0x21a0   :  { %3244 = vmatpush3.bf16.msra.mxu0 %v4261_v12 }
0x21a1   :  { %3257 = vmatprep.subr.bf16.mxu0 %v3612_v0 }
0x226e   :  { %v2357_v49 = vpop.f32.mrb[76].mxu0 }
0x226f   :  { %2364 = vrot.lane.b32.xlu1 %v2357_v49, %s3617_s28  ;;  %v3239_v1 = vpop.f32.mrb[77].mxu0 }
0x2270   :  { %v2360_v48 = vpop.f32.mrb[78].mxu0 }
0x2271   :  { %v3240_v11 = vpop.f32.mrb[79].mxu0 }
0x2273   :  { %2380 = vrot.lane.b32.xlu1 %v2089_v10, %s3617_s28 }
0x22e1   :  { %v2365_v5 = vpop.permute.xlu1 %2364 }
0x22e2   :  { %v2367_v59 = vadd.f32 %v2365_v5, %v3944_v53 }
0x22e4   :  { %v2372_v14 = vadd.f32 %v2370_v62, %v2367_v59 }
0x22e5   :  { %v2381_v17 = vpop.permute.xlu1 %2380 }
0x22e6   :  { %v2898_v58 = vmul.f32 -1.442695, %v2372_v14 }
0x22e8   :  { %3361 = vpow2.f32 %v2898_v58 }
0x22f2   :  { %v3362_v12 = vpop.eup %3361 }
0x22f3   :  { %v2376_v15 = vadd.f32 1.0, %v3362_v12 }
0x22f5   :  { %3363 = vrcp.f32 %v2376_v15 }
0x22ff   :  { %v3364_v16 = vpop.eup %3363 }
0x2300   :  { %v2383_v23 = vmul.f32 %v3364_v16, %v2381_v17  ;;  %v2390_v25 = vsub.f32 1.0, %v3364_v16  ;;  %v2396_v27 = vmul.f32 %v3364_v16, %v4273_v35 }
0x2302   :  { %2385 = vrot.lane.b32.xlu0 %v2383_v23, %s3607_s22  ;;  %v2899_v23 = vld [vmem:[%s4588_s24 + $0x28] sm:$0xff] }
0x2374   :  { %v2386_v24 = vpop.permute.xlu0 %2385 }
0x2375   :  { %v2388_v8 = vadd.f32 %v2386_v24, %v2367_v59 }
0x2377   :  { %3365 = vtanh.f32 %v2388_v8 }
0x2381   :  { %v3366_v29 = vpop.eup %3365 }
0x2382   :  { %2392 = vrot.lane.b32.xlu1 %v3366_v29, %s3616_s29 }
0x23f4   :  { %v2393_v53 = vpop.permute.xlu1 %2392 }
0x23f5   :  { %v2395_v32 = vmul.f32 %v2393_v53, %v2390_v25 }
0x23f7   :  { %v4366_v31 = vadd.f32 %v2396_v27, %v2395_v32 }
0x23f9   :  { %v2413_v20 = vpack.c.bf16 %v4366_v31, %v4366_v31 }
0x23fb   :  { %2415 = vrot.lane.b32.xlu0 %v2413_v20, %s3607_s22 }
0x246d   :  { %v2416_v36 = vpop.permute.xlu0 %2415 }
0x246e   :  { %2900 = vmatmul.mubr.msk.bf16.vlgmr.msra.gmra.mrb[76].mxu1 %vm329_vm2, %v2416_v36 }
0x246f   :  { %3250 = vmatpush3.bf16.msra.mxu1 %v4282_v44  ;;  %3253 = vmatprep.mubr.msk.bf16.mxu1 %vm3613_vm0, %v3612_v0 }
0x2470   :  { %3251 = vmatprep.subr.bf16.mxu1 %v3612_v0 }
0x2473   :  { %3252 = vmatpush3.bf16.msra.mxu1 %v4291_v39 }
0x2474   :  { %3265 = vmatprep.subr.bf16.mxu1 %v3612_v0 }
0x2541   :  { %v2454_v35 = vpop.f32.mrb[76].mxu1 }
0x2542   :  { %v2455_v26 = vadd.f32 %v2454_v35, %v3919_v30  ;;  %v4379_v37 = vpop.f32.mrb[77].mxu1  ;;  %v3413_v30 = vld [vmem:[%s4568_s14 + $0x8] sm:$0xff]  }
0x2543   :  { %v2458_v2 = vpop.f32.mrb[78].mxu1 }
0x2544   :  { %v2461_v38 = vadd.f32 %v2455_v26, %v3946_v57  ;;  %v2459_v33 = vpop.f32.mrb[79].mxu1  ;;  %v2570_v50 = vmax.f32 %v2455_v26, 0.0 }
0x2546   :  { %v2462_v44 = vmax.f32 %v2461_v38, 0.0  ;;  %v2571_v40 = vpack.c.bf16 %v2570_v50, %v2570_v50  ;;  %v2457_v50 = vadd.f32 %v4379_v37, %v3898_v54 }
0x2548   :  { %v2463_v28 = vpack.c.bf16 %v2462_v44, %v2462_v44  ;;  %2573 = vrot.lane.b32.xlu0 %v2571_v40, %s3616_s29 }
0x254a   :  { %3246 = vmatmul.mubr.msk.bf16.vlgmr.msra.gmra.mrb[80].mxu0 %vm329_vm2, %v2463_v28 }
0x254b   :  { %3258 = vmatpush3.bf16.msra.mxu0 %v4304_v3  ;;  %3261 = vmatprep.mubr.msk.bf16.mxu0 %vm3613_vm0, %v3612_v0  ;;  %v3414_v3 = vld [vmem:[%s4572_s18] sm:$0xff]  }
0x254c   :  { %2737 = vrot.lane.b32.xlu0 %v2455_v26, %s3616_s29  ;;  %3259 = vmatprep.subr.bf16.mxu0 %v3612_v0 }
0x254f   :  { %3260 = vmatpush3.bf16.msra.mxu0 %v3413_v30 }
0x2550   :  { %3271 = vmatprep.subr.bf16.mxu0 %v3612_v0 }
0x25ba   :  { %v2574_v39 = vpop.permute.xlu0 %2573 }
0x25bb   :  { %3262 = vmatmul.mubr.msk.bf16.vlgmr.msra.gmra.mrb[84].mxu0 %vm329_vm2, %v2574_v39 }
0x25bc   :  { %3272 = vmatpush3.bf16.msra.mxu0 %v3414_v3  ;;  %3275 = vmatprep.mubr.msk.bf16.mxu0 %vm3613_vm0, %v3612_v0 }
0x25bd   :  { %3273 = vmatprep.subr.bf16.mxu0 %v3612_v0 }
0x25c0   :  { %3274 = vmatpush3.bf16.msra.mxu0 %v3415_v41 }
0x261d   :  { %v2501_v43 = vpop.f32.mrb[80].mxu0 }
0x261e   :  { %v2502_v46 = vadd.f32 %v4320_v42, %v2501_v43  ;;  %v3247_v4 = vpop.f32.mrb[81].mxu0 }
0x261f   :  { %v2504_v56 = vpop.f32.mrb[82].mxu0 }
0x2620   :  { %v2507_v51 = vmax.f32 %v2502_v46, 0.0  ;;  %v3248_v45 = vpop.f32.mrb[83].mxu0 }
0x2622   :  { %v2508_v52 = vpack.c.bf16 %v2507_v51, %v2507_v51 }
0x2624   :  { %3254 = vmatmul.mubr.msk.bf16.vlgmr.msra.gmra.mrb[80].mxu1 %vm329_vm2, %v2508_v52 }
0x2625   :  { %3266 = vmatpush3.bf16.msra.mxu1 %v3969_v7  ;;  %3267 = vmatprep.mubr.msk.bf16.mxu1 %vm3613_vm0, %v3612_v0 }
0x268e   :  { %v4408_v47 = vpop.f32.mrb[84].mxu0 }
0x268f   :  { %v3263_v55 = vpop.f32.mrb[85].mxu0 }
0x2690   :  { %v2615_v6 = vpop.f32.mrb[86].mxu0 }
0x2691   :  { %v3264_v9 = vpop.f32.mrb[87].mxu0 }
0x26f7   :  { %v2546_v63 = vpop.f32.mrb[80].mxu1 }
0x26f8   :  { %v2547_v42 = vadd.f32 %v4330_v18, %v2546_v63  ;;  %v3255_v21 = vpop.f32.mrb[81].mxu1 }
0x26f9   :  { %v2549_v49 = vpop.f32.mrb[82].mxu1 }
0x26fa   :  { %v2555_v1 = vand.u32 2147483647, %v2547_v42  ;;  %2767 = vst.msk [vmem:[#allocation14 + $0x28] sm:$0xff] %vm780_vm4, %v2547_v42  ;;  %v3256_v48 = vpop.f32.mrb[83].mxu1  ;;  %v2552_v15 = vmax.f32 %v2547_v42, 0.0  ;;  %vm2553_vm1 = vcmp.ne.f32.partialorder %v2547_v42, %v2547_v42 }
0x26fc   :  { %v2556_v10 = vsub.f32 0.0, %v2555_v1 }
0x26fe   :  { %v2557_v11 = vmul.f32 1.442695, %v2556_v10 }
0x2700   :  { %3367 = vpow2.f32 %v2557_v11 }
0x270a   :  { %v3368_v7 = vpop.eup %3367 }
0x270b   :  { %v2559_v5 = vadd.f32 1.0, %v3368_v7  ;;  %v2562_v0 = vmul.f32 -0.5, %v3368_v7  ;;  %v2565_v62 = vand.u32 2147483647, %v3368_v7 }
0x270d   :  { %3369 = vlog2.f32 %v2559_v5  ;;  %v2563_v59 = vadd.f32 1.0, %v2562_v0  ;;  %vm2566_vm0 = vcmp.lt.f32.partialorder %v2565_v62, 0.0004427343 }
0x270f   :  { %v2564_v12 = vmul.f32 %v3368_v7, %v2563_v59 }
0x2717   :  { %v3370_v14 = vpop.eup %3369 }
0x2718   :  { %v2561_v58 = vmul.f32 0.6931472, %v3370_v14 }
0x271a   :  { %v2567_v18 = vsel %vm2566_vm0, %v2564_v12, %v2561_v58 }
0x271b   :  { %v2568_v16 = vadd.f32 %v2567_v18, %v2552_v15 }
0x271d   :  { %v2569_v17 = vsel %vm2553_vm1, %v2547_v42, %v2568_v16 }
0x271e   :  { %2637 = vrot.lane.b32.xlu1 %v2569_v17, %s3615_s7  ;;  %2768 = vst.msk [vmem:[#allocation14 + $0x28] sm:$0xff] %vm925_vm6, %v2569_v17 }
0x2790   :  { %v2638_v24 = vpop.permute.xlu1 %2637 }
0x2791   :  { %v2640_v8 = vmul.f32 %v2899_v23, %v2638_v24 }
0x2793   :  { %v2641_v29 = vadd.f32 %v2640_v8, %v2547_v42 }
0x2795   :  { %v2642_v25 = vpack.c.bf16 %v2641_v29, %v2641_v29 }
0x2797   :  { %3268 = vmatmul.mubr.msk.bf16.vlgmr.msra.gmra.mrb[84].mxu1 %vm780_vm4, %v2642_v25 }
0x286a   :  { %v2680_v53 = vpop.f32.mrb[84].mxu1 }
0x286b   :  { %v2681_v27 = vadd.f32 %v4348_v13, %v2680_v53  ;;  %v3269_v32 = vpop.f32.mrb[85].mxu1  ;;  %v4428_v13 = vld [vmem:[%s4569_s15] ss:$0 sm:$0xff]  ;;  %s3618_s15 = smov 16  }
0x286c   :  { %v2683_v20 = vpop.f32.mrb[86].mxu1  ;;  %v4432_v40 = vadd.f32 %v4428_v13, %v4019_v61  ;;  %v4437_v30 = vadd.f32 %v4428_v13, %v4149_v34  ;;  %v4442_v37 = vadd.f32 %v4428_v13, %v4328_v22  ;;  %v2738_v61 = vpop.permute.xlu0 %2737 }
0x286d   :  { %v2686_v36 = vmax.f32 %v2681_v27, 0.0  ;;  %v3270_v35 = vpop.f32.mrb[87].mxu1 }
0x286e   :  { %v758_v28 = vand.u32 2147483647, %v4432_v40  ;;  %v1517_v54 = vand.u32 2147483647, %v4437_v30  ;;  %v2253_v4 = vand.u32 2147483647, %v4442_v37  ;;  %vm756_vm5 = vcmp.ne.f32.partialorder %v4432_v40, %v4432_v40 }
0x286f   :  { %v2687_v26 = vpack.c.bf16 %v2686_v36, %v2686_v36  ;;  %2787 = vst.msk [vmem:[#allocation15] sm:$0xff] %vm329_vm2, %v2686_v36  ;;  %v755_v23 = vmax.f32 %v4432_v40, 0.0  ;;  %v1514_v32 = vmax.f32 %v4437_v30, 0.0  ;;  %vm1515_vm7 = vcmp.ne.f32.partialorder %v4437_v30, %v4437_v30 }
0x2870   :  { %v759_v39 = vsub.f32 0.0, %v758_v28  ;;  %v1518_v46 = vsub.f32 0.0, %v1517_v54  ;;  %v2254_v45 = vsub.f32 0.0, %v2253_v4  ;;  %vm2251_vm8 = vcmp.ne.f32.partialorder %v4442_v37, %v4442_v37 }
0x2871   :  { %3276 = vmatmul.mubr.msk.bf16.vlgmr.msra.gmra.mrb[88].mxu0 %vm329_vm2, %v2687_v26  ;;  %v4481_v28 = vadd.f32 %v4428_v13, %v4223_v60  ;;  %v4486_v54 = vadd.f32 %v4428_v13, %v4408_v47 }
0x2872   :  { %v760_v43 = vmul.f32 1.442695, %v759_v39  ;;  %v1519_v51 = vmul.f32 1.442695, %v1518_v46  ;;  %v2255_v52 = vmul.f32 1.442695, %v2254_v45 }
0x2873   :  { %v1885_v39 = vand.u32 2147483647, %v4481_v28  ;;  %vm1883_vm15 = vcmp.ne.f32.partialorder %v4481_v28, %v4481_v28  ;;  %vm2619_vm0 = vcmp.ne.f32.partialorder %v4486_v54, %v4486_v54 }
0x2874   :  { %3371 = vpow2.f32 %v760_v43  ;;  %v2621_v43 = vand.u32 2147483647, %v4486_v54 }
0x287e   :  { %v3372_v22 = vpop.eup %3371 }
0x287f   :  { %v765_v10 = vmul.f32 -0.5, %v3372_v22  ;;  %v768_v0 = vand.u32 2147483647, %v3372_v22 }
0x2881   :  { %v766_v7 = vadd.f32 1.0, %v765_v10  ;;  %vm769_vm3 = vcmp.lt.f32.partialorder %v768_v0, 0.0004427343 }
0x2883   :  { %v767_v14 = vmul.f32 %v3372_v22, %v766_v7 }
0x2944   :  { %v2725_v2 = vpop.f32.mrb[88].mxu0 }
0x2945   :  { %2732 = vrot.lane.b32.xlu1 %v2725_v2, %s3617_s28  ;;  %v3277_v38 = vpop.f32.mrb[89].mxu0  ;;  %v2250_v2 = vmax.f32 %v4442_v37, 0.0 }
0x2946   :  { %v2728_v33 = vpop.f32.mrb[90].mxu0 }
0x2947   :  { %v3278_v44 = vpop.f32.mrb[91].mxu0 }
0x2948   :  { %v4476_v44 = vadd.f32 %v4428_v13, %v4080_v19 }
0x2949   :  { %2748 = vrot.lane.b32.xlu1 %v2457_v50, %s3617_s28  ;;  %s3619_s28 = smov [#allocation14]  }
0x294a   :  { %vm1147_vm13 = vcmp.ne.f32.partialorder %v4476_v44, %v4476_v44  ;;  %s2798_s27 = sshll.u32 %s3619_s28, 4  ;;  %s2799_s27 = int_to_ptr.vmem [resolvable:$true] %s2798_s27 }
0x294b   :  { %p3553_p7 = scmp.lt.s32.totalorder %s2799_s27, %s2799_s27 }
0x29b7   :  { %v2733_v3 = vpop.permute.xlu1 %2732 }
0x29b8   :  { %v4445_v41 = vadd.f32 %v2733_v3, %v3946_v57  ;;  %v762_v57 = vadd.f32 1.0, %v3372_v22  ;;  %v1886_v3 = vsub.f32 0.0, %v1885_v39 }
0x29ba   :  { %v2740_v56 = vadd.f32 %v2738_v61, %v4445_v41  ;;  %v1887_v19 = vmul.f32 1.442695, %v1886_v3  ;;  %v2622_v61 = vsub.f32 0.0, %v2621_v43 }
0x29bb   :  { %v2749_v1 = vpop.permute.xlu1 %2748 }
0x29bc   :  { %v2906_v34 = vmul.f32 -1.442695, %v2740_v56  ;;  %v2623_v46 = vmul.f32 1.442695, %v2622_v61 }
0x29be   :  { %3373 = vpow2.f32 %v2906_v34 }
0x29bf   :  { %3375 = vpow2.f32 %v1519_v51 }
0x29c0   :  { %3377 = vpow2.f32 %v2255_v52 }
0x29c8   :  { %v3374_v55 = vpop.eup %3373 }
0x29c9   :  { %v2744_v6 = vadd.f32 1.0, %v3374_v55  ;;  %v3376_v9 = vpop.eup %3375 }
0x29ca   :  { %v1521_v63 = vadd.f32 1.0, %v3376_v9  ;;  %v3378_v42 = vpop.eup %3377  ;;  %v1524_v5 = vmul.f32 -0.5, %v3376_v9  ;;  %v1527_v15 = vand.u32 2147483647, %v3376_v9 }
0x29cb   :  { %3379 = vrcp.f32 %v2744_v6  ;;  %v2257_v21 = vadd.f32 1.0, %v3378_v42  ;;  %v2260_v12 = vmul.f32 -0.5, %v3378_v42  ;;  %v2263_v25 = vand.u32 2147483647, %v3378_v42 }
0x29cc   :  { %3381 = vlog2.f32 %v762_v57  ;;  %v1525_v58 = vadd.f32 1.0, %v1524_v5  ;;  %vm1528_vm4 = vcmp.lt.f32.partialorder %v1527_v15, 0.0004427343 }
0x29cd   :  { %3383 = vlog2.f32 %v1521_v63  ;;  %v2261_v8 = vadd.f32 1.0, %v2260_v12  ;;  %vm2264_vm6 = vcmp.lt.f32.partialorder %v2263_v25, 0.0004427343 }
0x29ce   :  { %3385 = vlog2.f32 %v2257_v21  ;;  %v1526_v24 = vmul.f32 %v3376_v9, %v1525_v58  ;;  %v1146_v58 = vmax.f32 %v4476_v44, 0.0 }
0x29cf   :  { %v2262_v20 = vmul.f32 %v3378_v42, %v2261_v8  ;;  %v1882_v8 = vmax.f32 %v4481_v28, 0.0 }
0x29d5   :  { %v4449_v49 = vpop.eup %3379 }
0x29d6   :  { %v2751_v48 = vmul.f32 %v4449_v49, %v2749_v1  ;;  %v3382_v11 = vpop.eup %3381 }
0x29d7   :  { %v764_v59 = vmul.f32 0.6931472, %v3382_v11  ;;  %v3384_v62 = vpop.eup %3383 }
0x29d8   :  { %2753 = vrot.lane.b32.xlu0 %v2751_v48, %s3607_s22  ;;  %v1523_v16 = vmul.f32 0.6931472, %v3384_v62  ;;  %v3386_v17 = vpop.eup %3385 }
0x29d9   :  { %v770_v18 = vsel %vm769_vm3, %v767_v14, %v764_v59  ;;  %v2259_v27 = vmul.f32 0.6931472, %v3386_v17 }
0x29da   :  { %v771_v29 = vadd.f32 %v770_v18, %v755_v23  ;;  %v1529_v53 = vsel %vm1528_vm4, %v1526_v24, %v1523_v16 }
0x29db   :  { %v1530_v35 = vadd.f32 %v1529_v53, %v1514_v32  ;;  %v2265_v26 = vsel %vm2264_vm6, %v2262_v20, %v2259_v27  ;;  %v2618_v32 = vmax.f32 %v4486_v54, 0.0 }
0x29dc   :  { %928 = vrot.lane.b32.xlu0 %v4432_v40, %s3618_s15  ;;  %v772_v36 = vsel %vm756_vm5, %v4432_v40, %v771_v29  ;;  %v2266_v33 = vadd.f32 %v2265_v26, %v2250_v2  ;;  %v1149_v40 = vand.u32 2147483647, %v4476_v44  ;;  %v2758_v26 = vsub.f32 1.0, %v4449_v49 }
0x29dd   :  { %v1531_v38 = vsel %vm1515_vm7, %v4437_v30, %v1530_v35 }
0x29de   :  { %v2267_v50 = vsel %vm2251_vm8, %v4442_v37, %v2266_v33  ;;  %v2764_v33 = vmul.f32 %v4449_v49, %v4366_v31 }
0x29e0   :  { %1666 = vrot.lane.b32.xlu0 %v4437_v30, %s3618_s15  ;;  %v1150_v30 = vsub.f32 0.0, %v1149_v40 }
0x29e4   :  { %2402 = vrot.lane.b32.xlu0 %v4442_v37, %s3618_s15  ;;  %v1151_v37 = vmul.f32 1.442695, %v1150_v30 }
0x29e6   :  { %3387 = vpow2.f32 %v1151_v37 }
0x29e7   :  { %3389 = vpow2.f32 %v1887_v19 }
0x29e8   :  { %934 = vrot.lane.b32.xlu0 %v772_v36, %s3618_s15  ;;  %3391 = vpow2.f32 %v2623_v46 }
0x29ec   :  { %1671 = vrot.lane.b32.xlu0 %v1531_v38, %s3618_s15 }
0x29f0   :  { %2407 = vrot.lane.b32.xlu0 %v2267_v50, %s3618_s15  ;;  %v3388_v4 = vpop.eup %3387 }
0x29f1   :  { %v1153_v34 = vadd.f32 1.0, %v3388_v4  ;;  %v3390_v51 = vpop.eup %3389  ;;  %v1156_v6 = vmul.f32 -0.5, %v3388_v4  ;;  %v1159_v21 = vand.u32 2147483647, %v3388_v4 }
0x29f2   :  { %v1889_v13 = vadd.f32 1.0, %v3390_v51  ;;  %v3392_v45 = vpop.eup %3391  ;;  %v1892_v42 = vmul.f32 -0.5, %v3390_v51  ;;  %v1895_v0 = vand.u32 2147483647, %v3390_v51 }
0x29f3   :  { %v2625_v22 = vadd.f32 1.0, %v3392_v45  ;;  %v1157_v63 = vadd.f32 1.0, %v1156_v6  ;;  %v2628_v5 = vmul.f32 -0.5, %v3392_v45  ;;  %vm1160_vm11 = vcmp.lt.f32.partialorder %v1159_v21, 0.0004427343 }
0x29f4   :  { %v1893_v7 = vadd.f32 1.0, %v1892_v42  ;;  %vm1896_vm12 = vcmp.lt.f32.partialorder %v1895_v0, 0.0004427343  ;;  %v2631_v17 = vand.u32 2147483647, %v3392_v45 }
0x29f5   :  { %v1158_v11 = vmul.f32 %v3388_v4, %v1157_v63  ;;  %v2629_v18 = vadd.f32 1.0, %v2628_v5 }
0x29f6   :  { %v1894_v15 = vmul.f32 %v3390_v51, %v1893_v7  ;;  %vm2632_vm14 = vcmp.lt.f32.partialorder %v2631_v17, 0.0004427343 }
0x29f7   :  { %v2630_v29 = vmul.f32 %v3392_v45, %v2629_v18 }
0x2a4a   :  { %v2754_v60 = vpop.permute.xlu0 %2753 }
0x2a4b   :  { %v2756_v56 = vadd.f32 %v2754_v60, %v4445_v41 }
0x2a4d   :  { %3393 = vtanh.f32 %v2756_v56 }
0x2a4e   :  { %v929_v47 = vpop.permute.xlu0 %928  ;;  %3395 = vlog2.f32 %v1153_v34 }
0x2a4f   :  { %932 = vst.msk [vmem:[#allocation14] sm:$0xff] %vm931_vm9, %v929_v47  ;;  %3397 = vlog2.f32 %v1889_v13 }
0x2a50   :  { %3399 = vlog2.f32 %v2625_v22 }
0x2a52   :  { %v1667_v52 = vpop.permute.xlu0 %1666 }
0x2a53   :  { %1669 = vst.msk [vmem:[#allocation14 + $0x10] sm:$0xff] %vm931_vm9, %v1667_v52 }
0x2a56   :  { %v2403_v55 = vpop.permute.xlu0 %2402 }
0x2a57   :  { %v3394_v57 = vpop.eup %3393  ;;  %2405 = vst.msk [vmem:[#allocation14 + $0x20] sm:$0xff] %vm931_vm9, %v2403_v55 }
0x2a58   :  { %2760 = vrot.lane.b32.xlu1 %v3394_v57, %s3616_s29  ;;  %v3396_v41 = vpop.eup %3395 }
0x2a59   :  { %v1155_v1 = vmul.f32 0.6931472, %v3396_v41  ;;  %v3398_v48 = vpop.eup %3397 }
0x2a5a   :  { %v935_v9 = vpop.permute.xlu0 %934  ;;  %v1891_v62 = vmul.f32 0.6931472, %v3398_v48  ;;  %v3400_v14 = vpop.eup %3399 }
0x2a5b   :  { %938 = vst.msk [vmem:[#allocation14] sm:$0xff] %vm937_vm10, %v935_v9  ;;  %v1161_v59 = vsel %vm1160_vm11, %v1158_v11, %v1155_v1  ;;  %v2627_v24 = vmul.f32 0.6931472, %v3400_v14 }
0x2a5c   :  { %1298 = vrot.lane.b32.xlu1 %v4476_v44, %s3618_s15  ;;  %v1162_v16 = vadd.f32 %v1161_v59, %v1146_v58  ;;  %v1897_v23 = vsel %vm1896_vm12, %v1894_v15, %v1891_v62 }
0x2a5d   :  { %v1898_v53 = vadd.f32 %v1897_v23, %v1882_v8  ;;  %v2633_v27 = vsel %vm2632_vm14, %v2630_v29, %v2627_v24 }
0x2a5e   :  { %v1672_v10 = vpop.permute.xlu0 %1671  ;;  %v1163_v25 = vsel %vm1147_vm13, %v4476_v44, %v1162_v16  ;;  %v2634_v36 = vadd.f32 %v2633_v27, %v2618_v32 }
0x2a5f   :  { %1674 = vst.msk [vmem:[#allocation14 + $0x10] sm:$0xff] %vm937_vm10, %v1672_v10  ;;  %v1899_v20 = vsel %vm1883_vm15, %v4481_v28, %v1898_v53 }
0x2a60   :  { %2034 = vrot.lane.b32.xlu1 %v4481_v28, %s3618_s15  ;;  %v2635_v35 = vsel %vm2619_vm0, %v4486_v54, %v2634_v36 }
0x2a62   :  { %v2408_v12 = vpop.permute.xlu0 %2407 }
0x2a63   :  { %2410 = vst.msk [vmem:[#allocation14 + $0x20] sm:$0xff] %vm937_vm10, %v2408_v12 }
0x2a64   :  { %2770 = vrot.lane.b32.xlu1 %v4486_v54, %s3618_s15 }
0x2a68   :  { %1303 = vrot.lane.b32.xlu1 %v1163_v25, %s3618_s15 }
0x2a6c   :  { %2039 = vrot.lane.b32.xlu1 %v1899_v20, %s3618_s15 }
0x2a70   :  { %2775 = vrot.lane.b32.xlu1 %v2635_v35, %s3618_s15 }
0x2aca   :  { %v2761_v2 = vpop.permute.xlu1 %2760 }
0x2acb   :  { %v2763_v38 = vmul.f32 %v2761_v2, %v2758_v26 }
0x2acd   :  { %v2765_v50 = vadd.f32 %v2764_v33, %v2763_v38 }
0x2ace   :  { %v1299_v44 = vpop.permute.xlu1 %1298 }
0x2acf   :  { %1301 = vst.msk [vmem:[#allocation14 + $0x8] sm:$0xff] %vm931_vm9, %v1299_v44  ;;  %2780 = vrot.lane.b32.xlu1 %v2765_v50, %s3607_s22  ;;  %2788 = vrot.lane.b32.xlu0 %v2765_v50, %s3616_s29  ;;  %s3548_s22 = scalar_lea.vmem %s2799_s27, 768 }
0x2ad0   :  { %p3549_p6 = scmp.ne.s32.totalorder %s2799_s27, %s3548_s22  ;;  %p3554_p8 = scmp.lt.s32.totalorder %s3548_s22, %s3548_s22 }
0x2ad2   :  { %v2035_v40 = vpop.permute.xlu1 %2034  ;;  %p3555_p9 = por %p3554_p8, %p3553_p7 }
0x2ad3   :  { %2037 = vst.msk [vmem:[#allocation14 + $0x18] sm:$0xff] %vm931_vm9, %v2035_v40 }
0x2ad4   :  { %p3556_p10 = pnand %p3555_p9, %p3549_p6 }
0x2ad6   :  { %v2771_v28 = vpop.permute.xlu1 %2770 }
0x2ad7   :  { %2773 = vst.msk [vmem:[#allocation14 + $0x28] sm:$0xff] %vm931_vm9, %v2771_v28 }
0x2ada   :  { %v1304_v30 = vpop.permute.xlu1 %1303 }
0x2adb   :  { %1306 = vst.msk [vmem:[#allocation14 + $0x8] sm:$0xff] %vm937_vm10, %v1304_v30 }
0x2ade   :  { %v2040_v31 = vpop.permute.xlu1 %2039 }
0x2adf   :  { %2042 = vst.msk [vmem:[#allocation14 + $0x18] sm:$0xff] %vm937_vm10, %v2040_v31 }
0x2ae2   :  { %v2776_v49 = vpop.permute.xlu1 %2775 }
0x2ae3   :  { %2778 = vst.msk [vmem:[#allocation14 + $0x28] sm:$0xff] %vm937_vm10, %v2776_v49 }
0x2ae4   :  { %3559 = shalt.err (!%p3556_p10)
}
0x2ae5   :  { %s3560_s4 = scalar_lea.hbm %s4573_s19, 768 }
0x2ae6   :  { %p3561_p11 = scmp.ne.s32.totalorder %s4573_s19, %s3560_s4  ;;  %p3564_p12 = scmp.lt.u32.totalorder %s3560_s4, %s4573_s19 }
0x2ae8   :  { %p3566_p13 = pnand %p3564_p12, %p3561_p11 }
0x2aea   :  { %3569 = shalt.err (!%p3566_p13)
}
0x2aeb   :  { %s3620_s5 = smov 128   ;;  %s3621_s30 = smov 8   ;;  %vm2791_vm1 = vcmask 523520  }
0x2aec   :  { %2804 = dma.vmem_to_hbm [thread:$0]  %s2799_s27, 768, %s4573_s19, [#allocation5], %s3620_s5, %s3620_s5, %s3621_s30  }
0x2aed   :  { %s3622_s13 = smov [#allocation15]  }
0x2aee   :  { %s2811_s2 = sshll.u32 %s3622_s13, 4  ;;  %s2812_s2 = int_to_ptr.vmem [resolvable:$true] %s2811_s2 }
0x2aef   :  { %s3570_s9 = scalar_lea.vmem %s2812_s2, 128  ;;  %p3575_p1 = scmp.lt.s32.totalorder %s2812_s2, %s2812_s2 }
0x2af0   :  { %p3571_p0 = scmp.ne.s32.totalorder %s2812_s2, %s3570_s9  ;;  %p3576_p2 = scmp.lt.s32.totalorder %s3570_s9, %s3570_s9 }
0x2af2   :  { %p3577_p3 = por %p3576_p2, %p3575_p1 }
0x2af4   :  { %p3578_p4 = pnand %p3577_p3, %p3571_p0 }
0x2b41   :  { %v2781_v39 = vpop.permute.xlu1 %2780  ;;  %v2789_v54 = vpop.permute.xlu0 %2788 }
0x2b42   :  { %2783 = vst.msk [vmem:[#allocation2] sm:$0xff] %vm329_vm2, %v2781_v39 }
0x2b43   :  { %2792 = vst.msk [vmem:[#allocation15] sm:$0xff] %vm2791_vm1, %v2789_v54 }
0x2b44   :  { %3581 = shalt.err (!%p3578_p4)
}
0x2b45   :  { %s3582_s19 = scalar_lea.hbm %s4574_s20, 128 }
0x2b46   :  { %p3583_p5 = scmp.ne.s32.totalorder %s4574_s20, %s3582_s19  ;;  %p3586_p6 = scmp.lt.u32.totalorder %s3582_s19, %s4574_s20 }
0x2b48   :  { %p3588_p7 = pnand %p3586_p6, %p3583_p5 }
0x2b4a   :  { %3591 = shalt.err (!%p3588_p7)
}
0x2b4b   :  { %2814 = dma.vmem_to_hbm [thread:$0]  %s2812_s2, 128, %s4574_s20, [#allocation16]  }
0x2b4c   :  { %3600 = dma.done.wait [#allocation5], 768  }
0x2b4d   :  { %3601 = vsyncadd [#allocation5], 4294966528 }
0x2b4e   :  { %3602 = dma.done.wait [#allocation16], 128  }
0x2b4f   :  { %3603 = vsyncadd [#allocation16], 4294967168 }
0x2b50   :  { %2821 = vsyncpa [#allocation4], 1 }
0x2b51   :  { %2822 = vsyncpa [#allocation7], 1 }
0x2b52   :  { %2823 = vsyncpa [#allocation10], 1 }
0x2b53   :  { %2824 = vsyncpa [#allocation13], 1 }
0x2b54   :  { %2825 = vsyncpa [#allocation5], 1 }
0x2b55   :  { %2826 = vsyncpa [#allocation16], 1 }

</bundles_post_ra>
